<compile_context>
chip_gen: v7x
topology: tpu7x:2x2x1
jax: 0.10.0
libtpu: 0.0.40
codegen_flags: <defaults>
</compile_context>

<pallas_src>
import math
import functools

import jax
import jax.numpy as jnp
from jax.experimental import pallas as pl
from jax.experimental.pallas import tpu as pltpu

# ---- model hyper-parameters (small, synthetic) ----
N_LAYERS = 2
D_MODEL = 32
N_HEADS = 4
D_K = D_MODEL // N_HEADS
D_FF = 64
SRC_VOCAB = 11
TGT_VOCAB = 11
EPS = 1e-6        # LayerNorm eps of the Annotated Transformer
NEG_INF = -1e9    # masked_fill value (applied additively here)
LANES = 128
SUBLANES = 8


def _vmem():
    return pl.BlockSpec(memory_space=pltpu.MemorySpace.VMEM)


def _pad8(n):
    return ((n + SUBLANES - 1) // SUBLANES) * SUBLANES


# ----------------------- in-kernel building blocks -----------------------

def _layernorm(x, g, b):
    # Annotated-Transformer LayerNorm: a_2 * (x - mean) / (std + eps) + b_2
    # (torch.std is unbiased -> divide by n-1). Divide replaced by an EUP
    # reciprocal multiply per the review.
    mean = jnp.mean(x, axis=-1, keepdims=True)
    var = jnp.sum((x - mean) ** 2, axis=-1, keepdims=True) * (1.0 / (x.shape[-1] - 1))
    inv = pl.reciprocal(jnp.sqrt(var) + EPS, approx=True)
    return g * (x - mean) * inv + b


def _split_heads(x, T):
    # [B*T, D] -> [H*B, T, D_K]: static lane split + stack on a new leading
    # (major) axis, then trivial leading-dim reshapes.  Head/batch order of the
    # merged leading dim is (h * B + b).
    B = x.shape[0] // T
    xh = jnp.stack(jnp.split(x, N_HEADS, axis=1), axis=0)     # [H, B*T, D_K]
    return xh.reshape(N_HEADS * B, T, D_K)


def _merge_heads(x, B, T):
    # [H*B, T, D_K] -> [B*T, D] with heads back in lane order h*D_K + d.
    xh = x.reshape(N_HEADS, B * T, D_K)
    return jnp.concatenate([xh[h] for h in range(N_HEADS)], axis=-1)


def _mha(x_q, x_kv, wqkv, bqkv, wo, bo, bias, B, Tq, Tk, self_attn):
    """All-heads attention on flattened activations.

    x_q: [B*Tq, D], x_kv: [B*Tk, D]; wqkv [D, 3D], bqkv [1, 3D], wo [D, D],
    bo [1, D]; bias: additive mask bias broadcastable against [H*B, Tq, Tk].
    The 1/sqrt(D_K) score scale is folded into the Q columns of wqkv/bqkv.
    Returns the attention output [B*Tq, D] (residual added by the caller).
    """
    D = D_MODEL
    if self_attn:
        qkv = jnp.dot(x_q, wqkv, preferred_element_type=jnp.float32) + bqkv
        q, k, v = qkv[:, :D], qkv[:, D:2 * D], qkv[:, 2 * D:]
    else:
        # cross attention: Q from decoder stream, fused K/V from encoder memory
        q = jnp.dot(x_q, wqkv[:, :D],
                    preferred_element_type=jnp.float32) + bqkv[:, :D]
        kv = jnp.dot(x_kv, wqkv[:, D:],
                     preferred_element_type=jnp.float32) + bqkv[:, D:]
        k, v = kv[:, :D], kv[:, D:]

    qh = _split_heads(q, Tq)                                   # [H*B, Tq, Dk]
    kh = _split_heads(k, Tk)                                   # [H*B, Tk, Dk]
    vh = _split_heads(v, Tk)                                   # [H*B, Tk, Dk]

    s = jnp.einsum("bqd,bkd->bqk", qh, kh,
                   preferred_element_type=jnp.float32)         # [H*B, Tq, Tk]
    s = s + bias                                               # additive mask
    s = s - jnp.max(s, axis=-1, keepdims=True)
    p = jnp.exp(s)
    p = p * pl.reciprocal(jnp.sum(p, axis=-1, keepdims=True), approx=True)
    o = jnp.einsum("bqk,bkd->bqd", p, vh,
                   preferred_element_type=jnp.float32)         # [H*B, Tq, Dk]
    o = _merge_heads(o, B, Tq)                                 # [B*Tq, D]
    return jnp.dot(o, wo, preferred_element_type=jnp.float32) + bo


def _ffn(x, w1, b1, w2, b2):
    # PositionwiseFeedForward (dropout is identity in eval)
    h = jnp.dot(x, w1, preferred_element_type=jnp.float32) + b1
    h = jnp.maximum(h, 0.0)
    return jnp.dot(h, w2, preferred_element_type=jnp.float32) + b2


# --------------------------- the fused kernel ---------------------------

def _fused_forward_kernel(slab_ref, src_ref, tgt_ref, smask_ref, tmask_ref,
                          out_ref, *, layout, B, S, T):
    D = D_MODEL
    H = N_HEADS

    def P(name, rows=None):
        r0, r, c = layout[name]
        if rows is not None:
            r = rows
        return slab_ref[r0:r0 + r, 0:c]          # static slice of the VMEM slab

    # --- additive mask biases, built ONCE and reused by every attention block
    sbias = jnp.where(smask_ref[...] == 0.0, NEG_INF, 0.0)          # [B, 1, S]
    sbias = jnp.broadcast_to(sbias[None], (H, B, 1, S)).reshape(H * B, 1, S)
    tbias = jnp.where(tmask_ref[...] == 0.0, NEG_INF, 0.0)          # [B, T, T]
    tbias = jnp.broadcast_to(tbias[None], (H, B, T, T)).reshape(H * B, T, T)

    # --- embeddings: in-kernel one-hot matmul; sqrt(D_MODEL) folded into tables
    svp = _pad8(SRC_VOCAB)
    src_oh = (src_ref[...] ==
              jax.lax.broadcasted_iota(jnp.int32, (B * S, svp), 1)
              ).astype(jnp.float32)
    x = jnp.dot(src_oh, P("src_emb", svp), preferred_element_type=jnp.float32)
    x = (x.reshape(B, S, D) + P("pe", S)[None, :, :]).reshape(B * S, D)

    tvp = _pad8(TGT_VOCAB)
    tgt_oh = (tgt_ref[...] ==
              jax.lax.broadcasted_iota(jnp.int32, (B * T, tvp), 1)
              ).astype(jnp.float32)
    y = jnp.dot(tgt_oh, P("tgt_emb", tvp), preferred_element_type=jnp.float32)
    y = (y.reshape(B, T, D) + P("pe", T)[None, :, :]).reshape(B * T, D)

    # ------------------------------ encoder ------------------------------
    for i in range(N_LAYERS):
        p = f"enc{i}."
        nx = _layernorm(x, P(p + "ln1.g"), P(p + "ln1.b"))
        x = x + _mha(nx, nx, P(p + "attn.wqkv"), P(p + "attn.bqkv"),
                     P(p + "attn.wo"), P(p + "attn.bo"),
                     sbias, B, S, S, self_attn=True)
        nx = _layernorm(x, P(p + "ln2.g"), P(p + "ln2.b"))
        x = x + _ffn(nx, P(p + "ffn.w1"), P(p + "ffn.b1"),
                     P(p + "ffn.w2"), P(p + "ffn.b2"))
    memory = _layernorm(x, P("enc_norm.g"), P("enc_norm.b"))

    # ------------------------------ decoder ------------------------------
    for i in range(N_LAYERS):
        p = f"dec{i}."
        ny = _layernorm(y, P(p + "ln1.g"), P(p + "ln1.b"))
        y = y + _mha(ny, ny, P(p + "self_attn.wqkv"), P(p + "self_attn.bqkv"),
                     P(p + "self_attn.wo"), P(p + "self_attn.bo"),
                     tbias, B, T, T, self_attn=True)
        ny = _layernorm(y, P(p + "ln2.g"), P(p + "ln2.b"))
        y = y + _mha(ny, memory, P(p + "src_attn.wqkv"), P(p + "src_attn.bqkv"),
                     P(p + "src_attn.wo"), P(p + "src_attn.bo"),
                     sbias, B, T, S, self_attn=False)
        ny = _layernorm(y, P(p + "ln3.g"), P(p + "ln3.b"))
        y = y + _ffn(ny, P(p + "ffn.w1"), P(p + "ffn.b1"),
                     P(p + "ffn.w2"), P(p + "ffn.b2"))
    y = _layernorm(y, P("dec_norm.g"), P("dec_norm.b"))

    out_ref[...] = y.reshape(B, T, D)


# ----------------------------- model pieces -----------------------------

def positional_encoding(max_len, d_model):
    pos = jnp.arange(max_len, dtype=jnp.float32)[:, None]
    div = jnp.exp(jnp.arange(0, d_model, 2, dtype=jnp.float32)
                  * (-math.log(10000.0) / d_model))
    pe = jnp.zeros((max_len, d_model), jnp.float32)
    pe = pe.at[:, 0::2].set(jnp.sin(pos * div))
    pe = pe.at[:, 1::2].set(jnp.cos(pos * div))
    return pe


def init_params(key):
    keys = jax.random.split(key, 64)
    it = iter(keys)

    def lin(d_in, d_out):
        w = jax.random.normal(next(it), (d_in, d_out), jnp.float32) * 0.02
        b = jnp.zeros((1, d_out), jnp.float32)
        return {"w": w, "b": b}

    def ln():
        return {"g": jnp.ones((1, D_MODEL), jnp.float32),
                "b": jnp.zeros((1, D_MODEL), jnp.float32)}

    def attn():
        wqkv = jax.random.normal(next(it), (D_MODEL, 3 * D_MODEL),
                                 jnp.float32) * 0.02
        return {"wqkv": wqkv,
                "bqkv": jnp.zeros((1, 3 * D_MODEL), jnp.float32),
                "wo": jax.random.normal(next(it), (D_MODEL, D_MODEL),
                                        jnp.float32) * 0.02,
                "bo": jnp.zeros((1, D_MODEL), jnp.float32)}

    def ffn():
        return {"w1": jax.random.normal(next(it), (D_MODEL, D_FF),
                                        jnp.float32) * 0.02,
                "b1": jnp.zeros((1, D_FF), jnp.float32),
                "w2": jax.random.normal(next(it), (D_FF, D_MODEL),
                                        jnp.float32) * 0.02,
                "b2": jnp.zeros((1, D_MODEL), jnp.float32)}

    return {
        "src_emb": jax.random.normal(next(it), (SRC_VOCAB, D_MODEL),
                                     jnp.float32) * 0.02,
        "tgt_emb": jax.random.normal(next(it), (TGT_VOCAB, D_MODEL),
                                     jnp.float32) * 0.02,
        "enc_layers": [{"ln1": ln(), "attn": attn(), "ln2": ln(), "ffn": ffn()}
                       for _ in range(N_LAYERS)],
        "enc_norm": ln(),
        "dec_layers": [{"ln1": ln(), "self_attn": attn(), "ln2": ln(),
                        "src_attn": attn(), "ln3": ln(), "ffn": ffn()}
                       for _ in range(N_LAYERS)],
        "dec_norm": ln(),
        # generator exists on the module but forward() never applies it
        "generator": lin(D_MODEL, TGT_VOCAB),
    }


def pack_params(params, pe, max_seq):
    """Pack every forward-pass weight into a single f32 [rows, 128] slab.

    Folds sqrt(D_MODEL) into the embedding tables and 1/sqrt(D_K) into the Q
    columns of each fused QKV projection.  Each entry is padded to an 8-row
    (sublane) boundary and 128 lanes so the in-kernel static slices are
    tile-aligned.  Returns (slab, layout) with layout[name] = (row0, rows, cols).
    """
    layout = {}
    parts = []
    row = 0

    def add(name, arr):
        nonlocal row
        arr = jnp.asarray(arr, jnp.float32)
        r, c = arr.shape
        rp = _pad8(r)
        parts.append(jnp.pad(arr, ((0, rp - r), (0, LANES - c))))
        layout[name] = (row, r, c)
        row += rp

    emb_scale = math.sqrt(D_MODEL)
    q_scale = 1.0 / math.sqrt(D_K)

    add("src_emb", params["src_emb"] * emb_scale)
    add("tgt_emb", params["tgt_emb"] * emb_scale)
    add("pe", pe[:max_seq])

    def add_ln(prefix, lnp):
        add(prefix + ".g", lnp["g"])
        add(prefix + ".b", lnp["b"])

    def add_attn(prefix, ap):
        add(prefix + ".wqkv", ap["wqkv"].at[:, :D_MODEL].multiply(q_scale))
        add(prefix + ".bqkv", ap["bqkv"].at[:, :D_MODEL].multiply(q_scale))
        add(prefix + ".wo", ap["wo"])
        add(prefix + ".bo", ap["bo"])

    def add_ffn(prefix, fp):
        add(prefix + ".w1", fp["w1"])
        add(prefix + ".b1", fp["b1"])
        add(prefix + ".w2", fp["w2"])
        add(prefix + ".b2", fp["b2"])

    for i, lp in enumerate(params["enc_layers"]):
        add_ln(f"enc{i}.ln1", lp["ln1"])
        add_attn(f"enc{i}.attn", lp["attn"])
        add_ln(f"enc{i}.ln2", lp["ln2"])
        add_ffn(f"enc{i}.ffn", lp["ffn"])
    add_ln("enc_norm", params["enc_norm"])
    for i, lp in enumerate(params["dec_layers"]):
        add_ln(f"dec{i}.ln1", lp["ln1"])
        add_attn(f"dec{i}.self_attn", lp["self_attn"])
        add_ln(f"dec{i}.ln2", lp["ln2"])
        add_attn(f"dec{i}.src_attn", lp["src_attn"])
        add_ln(f"dec{i}.ln3", lp["ln3"])
        add_ffn(f"dec{i}.ffn", lp["ffn"])
    add_ln("dec_norm", params["dec_norm"])

    return jnp.concatenate(parts, axis=0), layout


def encoder_decoder_forward(layout, slab, src, tgt, src_mask, tgt_mask):
    B, S = src.shape
    T = tgt.shape[1]

    # Token ids as column vectors for the in-kernel one-hot embedding matmul.
    src_ids = src.reshape(B * S, 1).astype(jnp.int32)
    tgt_ids = tgt.reshape(B * T, 1).astype(jnp.int32)
    smask = src_mask[:, 0, :, :].astype(jnp.float32)     # [B, 1, S]
    tmask = tgt_mask[:, 0, :, :].astype(jnp.float32)     # [B, T, T]

    kernel = functools.partial(_fused_forward_kernel,
                               layout=layout, B=B, S=S, T=T)
    # TODO(synk): at larger batch sizes, add a grid over batch with
    # dimension_semantics=("parallel",) so v7x's two TensorCores share the work.
    return pl.pallas_call(
        kernel,
        out_shape=jax.ShapeDtypeStruct((B, T, D_MODEL), jnp.float32),
        in_specs=[_vmem()] * 5,
        out_specs=_vmem(),
    )(slab, src_ids, tgt_ids, smask, tmask)


# ----------------------------- main -----------------------------

if __name__ == "__main__":
    key = jax.random.PRNGKey(0)
    pkey, skey, tkey = jax.random.split(key, 3)
    params = init_params(pkey)

    B, S, T = 2, 8, 8
    pe = positional_encoding(64, D_MODEL)
    slab, layout = pack_params(params, pe, max_seq=max(S, T))

    src = jax.random.randint(skey, (B, S), 1, SRC_VOCAB, dtype=jnp.int32)
    tgt = jax.random.randint(tkey, (B, T), 1, TGT_VOCAB, dtype=jnp.int32)
    src_mask = jnp.ones((B, 1, 1, S), dtype=jnp.float32)
    causal = jnp.tril(jnp.ones((T, T), dtype=jnp.float32))
    tgt_mask = jnp.broadcast_to(causal, (B, 1, T, T))

    fwd = jax.jit(functools.partial(encoder_decoder_forward, layout))
    out = fwd(slab, src, tgt, src_mask, tgt_mask)
    out = jax.block_until_ready(out)
    assert out.shape == (B, T, D_MODEL) and out.dtype == jnp.float32
    assert bool(jnp.all(jnp.isfinite(out)))
    print("KERNEL_OK")
</pallas_src>

<mosaic_0001>
module attributes {stable_mosaic.version = 11 : i64} {
  func.func @_fused_forward_kernel(%arg0: memref<1160x128xf32, #tpu.memory_space<vmem>>, %arg1: memref<16x1xi32, #tpu.memory_space<vmem>>, %arg2: memref<16x1xi32, #tpu.memory_space<vmem>>, %arg3: memref<2x1x8xf32, #tpu.memory_space<vmem>>, %arg4: memref<2x8x8xf32, #tpu.memory_space<vmem>>, %arg5: memref<2x8x32xf32, #tpu.memory_space<vmem>>) attributes {dimension_semantics = [], scalar_prefetch = 0 : i64, scratch_operands = 0 : i64, tpu.core_type = #tpu.core_type<tc>} {
    %c0 = arith.constant 0 : index
    %c0_0 = arith.constant 0 : index
    %c0_1 = arith.constant 0 : index
    %0 = vector.load %arg3[%c0, %c0_0, %c0_1] : memref<2x1x8xf32, #tpu.memory_space<vmem>>, vector<2x1x8xf32>
    %cst = arith.constant 0.000000e+00 : f32
    %1 = vector.broadcast %cst : f32 to vector<2x1x8xf32>
    %2 = arith.cmpf oeq, %0, %1 : vector<2x1x8xf32>
    %cst_2 = arith.constant -1.000000e+09 : f32
    %cst_3 = arith.constant 0.000000e+00 : f32
    %3 = vector.broadcast %cst_2 : f32 to vector<2x1x8xf32>
    %4 = vector.broadcast %cst_3 : f32 to vector<2x1x8xf32>
    %5 = arith.select %2, %3, %4 : vector<2x1x8xi1>, vector<2x1x8xf32>
    %6 = vector.shape_cast %5 : vector<2x1x8xf32> to vector<1x2x1x8xf32>
    %7 = vector.shape_cast %6 : vector<1x2x1x8xf32> to vector<1x2x1x8xf32>
    %8 = vector.broadcast %7 : vector<1x2x1x8xf32> to vector<4x2x1x8xf32>
    %9 = vector.shape_cast %8 : vector<4x2x1x8xf32> to vector<8x1x8xf32>
    %c0_4 = arith.constant 0 : index
    %c0_5 = arith.constant 0 : index
    %c0_6 = arith.constant 0 : index
    %10 = vector.load %arg4[%c0_4, %c0_5, %c0_6] : memref<2x8x8xf32, #tpu.memory_space<vmem>>, vector<2x8x8xf32>
    %cst_7 = arith.constant 0.000000e+00 : f32
    %11 = vector.broadcast %cst_7 : f32 to vector<2x8x8xf32>
    %12 = arith.cmpf oeq, %10, %11 : vector<2x8x8xf32>
    %cst_8 = arith.constant -1.000000e+09 : f32
    %cst_9 = arith.constant 0.000000e+00 : f32
    %13 = vector.broadcast %cst_8 : f32 to vector<2x8x8xf32>
    %14 = vector.broadcast %cst_9 : f32 to vector<2x8x8xf32>
    %15 = arith.select %12, %13, %14 : vector<2x8x8xi1>, vector<2x8x8xf32>
    %16 = vector.shape_cast %15 : vector<2x8x8xf32> to vector<1x2x8x8xf32>
    %17 = vector.shape_cast %16 : vector<1x2x8x8xf32> to vector<1x2x8x8xf32>
    %18 = vector.broadcast %17 : vector<1x2x8x8xf32> to vector<4x2x8x8xf32>
    %19 = vector.shape_cast %18 : vector<4x2x8x8xf32> to vector<8x8x8xf32>
    %c0_10 = arith.constant 0 : index
    %c0_11 = arith.constant 0 : index
    %20 = vector.load %arg1[%c0_10, %c0_11] : memref<16x1xi32, #tpu.memory_space<vmem>>, vector<16x1xi32>
    %21 = tpu.iota {dimensions = array<i32: 1>} : vector<16x16xi32>
    %22 = vector.broadcast %20 : vector<16x1xi32> to vector<16x16xi32>
    %23 = arith.cmpi eq, %22, %21 : vector<16x16xi32>
    %24 = arith.extui %23 : vector<16x16xi1> to vector<16x16xi32>
    %25 = arith.sitofp %24 : vector<16x16xi32> to vector<16x16xf32>
    %c0_12 = arith.constant 0 : index
    %c0_13 = arith.constant 0 : index
    %26 = vector.load %arg0[%c0_12, %c0_13] : memref<1160x128xf32, #tpu.memory_space<vmem>>, vector<16x32xf32>
    %cst_14 = arith.constant dense<0.000000e+00> : vector<16x32xf32>
    %27 = tpu.matmul %25, %26, %cst_14 {dimension_numbers = #tpu.dot_dimension_numbers<[1], [0], [0], [1], [0, 0, 1, 1], [], []>} : vector<16x16xf32>, vector<16x32xf32>, vector<16x32xf32> -> vector<16x32xf32>
    %28 = vector.shape_cast %27 : vector<16x32xf32> to vector<2x8x32xf32>
    %c32 = arith.constant 32 : index
    %c0_15 = arith.constant 0 : index
    %29 = vector.load %arg0[%c32, %c0_15] : memref<1160x128xf32, #tpu.memory_space<vmem>>, vector<8x32xf32>
    %30 = vector.shape_cast %29 : vector<8x32xf32> to vector<1x8x32xf32>
    %31 = vector.broadcast %30 : vector<1x8x32xf32> to vector<2x8x32xf32>
    %32 = arith.addf %28, %31 : vector<2x8x32xf32>
    %33 = vector.shape_cast %32 : vector<2x8x32xf32> to vector<16x32xf32>
    %c0_16 = arith.constant 0 : index
    %c0_17 = arith.constant 0 : index
    %34 = vector.load %arg2[%c0_16, %c0_17] : memref<16x1xi32, #tpu.memory_space<vmem>>, vector<16x1xi32>
    %35 = tpu.iota {dimensions = array<i32: 1>} : vector<16x16xi32>
    %36 = vector.broadcast %34 : vector<16x1xi32> to vector<16x16xi32>
    %37 = arith.cmpi eq, %36, %35 : vector<16x16xi32>
    %38 = arith.extui %37 : vector<16x16xi1> to vector<16x16xi32>
    %39 = arith.sitofp %38 : vector<16x16xi32> to vector<16x16xf32>
    %c16 = arith.constant 16 : index
    %c0_18 = arith.constant 0 : index
    %40 = vector.load %arg0[%c16, %c0_18] : memref<1160x128xf32, #tpu.memory_space<vmem>>, vector<16x32xf32>
    %cst_19 = arith.constant dense<0.000000e+00> : vector<16x32xf32>
    %41 = tpu.matmul %39, %40, %cst_19 {dimension_numbers = #tpu.dot_dimension_numbers<[1], [0], [0], [1], [0, 0, 1, 1], [], []>} : vector<16x16xf32>, vector<16x32xf32>, vector<16x32xf32> -> vector<16x32xf32>
    %42 = vector.shape_cast %41 : vector<16x32xf32> to vector<2x8x32xf32>
    %c32_20 = arith.constant 32 : index
    %c0_21 = arith.constant 0 : index
    %43 = vector.load %arg0[%c32_20, %c0_21] : memref<1160x128xf32, #tpu.memory_space<vmem>>, vector<8x32xf32>
    %44 = vector.shape_cast %43 : vector<8x32xf32> to vector<1x8x32xf32>
    %45 = vector.broadcast %44 : vector<1x8x32xf32> to vector<2x8x32xf32>
    %46 = arith.addf %42, %45 : vector<2x8x32xf32>
    %47 = vector.shape_cast %46 : vector<2x8x32xf32> to vector<16x32xf32>
    %c40 = arith.constant 40 : index
    %c0_22 = arith.constant 0 : index
    %48 = vector.load %arg0[%c40, %c0_22] : memref<1160x128xf32, #tpu.memory_space<vmem>>, vector<1x32xf32>
    %c48 = arith.constant 48 : index
    %c0_23 = arith.constant 0 : index
    %49 = vector.load %arg0[%c48, %c0_23] : memref<1160x128xf32, #tpu.memory_space<vmem>>, vector<1x32xf32>
    %cst_24 = arith.constant dense<0.000000e+00> : vector<16xf32>
    %50 = vector.multi_reduction <add>, %33, %cst_24 [1] : vector<16x32xf32> to vector<16xf32>
    %51 = vector.shape_cast %50 : vector<16xf32> to vector<16x1xf32>
    %cst_25 = arith.constant 3.200000e+01 : f32
    %52 = vector.broadcast %cst_25 : f32 to vector<16x1xf32>
    %53 = arith.divf %51, %52 : vector<16x1xf32>
    %54 = vector.broadcast %53 : vector<16x1xf32> to vector<16x32xf32>
    %55 = arith.subf %33, %54 : vector<16x32xf32>
    %56 = arith.mulf %55, %55 : vector<16x32xf32>
    %cst_26 = arith.constant dense<0.000000e+00> : vector<16xf32>
    %57 = vector.multi_reduction <add>, %56, %cst_26 [1] : vector<16x32xf32> to vector<16xf32>
    %58 = vector.shape_cast %57 : vector<16xf32> to vector<16x1xf32>
    %cst_27 = arith.constant 0.0322580636 : f32
    %59 = vector.broadcast %cst_27 : f32 to vector<16x1xf32>
    %60 = arith.mulf %58, %59 : vector<16x1xf32>
    %61 = math.sqrt %60 : vector<16x1xf32>
    %cst_28 = arith.constant 9.99999997E-7 : f32
    %62 = vector.broadcast %cst_28 : f32 to vector<16x1xf32>
    %63 = arith.addf %61, %62 : vector<16x1xf32>
    %64 = tpu.reciprocal %63 {approx = true} : vector<16x1xf32> -> vector<16x1xf32>
    %65 = vector.broadcast %53 : vector<16x1xf32> to vector<16x32xf32>
    %66 = arith.subf %33, %65 : vector<16x32xf32>
    %67 = vector.broadcast %48 : vector<1x32xf32> to vector<16x32xf32>
    %68 = arith.mulf %67, %66 : vector<16x32xf32>
    %69 = vector.broadcast %64 : vector<16x1xf32> to vector<16x32xf32>
    %70 = arith.mulf %68, %69 : vector<16x32xf32>
    %71 = vector.broadcast %49 : vector<1x32xf32> to vector<16x32xf32>
    %72 = arith.addf %70, %71 : vector<16x32xf32>
    %c56 = arith.constant 56 : index
    %c0_29 = arith.constant 0 : index
    %73 = vector.load %arg0[%c56, %c0_29] : memref<1160x128xf32, #tpu.memory_space<vmem>>, vector<32x96xf32>
    %c88 = arith.constant 88 : index
    %c0_30 = arith.constant 0 : index
    %74 = vector.load %arg0[%c88, %c0_30] : memref<1160x128xf32, #tpu.memory_space<vmem>>, vector<1x96xf32>
    %c96 = arith.constant 96 : index
    %c0_31 = arith.constant 0 : index
    %75 = vector.load %arg0[%c96, %c0_31] : memref<1160x128xf32, #tpu.memory_space<vmem>>, vector<32x32xf32>
    %c128 = arith.constant 128 : index
    %c0_32 = arith.constant 0 : index
    %76 = vector.load %arg0[%c128, %c0_32] : memref<1160x128xf32, #tpu.memory_space<vmem>>, vector<1x32xf32>
    %cst_33 = arith.constant dense<0.000000e+00> : vector<16x96xf32>
    %77 = tpu.matmul %72, %73, %cst_33 {dimension_numbers = #tpu.dot_dimension_numbers<[1], [0], [0], [1], [0, 0, 1, 1], [], []>} : vector<16x32xf32>, vector<32x96xf32>, vector<16x96xf32> -> vector<16x96xf32>
    %78 = vector.broadcast %74 : vector<1x96xf32> to vector<16x96xf32>
    %79 = arith.addf %77, %78 : vector<16x96xf32>
    %80 = vector.extract_strided_slice %79 {offsets = [0, 0], sizes = [16, 32], strides = [1, 1]} : vector<16x96xf32> to vector<16x32xf32>
    %81 = vector.extract_strided_slice %79 {offsets = [0, 32], sizes = [16, 32], strides = [1, 1]} : vector<16x96xf32> to vector<16x32xf32>
    %82 = vector.extract_strided_slice %79 {offsets = [0, 64], sizes = [16, 32], strides = [1, 1]} : vector<16x96xf32> to vector<16x32xf32>
    %83 = vector.extract_strided_slice %80 {offsets = [0, 0], sizes = [16, 8], strides = [1, 1]} : vector<16x32xf32> to vector<16x8xf32>
    %84 = vector.extract_strided_slice %80 {offsets = [0, 8], sizes = [16, 8], strides = [1, 1]} : vector<16x32xf32> to vector<16x8xf32>
    %85 = vector.extract_strided_slice %80 {offsets = [0, 16], sizes = [16, 8], strides = [1, 1]} : vector<16x32xf32> to vector<16x8xf32>
    %86 = vector.extract_strided_slice %80 {offsets = [0, 24], sizes = [16, 8], strides = [1, 1]} : vector<16x32xf32> to vector<16x8xf32>
    %87 = vector.shape_cast %83 : vector<16x8xf32> to vector<1x16x8xf32>
    %88 = vector.shape_cast %84 : vector<16x8xf32> to vector<1x16x8xf32>
    %89 = vector.shape_cast %85 : vector<16x8xf32> to vector<1x16x8xf32>
    %90 = vector.shape_cast %86 : vector<16x8xf32> to vector<1x16x8xf32>
    %91 = tpu.concatenate %87, %88, %89, %90 in 0 : vector<1x16x8xf32>, vector<1x16x8xf32>, vector<1x16x8xf32>, vector<1x16x8xf32> -> vector<4x16x8xf32>
    %92 = vector.shape_cast %91 : vector<4x16x8xf32> to vector<8x8x8xf32>
    %93 = vector.extract_strided_slice %81 {offsets = [0, 0], sizes = [16, 8], strides = [1, 1]} : vector<16x32xf32> to vector<16x8xf32>
    %94 = vector.extract_strided_slice %81 {offsets = [0, 8], sizes = [16, 8], strides = [1, 1]} : vector<16x32xf32> to vector<16x8xf32>
    %95 = vector.extract_strided_slice %81 {offsets = [0, 16], sizes = [16, 8], strides = [1, 1]} : vector<16x32xf32> to vector<16x8xf32>
    %96 = vector.extract_strided_slice %81 {offsets = [0, 24], sizes = [16, 8], strides = [1, 1]} : vector<16x32xf32> to vector<16x8xf32>
    %97 = vector.shape_cast %93 : vector<16x8xf32> to vector<1x16x8xf32>
    %98 = vector.shape_cast %94 : vector<16x8xf32> to vector<1x16x8xf32>
    %99 = vector.shape_cast %95 : vector<16x8xf32> to vector<1x16x8xf32>
    %100 = vector.shape_cast %96 : vector<16x8xf32> to vector<1x16x8xf32>
    %101 = tpu.concatenate %97, %98, %99, %100 in 0 : vector<1x16x8xf32>, vector<1x16x8xf32>, vector<1x16x8xf32>, vector<1x16x8xf32> -> vector<4x16x8xf32>
    %102 = vector.shape_cast %101 : vector<4x16x8xf32> to vector<8x8x8xf32>
    %103 = vector.extract_strided_slice %82 {offsets = [0, 0], sizes = [16, 8], strides = [1, 1]} : vector<16x32xf32> to vector<16x8xf32>
    %104 = vector.extract_strided_slice %82 {offsets = [0, 8], sizes = [16, 8], strides = [1, 1]} : vector<16x32xf32> to vector<16x8xf32>
    %105 = vector.extract_strided_slice %82 {offsets = [0, 16], sizes = [16, 8], strides = [1, 1]} : vector<16x32xf32> to vector<16x8xf32>
    %106 = vector.extract_strided_slice %82 {offsets = [0, 24], sizes = [16, 8], strides = [1, 1]} : vector<16x32xf32> to vector<16x8xf32>
    %107 = vector.shape_cast %103 : vector<16x8xf32> to vector<1x16x8xf32>
    %108 = vector.shape_cast %104 : vector<16x8xf32> to vector<1x16x8xf32>
    %109 = vector.shape_cast %105 : vector<16x8xf32> to vector<1x16x8xf32>
    %110 = vector.shape_cast %106 : vector<16x8xf32> to vector<1x16x8xf32>
    %111 = tpu.concatenate %107, %108, %109, %110 in 0 : vector<1x16x8xf32>, vector<1x16x8xf32>, vector<1x16x8xf32>, vector<1x16x8xf32> -> vector<4x16x8xf32>
    %112 = vector.shape_cast %111 : vector<4x16x8xf32> to vector<8x8x8xf32>
    "tpu.trace_start"() <{level = 10 : i32, message = "bqd,bkd->bqk"}> : () -> ()
    %cst_34 = arith.constant dense<0.000000e+00> : vector<8x8x8xf32>
    %113 = tpu.matmul %92, %102, %cst_34 {dimension_numbers = #tpu.dot_dimension_numbers<[2], [2], [1], [1], [0, 0, 0, 1, 1, 1], [0], [0]>} : vector<8x8x8xf32>, vector<8x8x8xf32>, vector<8x8x8xf32> -> vector<8x8x8xf32>
    "tpu.trace_stop"() : () -> ()
    %114 = vector.broadcast %9 : vector<8x1x8xf32> to vector<8x8x8xf32>
    %115 = arith.addf %113, %114 : vector<8x8x8xf32>
    %cst_35 = arith.constant dense<0xFF800000> : vector<8x8xf32>
    %116 = vector.multi_reduction <maximumf>, %115, %cst_35 [2] : vector<8x8x8xf32> to vector<8x8xf32>
    %117 = vector.shape_cast %116 : vector<8x8xf32> to vector<8x8x1xf32>
    %118 = vector.broadcast %117 : vector<8x8x1xf32> to vector<8x8x8xf32>
    %119 = arith.subf %115, %118 : vector<8x8x8xf32>
    %120 = math.exp %119 : vector<8x8x8xf32>
    %cst_36 = arith.constant dense<0.000000e+00> : vector<8x8xf32>
    %121 = vector.multi_reduction <add>, %120, %cst_36 [2] : vector<8x8x8xf32> to vector<8x8xf32>
    %122 = vector.shape_cast %121 : vector<8x8xf32> to vector<8x8x1xf32>
    %123 = tpu.reciprocal %122 {approx = true} : vector<8x8x1xf32> -> vector<8x8x1xf32>
    %124 = vector.broadcast %123 : vector<8x8x1xf32> to vector<8x8x8xf32>
    %125 = arith.mulf %120, %124 : vector<8x8x8xf32>
    "tpu.trace_start"() <{level = 10 : i32, message = "bqk,bkd->bqd"}> : () -> ()
    %cst_37 = arith.constant dense<0.000000e+00> : vector<8x8x8xf32>
    %126 = tpu.matmul %125, %112, %cst_37 {dimension_numbers = #tpu.dot_dimension_numbers<[2], [1], [1], [2], [0, 0, 0, 1, 1, 2], [0], [0]>} : vector<8x8x8xf32>, vector<8x8x8xf32>, vector<8x8x8xf32> -> vector<8x8x8xf32>
    "tpu.trace_stop"() : () -> ()
    %127 = vector.shape_cast %126 : vector<8x8x8xf32> to vector<4x16x8xf32>
    %128 = vector.extract_strided_slice %127 {offsets = [0, 0, 0], sizes = [1, 16, 8], strides = [1, 1, 1]} : vector<4x16x8xf32> to vector<1x16x8xf32>
    %129 = vector.shape_cast %128 : vector<1x16x8xf32> to vector<16x8xf32>
    %130 = vector.extract_strided_slice %127 {offsets = [1, 0, 0], sizes = [1, 16, 8], strides = [1, 1, 1]} : vector<4x16x8xf32> to vector<1x16x8xf32>
    %131 = vector.shape_cast %130 : vector<1x16x8xf32> to vector<16x8xf32>
    %132 = vector.extract_strided_slice %127 {offsets = [2, 0, 0], sizes = [1, 16, 8], strides = [1, 1, 1]} : vector<4x16x8xf32> to vector<1x16x8xf32>
    %133 = vector.shape_cast %132 : vector<1x16x8xf32> to vector<16x8xf32>
    %134 = vector.extract_strided_slice %127 {offsets = [3, 0, 0], sizes = [1, 16, 8], strides = [1, 1, 1]} : vector<4x16x8xf32> to vector<1x16x8xf32>
    %135 = vector.shape_cast %134 : vector<1x16x8xf32> to vector<16x8xf32>
    %136 = tpu.concatenate %129, %131, %133, %135 in 1 : vector<16x8xf32>, vector<16x8xf32>, vector<16x8xf32>, vector<16x8xf32> -> vector<16x32xf32>
    %cst_38 = arith.constant dense<0.000000e+00> : vector<16x32xf32>
    %137 = tpu.matmul %136, %75, %cst_38 {dimension_numbers = #tpu.dot_dimension_numbers<[1], [0], [0], [1], [0, 0, 1, 1], [], []>} : vector<16x32xf32>, vector<32x32xf32>, vector<16x32xf32> -> vector<16x32xf32>
    %138 = vector.broadcast %76 : vector<1x32xf32> to vector<16x32xf32>
    %139 = arith.addf %137, %138 : vector<16x32xf32>
    %140 = arith.addf %33, %139 : vector<16x32xf32>
    %c136 = arith.constant 136 : index
    %c0_39 = arith.constant 0 : index
    %141 = vector.load %arg0[%c136, %c0_39] : memref<1160x128xf32, #tpu.memory_space<vmem>>, vector<1x32xf32>
    %c144 = arith.constant 144 : index
    %c0_40 = arith.constant 0 : index
    %142 = vector.load %arg0[%c144, %c0_40] : memref<1160x128xf32, #tpu.memory_space<vmem>>, vector<1x32xf32>
    %cst_41 = arith.constant dense<0.000000e+00> : vector<16xf32>
    %143 = vector.multi_reduction <add>, %140, %cst_41 [1] : vector<16x32xf32> to vector<16xf32>
    %144 = vector.shape_cast %143 : vector<16xf32> to vector<16x1xf32>
    %cst_42 = arith.constant 3.200000e+01 : f32
    %145 = vector.broadcast %cst_42 : f32 to vector<16x1xf32>
    %146 = arith.divf %144, %145 : vector<16x1xf32>
    %147 = vector.broadcast %146 : vector<16x1xf32> to vector<16x32xf32>
    %148 = arith.subf %140, %147 : vector<16x32xf32>
    %149 = arith.mulf %148, %148 : vector<16x32xf32>
    %cst_43 = arith.constant dense<0.000000e+00> : vector<16xf32>
    %150 = vector.multi_reduction <add>, %149, %cst_43 [1] : vector<16x32xf32> to vector<16xf32>
    %151 = vector.shape_cast %150 : vector<16xf32> to vector<16x1xf32>
    %cst_44 = arith.constant 0.0322580636 : f32
    %152 = vector.broadcast %cst_44 : f32 to vector<16x1xf32>
    %153 = arith.mulf %151, %152 : vector<16x1xf32>
    %154 = math.sqrt %153 : vector<16x1xf32>
    %cst_45 = arith.constant 9.99999997E-7 : f32
    %155 = vector.broadcast %cst_45 : f32 to vector<16x1xf32>
    %156 = arith.addf %154, %155 : vector<16x1xf32>
    %157 = tpu.reciprocal %156 {approx = true} : vector<16x1xf32> -> vector<16x1xf32>
    %158 = vector.broadcast %146 : vector<16x1xf32> to vector<16x32xf32>
    %159 = arith.subf %140, %158 : vector<16x32xf32>
    %160 = vector.broadcast %141 : vector<1x32xf32> to vector<16x32xf32>
    %161 = arith.mulf %160, %159 : vector<16x32xf32>
    %162 = vector.broadcast %157 : vector<16x1xf32> to vector<16x32xf32>
    %163 = arith.mulf %161, %162 : vector<16x32xf32>
    %164 = vector.broadcast %142 : vector<1x32xf32> to vector<16x32xf32>
    %165 = arith.addf %163, %164 : vector<16x32xf32>
    %c152 = arith.constant 152 : index
    %c0_46 = arith.constant 0 : index
    %166 = vector.load %arg0[%c152, %c0_46] : memref<1160x128xf32, #tpu.memory_space<vmem>>, vector<32x64xf32>
    %c184 = arith.constant 184 : index
    %c0_47 = arith.constant 0 : index
    %167 = vector.load %arg0[%c184, %c0_47] : memref<1160x128xf32, #tpu.memory_space<vmem>>, vector<1x64xf32>
    %c192 = arith.constant 192 : index
    %c0_48 = arith.constant 0 : index
    %168 = vector.load %arg0[%c192, %c0_48] : memref<1160x128xf32, #tpu.memory_space<vmem>>, vector<64x32xf32>
    %c256 = arith.constant 256 : index
    %c0_49 = arith.constant 0 : index
    %169 = vector.load %arg0[%c256, %c0_49] : memref<1160x128xf32, #tpu.memory_space<vmem>>, vector<1x32xf32>
    %cst_50 = arith.constant dense<0.000000e+00> : vector<16x64xf32>
    %170 = tpu.matmul %165, %166, %cst_50 {dimension_numbers = #tpu.dot_dimension_numbers<[1], [0], [0], [1], [0, 0, 1, 1], [], []>} : vector<16x32xf32>, vector<32x64xf32>, vector<16x64xf32> -> vector<16x64xf32>
    %171 = vector.broadcast %167 : vector<1x64xf32> to vector<16x64xf32>
    %172 = arith.addf %170, %171 : vector<16x64xf32>
    %cst_51 = arith.constant 0.000000e+00 : f32
    %173 = vector.broadcast %cst_51 : f32 to vector<16x64xf32>
    %174 = arith.maximumf %172, %173 : vector<16x64xf32>
    %cst_52 = arith.constant dense<0.000000e+00> : vector<16x32xf32>
    %175 = tpu.matmul %174, %168, %cst_52 {dimension_numbers = #tpu.dot_dimension_numbers<[1], [0], [0], [1], [0, 0, 1, 1], [], []>} : vector<16x64xf32>, vector<64x32xf32>, vector<16x32xf32> -> vector<16x32xf32>
    %176 = vector.broadcast %169 : vector<1x32xf32> to vector<16x32xf32>
    %177 = arith.addf %175, %176 : vector<16x32xf32>
    %178 = arith.addf %140, %177 : vector<16x32xf32>
    %c264 = arith.constant 264 : index
    %c0_53 = arith.constant 0 : index
    %179 = vector.load %arg0[%c264, %c0_53] : memref<1160x128xf32, #tpu.memory_space<vmem>>, vector<1x32xf32>
    %c272 = arith.constant 272 : index
    %c0_54 = arith.constant 0 : index
    %180 = vector.load %arg0[%c272, %c0_54] : memref<1160x128xf32, #tpu.memory_space<vmem>>, vector<1x32xf32>
    %cst_55 = arith.constant dense<0.000000e+00> : vector<16xf32>
    %181 = vector.multi_reduction <add>, %178, %cst_55 [1] : vector<16x32xf32> to vector<16xf32>
    %182 = vector.shape_cast %181 : vector<16xf32> to vector<16x1xf32>
    %cst_56 = arith.constant 3.200000e+01 : f32
    %183 = vector.broadcast %cst_56 : f32 to vector<16x1xf32>
    %184 = arith.divf %182, %183 : vector<16x1xf32>
    %185 = vector.broadcast %184 : vector<16x1xf32> to vector<16x32xf32>
    %186 = arith.subf %178, %185 : vector<16x32xf32>
    %187 = arith.mulf %186, %186 : vector<16x32xf32>
    %cst_57 = arith.constant dense<0.000000e+00> : vector<16xf32>
    %188 = vector.multi_reduction <add>, %187, %cst_57 [1] : vector<16x32xf32> to vector<16xf32>
    %189 = vector.shape_cast %188 : vector<16xf32> to vector<16x1xf32>
    %cst_58 = arith.constant 0.0322580636 : f32
    %190 = vector.broadcast %cst_58 : f32 to vector<16x1xf32>
    %191 = arith.mulf %189, %190 : vector<16x1xf32>
    %192 = math.sqrt %191 : vector<16x1xf32>
    %cst_59 = arith.constant 9.99999997E-7 : f32
    %193 = vector.broadcast %cst_59 : f32 to vector<16x1xf32>
    %194 = arith.addf %192, %193 : vector<16x1xf32>
    %195 = tpu.reciprocal %194 {approx = true} : vector<16x1xf32> -> vector<16x1xf32>
    %196 = vector.broadcast %184 : vector<16x1xf32> to vector<16x32xf32>
    %197 = arith.subf %178, %196 : vector<16x32xf32>
    %198 = vector.broadcast %179 : vector<1x32xf32> to vector<16x32xf32>
    %199 = arith.mulf %198, %197 : vector<16x32xf32>
    %200 = vector.broadcast %195 : vector<16x1xf32> to vector<16x32xf32>
    %201 = arith.mulf %199, %200 : vector<16x32xf32>
    %202 = vector.broadcast %180 : vector<1x32xf32> to vector<16x32xf32>
    %203 = arith.addf %201, %202 : vector<16x32xf32>
    %c280 = arith.constant 280 : index
    %c0_60 = arith.constant 0 : index
    %204 = vector.load %arg0[%c280, %c0_60] : memref<1160x128xf32, #tpu.memory_space<vmem>>, vector<32x96xf32>
    %c312 = arith.constant 312 : index
    %c0_61 = arith.constant 0 : index
    %205 = vector.load %arg0[%c312, %c0_61] : memref<1160x128xf32, #tpu.memory_space<vmem>>, vector<1x96xf32>
    %c320 = arith.constant 320 : index
    %c0_62 = arith.constant 0 : index
    %206 = vector.load %arg0[%c320, %c0_62] : memref<1160x128xf32, #tpu.memory_space<vmem>>, vector<32x32xf32>
    %c352 = arith.constant 352 : index
    %c0_63 = arith.constant 0 : index
    %207 = vector.load %arg0[%c352, %c0_63] : memref<1160x128xf32, #tpu.memory_space<vmem>>, vector<1x32xf32>
    %cst_64 = arith.constant dense<0.000000e+00> : vector<16x96xf32>
    %208 = tpu.matmul %203, %204, %cst_64 {dimension_numbers = #tpu.dot_dimension_numbers<[1], [0], [0], [1], [0, 0, 1, 1], [], []>} : vector<16x32xf32>, vector<32x96xf32>, vector<16x96xf32> -> vector<16x96xf32>
    %209 = vector.broadcast %205 : vector<1x96xf32> to vector<16x96xf32>
    %210 = arith.addf %208, %209 : vector<16x96xf32>
    %211 = vector.extract_strided_slice %210 {offsets = [0, 0], sizes = [16, 32], strides = [1, 1]} : vector<16x96xf32> to vector<16x32xf32>
    %212 = vector.extract_strided_slice %210 {offsets = [0, 32], sizes = [16, 32], strides = [1, 1]} : vector<16x96xf32> to vector<16x32xf32>
    %213 = vector.extract_strided_slice %210 {offsets = [0, 64], sizes = [16, 32], strides = [1, 1]} : vector<16x96xf32> to vector<16x32xf32>
    %214 = vector.extract_strided_slice %211 {offsets = [0, 0], sizes = [16, 8], strides = [1, 1]} : vector<16x32xf32> to vector<16x8xf32>
    %215 = vector.extract_strided_slice %211 {offsets = [0, 8], sizes = [16, 8], strides = [1, 1]} : vector<16x32xf32> to vector<16x8xf32>
    %216 = vector.extract_strided_slice %211 {offsets = [0, 16], sizes = [16, 8], strides = [1, 1]} : vector<16x32xf32> to vector<16x8xf32>
    %217 = vector.extract_strided_slice %211 {offsets = [0, 24], sizes = [16, 8], strides = [1, 1]} : vector<16x32xf32> to vector<16x8xf32>
    %218 = vector.shape_cast %214 : vector<16x8xf32> to vector<1x16x8xf32>
    %219 = vector.shape_cast %215 : vector<16x8xf32> to vector<1x16x8xf32>
    %220 = vector.shape_cast %216 : vector<16x8xf32> to vector<1x16x8xf32>
    %221 = vector.shape_cast %217 : vector<16x8xf32> to vector<1x16x8xf32>
    %222 = tpu.concatenate %218, %219, %220, %221 in 0 : vector<1x16x8xf32>, vector<1x16x8xf32>, vector<1x16x8xf32>, vector<1x16x8xf32> -> vector<4x16x8xf32>
    %223 = vector.shape_cast %222 : vector<4x16x8xf32> to vector<8x8x8xf32>
    %224 = vector.extract_strided_slice %212 {offsets = [0, 0], sizes = [16, 8], strides = [1, 1]} : vector<16x32xf32> to vector<16x8xf32>
    %225 = vector.extract_strided_slice %212 {offsets = [0, 8], sizes = [16, 8], strides = [1, 1]} : vector<16x32xf32> to vector<16x8xf32>
    %226 = vector.extract_strided_slice %212 {offsets = [0, 16], sizes = [16, 8], strides = [1, 1]} : vector<16x32xf32> to vector<16x8xf32>
    %227 = vector.extract_strided_slice %212 {offsets = [0, 24], sizes = [16, 8], strides = [1, 1]} : vector<16x32xf32> to vector<16x8xf32>
    %228 = vector.shape_cast %224 : vector<16x8xf32> to vector<1x16x8xf32>
    %229 = vector.shape_cast %225 : vector<16x8xf32> to vector<1x16x8xf32>
    %230 = vector.shape_cast %226 : vector<16x8xf32> to vector<1x16x8xf32>
    %231 = vector.shape_cast %227 : vector<16x8xf32> to vector<1x16x8xf32>
    %232 = tpu.concatenate %228, %229, %230, %231 in 0 : vector<1x16x8xf32>, vector<1x16x8xf32>, vector<1x16x8xf32>, vector<1x16x8xf32> -> vector<4x16x8xf32>
    %233 = vector.shape_cast %232 : vector<4x16x8xf32> to vector<8x8x8xf32>
    %234 = vector.extract_strided_slice %213 {offsets = [0, 0], sizes = [16, 8], strides = [1, 1]} : vector<16x32xf32> to vector<16x8xf32>
    %235 = vector.extract_strided_slice %213 {offsets = [0, 8], sizes = [16, 8], strides = [1, 1]} : vector<16x32xf32> to vector<16x8xf32>
    %236 = vector.extract_strided_slice %213 {offsets = [0, 16], sizes = [16, 8], strides = [1, 1]} : vector<16x32xf32> to vector<16x8xf32>
    %237 = vector.extract_strided_slice %213 {offsets = [0, 24], sizes = [16, 8], strides = [1, 1]} : vector<16x32xf32> to vector<16x8xf32>
    %238 = vector.shape_cast %234 : vector<16x8xf32> to vector<1x16x8xf32>
    %239 = vector.shape_cast %235 : vector<16x8xf32> to vector<1x16x8xf32>
    %240 = vector.shape_cast %236 : vector<16x8xf32> to vector<1x16x8xf32>
    %241 = vector.shape_cast %237 : vector<16x8xf32> to vector<1x16x8xf32>
    %242 = tpu.concatenate %238, %239, %240, %241 in 0 : vector<1x16x8xf32>, vector<1x16x8xf32>, vector<1x16x8xf32>, vector<1x16x8xf32> -> vector<4x16x8xf32>
    %243 = vector.shape_cast %242 : vector<4x16x8xf32> to vector<8x8x8xf32>
    "tpu.trace_start"() <{level = 10 : i32, message = "bqd,bkd->bqk"}> : () -> ()
    %cst_65 = arith.constant dense<0.000000e+00> : vector<8x8x8xf32>
    %244 = tpu.matmul %223, %233, %cst_65 {dimension_numbers = #tpu.dot_dimension_numbers<[2], [2], [1], [1], [0, 0, 0, 1, 1, 1], [0], [0]>} : vector<8x8x8xf32>, vector<8x8x8xf32>, vector<8x8x8xf32> -> vector<8x8x8xf32>
    "tpu.trace_stop"() : () -> ()
    %245 = vector.broadcast %9 : vector<8x1x8xf32> to vector<8x8x8xf32>
    %246 = arith.addf %244, %245 : vector<8x8x8xf32>
    %cst_66 = arith.constant dense<0xFF800000> : vector<8x8xf32>
    %247 = vector.multi_reduction <maximumf>, %246, %cst_66 [2] : vector<8x8x8xf32> to vector<8x8xf32>
    %248 = vector.shape_cast %247 : vector<8x8xf32> to vector<8x8x1xf32>
    %249 = vector.broadcast %248 : vector<8x8x1xf32> to vector<8x8x8xf32>
    %250 = arith.subf %246, %249 : vector<8x8x8xf32>
    %251 = math.exp %250 : vector<8x8x8xf32>
    %cst_67 = arith.constant dense<0.000000e+00> : vector<8x8xf32>
    %252 = vector.multi_reduction <add>, %251, %cst_67 [2] : vector<8x8x8xf32> to vector<8x8xf32>
    %253 = vector.shape_cast %252 : vector<8x8xf32> to vector<8x8x1xf32>
    %254 = tpu.reciprocal %253 {approx = true} : vector<8x8x1xf32> -> vector<8x8x1xf32>
    %255 = vector.broadcast %254 : vector<8x8x1xf32> to vector<8x8x8xf32>
    %256 = arith.mulf %251, %255 : vector<8x8x8xf32>
    "tpu.trace_start"() <{level = 10 : i32, message = "bqk,bkd->bqd"}> : () -> ()
    %cst_68 = arith.constant dense<0.000000e+00> : vector<8x8x8xf32>
    %257 = tpu.matmul %256, %243, %cst_68 {dimension_numbers = #tpu.dot_dimension_numbers<[2], [1], [1], [2], [0, 0, 0, 1, 1, 2], [0], [0]>} : vector<8x8x8xf32>, vector<8x8x8xf32>, vector<8x8x8xf32> -> vector<8x8x8xf32>
    "tpu.trace_stop"() : () -> ()
    %258 = vector.shape_cast %257 : vector<8x8x8xf32> to vector<4x16x8xf32>
    %259 = vector.extract_strided_slice %258 {offsets = [0, 0, 0], sizes = [1, 16, 8], strides = [1, 1, 1]} : vector<4x16x8xf32> to vector<1x16x8xf32>
    %260 = vector.shape_cast %259 : vector<1x16x8xf32> to vector<16x8xf32>
    %261 = vector.extract_strided_slice %258 {offsets = [1, 0, 0], sizes = [1, 16, 8], strides = [1, 1, 1]} : vector<4x16x8xf32> to vector<1x16x8xf32>
    %262 = vector.shape_cast %261 : vector<1x16x8xf32> to vector<16x8xf32>
    %263 = vector.extract_strided_slice %258 {offsets = [2, 0, 0], sizes = [1, 16, 8], strides = [1, 1, 1]} : vector<4x16x8xf32> to vector<1x16x8xf32>
    %264 = vector.shape_cast %263 : vector<1x16x8xf32> to vector<16x8xf32>
    %265 = vector.extract_strided_slice %258 {offsets = [3, 0, 0], sizes = [1, 16, 8], strides = [1, 1, 1]} : vector<4x16x8xf32> to vector<1x16x8xf32>
    %266 = vector.shape_cast %265 : vector<1x16x8xf32> to vector<16x8xf32>
    %267 = tpu.concatenate %260, %262, %264, %266 in 1 : vector<16x8xf32>, vector<16x8xf32>, vector<16x8xf32>, vector<16x8xf32> -> vector<16x32xf32>
    %cst_69 = arith.constant dense<0.000000e+00> : vector<16x32xf32>
    %268 = tpu.matmul %267, %206, %cst_69 {dimension_numbers = #tpu.dot_dimension_numbers<[1], [0], [0], [1], [0, 0, 1, 1], [], []>} : vector<16x32xf32>, vector<32x32xf32>, vector<16x32xf32> -> vector<16x32xf32>
    %269 = vector.broadcast %207 : vector<1x32xf32> to vector<16x32xf32>
    %270 = arith.addf %268, %269 : vector<16x32xf32>
    %271 = arith.addf %178, %270 : vector<16x32xf32>
    %c360 = arith.constant 360 : index
    %c0_70 = arith.constant 0 : index
    %272 = vector.load %arg0[%c360, %c0_70] : memref<1160x128xf32, #tpu.memory_space<vmem>>, vector<1x32xf32>
    %c368 = arith.constant 368 : index
    %c0_71 = arith.constant 0 : index
    %273 = vector.load %arg0[%c368, %c0_71] : memref<1160x128xf32, #tpu.memory_space<vmem>>, vector<1x32xf32>
    %cst_72 = arith.constant dense<0.000000e+00> : vector<16xf32>
    %274 = vector.multi_reduction <add>, %271, %cst_72 [1] : vector<16x32xf32> to vector<16xf32>
    %275 = vector.shape_cast %274 : vector<16xf32> to vector<16x1xf32>
    %cst_73 = arith.constant 3.200000e+01 : f32
    %276 = vector.broadcast %cst_73 : f32 to vector<16x1xf32>
    %277 = arith.divf %275, %276 : vector<16x1xf32>
    %278 = vector.broadcast %277 : vector<16x1xf32> to vector<16x32xf32>
    %279 = arith.subf %271, %278 : vector<16x32xf32>
    %280 = arith.mulf %279, %279 : vector<16x32xf32>
    %cst_74 = arith.constant dense<0.000000e+00> : vector<16xf32>
    %281 = vector.multi_reduction <add>, %280, %cst_74 [1] : vector<16x32xf32> to vector<16xf32>
    %282 = vector.shape_cast %281 : vector<16xf32> to vector<16x1xf32>
    %cst_75 = arith.constant 0.0322580636 : f32
    %283 = vector.broadcast %cst_75 : f32 to vector<16x1xf32>
    %284 = arith.mulf %282, %283 : vector<16x1xf32>
    %285 = math.sqrt %284 : vector<16x1xf32>
    %cst_76 = arith.constant 9.99999997E-7 : f32
    %286 = vector.broadcast %cst_76 : f32 to vector<16x1xf32>
    %287 = arith.addf %285, %286 : vector<16x1xf32>
    %288 = tpu.reciprocal %287 {approx = true} : vector<16x1xf32> -> vector<16x1xf32>
    %289 = vector.broadcast %277 : vector<16x1xf32> to vector<16x32xf32>
    %290 = arith.subf %271, %289 : vector<16x32xf32>
    %291 = vector.broadcast %272 : vector<1x32xf32> to vector<16x32xf32>
    %292 = arith.mulf %291, %290 : vector<16x32xf32>
    %293 = vector.broadcast %288 : vector<16x1xf32> to vector<16x32xf32>
    %294 = arith.mulf %292, %293 : vector<16x32xf32>
    %295 = vector.broadcast %273 : vector<1x32xf32> to vector<16x32xf32>
    %296 = arith.addf %294, %295 : vector<16x32xf32>
    %c376 = arith.constant 376 : index
    %c0_77 = arith.constant 0 : index
    %297 = vector.load %arg0[%c376, %c0_77] : memref<1160x128xf32, #tpu.memory_space<vmem>>, vector<32x64xf32>
    %c408 = arith.constant 408 : index
    %c0_78 = arith.constant 0 : index
    %298 = vector.load %arg0[%c408, %c0_78] : memref<1160x128xf32, #tpu.memory_space<vmem>>, vector<1x64xf32>
    %c416 = arith.constant 416 : index
    %c0_79 = arith.constant 0 : index
    %299 = vector.load %arg0[%c416, %c0_79] : memref<1160x128xf32, #tpu.memory_space<vmem>>, vector<64x32xf32>
    %c480 = arith.constant 480 : index
    %c0_80 = arith.constant 0 : index
    %300 = vector.load %arg0[%c480, %c0_80] : memref<1160x128xf32, #tpu.memory_space<vmem>>, vector<1x32xf32>
    %cst_81 = arith.constant dense<0.000000e+00> : vector<16x64xf32>
    %301 = tpu.matmul %296, %297, %cst_81 {dimension_numbers = #tpu.dot_dimension_numbers<[1], [0], [0], [1], [0, 0, 1, 1], [], []>} : vector<16x32xf32>, vector<32x64xf32>, vector<16x64xf32> -> vector<16x64xf32>
    %302 = vector.broadcast %298 : vector<1x64xf32> to vector<16x64xf32>
    %303 = arith.addf %301, %302 : vector<16x64xf32>
    %cst_82 = arith.constant 0.000000e+00 : f32
    %304 = vector.broadcast %cst_82 : f32 to vector<16x64xf32>
    %305 = arith.maximumf %303, %304 : vector<16x64xf32>
    %cst_83 = arith.constant dense<0.000000e+00> : vector<16x32xf32>
    %306 = tpu.matmul %305, %299, %cst_83 {dimension_numbers = #tpu.dot_dimension_numbers<[1], [0], [0], [1], [0, 0, 1, 1], [], []>} : vector<16x64xf32>, vector<64x32xf32>, vector<16x32xf32> -> vector<16x32xf32>
    %307 = vector.broadcast %300 : vector<1x32xf32> to vector<16x32xf32>
    %308 = arith.addf %306, %307 : vector<16x32xf32>
    %309 = arith.addf %271, %308 : vector<16x32xf32>
    %c488 = arith.constant 488 : index
    %c0_84 = arith.constant 0 : index
    %310 = vector.load %arg0[%c488, %c0_84] : memref<1160x128xf32, #tpu.memory_space<vmem>>, vector<1x32xf32>
    %c496 = arith.constant 496 : index
    %c0_85 = arith.constant 0 : index
    %311 = vector.load %arg0[%c496, %c0_85] : memref<1160x128xf32, #tpu.memory_space<vmem>>, vector<1x32xf32>
    %cst_86 = arith.constant dense<0.000000e+00> : vector<16xf32>
    %312 = vector.multi_reduction <add>, %309, %cst_86 [1] : vector<16x32xf32> to vector<16xf32>
    %313 = vector.shape_cast %312 : vector<16xf32> to vector<16x1xf32>
    %cst_87 = arith.constant 3.200000e+01 : f32
    %314 = vector.broadcast %cst_87 : f32 to vector<16x1xf32>
    %315 = arith.divf %313, %314 : vector<16x1xf32>
    %316 = vector.broadcast %315 : vector<16x1xf32> to vector<16x32xf32>
    %317 = arith.subf %309, %316 : vector<16x32xf32>
    %318 = arith.mulf %317, %317 : vector<16x32xf32>
    %cst_88 = arith.constant dense<0.000000e+00> : vector<16xf32>
    %319 = vector.multi_reduction <add>, %318, %cst_88 [1] : vector<16x32xf32> to vector<16xf32>
    %320 = vector.shape_cast %319 : vector<16xf32> to vector<16x1xf32>
    %cst_89 = arith.constant 0.0322580636 : f32
    %321 = vector.broadcast %cst_89 : f32 to vector<16x1xf32>
    %322 = arith.mulf %320, %321 : vector<16x1xf32>
    %323 = math.sqrt %322 : vector<16x1xf32>
    %cst_90 = arith.constant 9.99999997E-7 : f32
    %324 = vector.broadcast %cst_90 : f32 to vector<16x1xf32>
    %325 = arith.addf %323, %324 : vector<16x1xf32>
    %326 = tpu.reciprocal %325 {approx = true} : vector<16x1xf32> -> vector<16x1xf32>
    %327 = vector.broadcast %315 : vector<16x1xf32> to vector<16x32xf32>
    %328 = arith.subf %309, %327 : vector<16x32xf32>
    %329 = vector.broadcast %310 : vector<1x32xf32> to vector<16x32xf32>
    %330 = arith.mulf %329, %328 : vector<16x32xf32>
    %331 = vector.broadcast %326 : vector<16x1xf32> to vector<16x32xf32>
    %332 = arith.mulf %330, %331 : vector<16x32xf32>
    %333 = vector.broadcast %311 : vector<1x32xf32> to vector<16x32xf32>
    %334 = arith.addf %332, %333 : vector<16x32xf32>
    %c504 = arith.constant 504 : index
    %c0_91 = arith.constant 0 : index
    %335 = vector.load %arg0[%c504, %c0_91] : memref<1160x128xf32, #tpu.memory_space<vmem>>, vector<1x32xf32>
    %c512 = arith.constant 512 : index
    %c0_92 = arith.constant 0 : index
    %336 = vector.load %arg0[%c512, %c0_92] : memref<1160x128xf32, #tpu.memory_space<vmem>>, vector<1x32xf32>
    %cst_93 = arith.constant dense<0.000000e+00> : vector<16xf32>
    %337 = vector.multi_reduction <add>, %47, %cst_93 [1] : vector<16x32xf32> to vector<16xf32>
    %338 = vector.shape_cast %337 : vector<16xf32> to vector<16x1xf32>
    %cst_94 = arith.constant 3.200000e+01 : f32
    %339 = vector.broadcast %cst_94 : f32 to vector<16x1xf32>
    %340 = arith.divf %338, %339 : vector<16x1xf32>
    %341 = vector.broadcast %340 : vector<16x1xf32> to vector<16x32xf32>
    %342 = arith.subf %47, %341 : vector<16x32xf32>
    %343 = arith.mulf %342, %342 : vector<16x32xf32>
    %cst_95 = arith.constant dense<0.000000e+00> : vector<16xf32>
    %344 = vector.multi_reduction <add>, %343, %cst_95 [1] : vector<16x32xf32> to vector<16xf32>
    %345 = vector.shape_cast %344 : vector<16xf32> to vector<16x1xf32>
    %cst_96 = arith.constant 0.0322580636 : f32
    %346 = vector.broadcast %cst_96 : f32 to vector<16x1xf32>
    %347 = arith.mulf %345, %346 : vector<16x1xf32>
    %348 = math.sqrt %347 : vector<16x1xf32>
    %cst_97 = arith.constant 9.99999997E-7 : f32
    %349 = vector.broadcast %cst_97 : f32 to vector<16x1xf32>
    %350 = arith.addf %348, %349 : vector<16x1xf32>
    %351 = tpu.reciprocal %350 {approx = true} : vector<16x1xf32> -> vector<16x1xf32>
    %352 = vector.broadcast %340 : vector<16x1xf32> to vector<16x32xf32>
    %353 = arith.subf %47, %352 : vector<16x32xf32>
    %354 = vector.broadcast %335 : vector<1x32xf32> to vector<16x32xf32>
    %355 = arith.mulf %354, %353 : vector<16x32xf32>
    %356 = vector.broadcast %351 : vector<16x1xf32> to vector<16x32xf32>
    %357 = arith.mulf %355, %356 : vector<16x32xf32>
    %358 = vector.broadcast %336 : vector<1x32xf32> to vector<16x32xf32>
    %359 = arith.addf %357, %358 : vector<16x32xf32>
    %c520 = arith.constant 520 : index
    %c0_98 = arith.constant 0 : index
    %360 = vector.load %arg0[%c520, %c0_98] : memref<1160x128xf32, #tpu.memory_space<vmem>>, vector<32x96xf32>
    %c552 = arith.constant 552 : index
    %c0_99 = arith.constant 0 : index
    %361 = vector.load %arg0[%c552, %c0_99] : memref<1160x128xf32, #tpu.memory_space<vmem>>, vector<1x96xf32>
    %c560 = arith.constant 560 : index
    %c0_100 = arith.constant 0 : index
    %362 = vector.load %arg0[%c560, %c0_100] : memref<1160x128xf32, #tpu.memory_space<vmem>>, vector<32x32xf32>
    %c592 = arith.constant 592 : index
    %c0_101 = arith.constant 0 : index
    %363 = vector.load %arg0[%c592, %c0_101] : memref<1160x128xf32, #tpu.memory_space<vmem>>, vector<1x32xf32>
    %cst_102 = arith.constant dense<0.000000e+00> : vector<16x96xf32>
    %364 = tpu.matmul %359, %360, %cst_102 {dimension_numbers = #tpu.dot_dimension_numbers<[1], [0], [0], [1], [0, 0, 1, 1], [], []>} : vector<16x32xf32>, vector<32x96xf32>, vector<16x96xf32> -> vector<16x96xf32>
    %365 = vector.broadcast %361 : vector<1x96xf32> to vector<16x96xf32>
    %366 = arith.addf %364, %365 : vector<16x96xf32>
    %367 = vector.extract_strided_slice %366 {offsets = [0, 0], sizes = [16, 32], strides = [1, 1]} : vector<16x96xf32> to vector<16x32xf32>
    %368 = vector.extract_strided_slice %366 {offsets = [0, 32], sizes = [16, 32], strides = [1, 1]} : vector<16x96xf32> to vector<16x32xf32>
    %369 = vector.extract_strided_slice %366 {offsets = [0, 64], sizes = [16, 32], strides = [1, 1]} : vector<16x96xf32> to vector<16x32xf32>
    %370 = vector.extract_strided_slice %367 {offsets = [0, 0], sizes = [16, 8], strides = [1, 1]} : vector<16x32xf32> to vector<16x8xf32>
    %371 = vector.extract_strided_slice %367 {offsets = [0, 8], sizes = [16, 8], strides = [1, 1]} : vector<16x32xf32> to vector<16x8xf32>
    %372 = vector.extract_strided_slice %367 {offsets = [0, 16], sizes = [16, 8], strides = [1, 1]} : vector<16x32xf32> to vector<16x8xf32>
    %373 = vector.extract_strided_slice %367 {offsets = [0, 24], sizes = [16, 8], strides = [1, 1]} : vector<16x32xf32> to vector<16x8xf32>
    %374 = vector.shape_cast %370 : vector<16x8xf32> to vector<1x16x8xf32>
    %375 = vector.shape_cast %371 : vector<16x8xf32> to vector<1x16x8xf32>
    %376 = vector.shape_cast %372 : vector<16x8xf32> to vector<1x16x8xf32>
    %377 = vector.shape_cast %373 : vector<16x8xf32> to vector<1x16x8xf32>
    %378 = tpu.concatenate %374, %375, %376, %377 in 0 : vector<1x16x8xf32>, vector<1x16x8xf32>, vector<1x16x8xf32>, vector<1x16x8xf32> -> vector<4x16x8xf32>
    %379 = vector.shape_cast %378 : vector<4x16x8xf32> to vector<8x8x8xf32>
    %380 = vector.extract_strided_slice %368 {offsets = [0, 0], sizes = [16, 8], strides = [1, 1]} : vector<16x32xf32> to vector<16x8xf32>
    %381 = vector.extract_strided_slice %368 {offsets = [0, 8], sizes = [16, 8], strides = [1, 1]} : vector<16x32xf32> to vector<16x8xf32>
    %382 = vector.extract_strided_slice %368 {offsets = [0, 16], sizes = [16, 8], strides = [1, 1]} : vector<16x32xf32> to vector<16x8xf32>
    %383 = vector.extract_strided_slice %368 {offsets = [0, 24], sizes = [16, 8], strides = [1, 1]} : vector<16x32xf32> to vector<16x8xf32>
    %384 = vector.shape_cast %380 : vector<16x8xf32> to vector<1x16x8xf32>
    %385 = vector.shape_cast %381 : vector<16x8xf32> to vector<1x16x8xf32>
    %386 = vector.shape_cast %382 : vector<16x8xf32> to vector<1x16x8xf32>
    %387 = vector.shape_cast %383 : vector<16x8xf32> to vector<1x16x8xf32>
    %388 = tpu.concatenate %384, %385, %386, %387 in 0 : vector<1x16x8xf32>, vector<1x16x8xf32>, vector<1x16x8xf32>, vector<1x16x8xf32> -> vector<4x16x8xf32>
    %389 = vector.shape_cast %388 : vector<4x16x8xf32> to vector<8x8x8xf32>
    %390 = vector.extract_strided_slice %369 {offsets = [0, 0], sizes = [16, 8], strides = [1, 1]} : vector<16x32xf32> to vector<16x8xf32>
    %391 = vector.extract_strided_slice %369 {offsets = [0, 8], sizes = [16, 8], strides = [1, 1]} : vector<16x32xf32> to vector<16x8xf32>
    %392 = vector.extract_strided_slice %369 {offsets = [0, 16], sizes = [16, 8], strides = [1, 1]} : vector<16x32xf32> to vector<16x8xf32>
    %393 = vector.extract_strided_slice %369 {offsets = [0, 24], sizes = [16, 8], strides = [1, 1]} : vector<16x32xf32> to vector<16x8xf32>
    %394 = vector.shape_cast %390 : vector<16x8xf32> to vector<1x16x8xf32>
    %395 = vector.shape_cast %391 : vector<16x8xf32> to vector<1x16x8xf32>
    %396 = vector.shape_cast %392 : vector<16x8xf32> to vector<1x16x8xf32>
    %397 = vector.shape_cast %393 : vector<16x8xf32> to vector<1x16x8xf32>
    %398 = tpu.concatenate %394, %395, %396, %397 in 0 : vector<1x16x8xf32>, vector<1x16x8xf32>, vector<1x16x8xf32>, vector<1x16x8xf32> -> vector<4x16x8xf32>
    %399 = vector.shape_cast %398 : vector<4x16x8xf32> to vector<8x8x8xf32>
    "tpu.trace_start"() <{level = 10 : i32, message = "bqd,bkd->bqk"}> : () -> ()
    %cst_103 = arith.constant dense<0.000000e+00> : vector<8x8x8xf32>
    %400 = tpu.matmul %379, %389, %cst_103 {dimension_numbers = #tpu.dot_dimension_numbers<[2], [2], [1], [1], [0, 0, 0, 1, 1, 1], [0], [0]>} : vector<8x8x8xf32>, vector<8x8x8xf32>, vector<8x8x8xf32> -> vector<8x8x8xf32>
    "tpu.trace_stop"() : () -> ()
    %401 = arith.addf %400, %19 : vector<8x8x8xf32>
    %cst_104 = arith.constant dense<0xFF800000> : vector<8x8xf32>
    %402 = vector.multi_reduction <maximumf>, %401, %cst_104 [2] : vector<8x8x8xf32> to vector<8x8xf32>
    %403 = vector.shape_cast %402 : vector<8x8xf32> to vector<8x8x1xf32>
    %404 = vector.broadcast %403 : vector<8x8x1xf32> to vector<8x8x8xf32>
    %405 = arith.subf %401, %404 : vector<8x8x8xf32>
    %406 = math.exp %405 : vector<8x8x8xf32>
    %cst_105 = arith.constant dense<0.000000e+00> : vector<8x8xf32>
    %407 = vector.multi_reduction <add>, %406, %cst_105 [2] : vector<8x8x8xf32> to vector<8x8xf32>
    %408 = vector.shape_cast %407 : vector<8x8xf32> to vector<8x8x1xf32>
    %409 = tpu.reciprocal %408 {approx = true} : vector<8x8x1xf32> -> vector<8x8x1xf32>
    %410 = vector.broadcast %409 : vector<8x8x1xf32> to vector<8x8x8xf32>
    %411 = arith.mulf %406, %410 : vector<8x8x8xf32>
    "tpu.trace_start"() <{level = 10 : i32, message = "bqk,bkd->bqd"}> : () -> ()
    %cst_106 = arith.constant dense<0.000000e+00> : vector<8x8x8xf32>
    %412 = tpu.matmul %411, %399, %cst_106 {dimension_numbers = #tpu.dot_dimension_numbers<[2], [1], [1], [2], [0, 0, 0, 1, 1, 2], [0], [0]>} : vector<8x8x8xf32>, vector<8x8x8xf32>, vector<8x8x8xf32> -> vector<8x8x8xf32>
    "tpu.trace_stop"() : () -> ()
    %413 = vector.shape_cast %412 : vector<8x8x8xf32> to vector<4x16x8xf32>
    %414 = vector.extract_strided_slice %413 {offsets = [0, 0, 0], sizes = [1, 16, 8], strides = [1, 1, 1]} : vector<4x16x8xf32> to vector<1x16x8xf32>
    %415 = vector.shape_cast %414 : vector<1x16x8xf32> to vector<16x8xf32>
    %416 = vector.extract_strided_slice %413 {offsets = [1, 0, 0], sizes = [1, 16, 8], strides = [1, 1, 1]} : vector<4x16x8xf32> to vector<1x16x8xf32>
    %417 = vector.shape_cast %416 : vector<1x16x8xf32> to vector<16x8xf32>
    %418 = vector.extract_strided_slice %413 {offsets = [2, 0, 0], sizes = [1, 16, 8], strides = [1, 1, 1]} : vector<4x16x8xf32> to vector<1x16x8xf32>
    %419 = vector.shape_cast %418 : vector<1x16x8xf32> to vector<16x8xf32>
    %420 = vector.extract_strided_slice %413 {offsets = [3, 0, 0], sizes = [1, 16, 8], strides = [1, 1, 1]} : vector<4x16x8xf32> to vector<1x16x8xf32>
    %421 = vector.shape_cast %420 : vector<1x16x8xf32> to vector<16x8xf32>
    %422 = tpu.concatenate %415, %417, %419, %421 in 1 : vector<16x8xf32>, vector<16x8xf32>, vector<16x8xf32>, vector<16x8xf32> -> vector<16x32xf32>
    %cst_107 = arith.constant dense<0.000000e+00> : vector<16x32xf32>
    %423 = tpu.matmul %422, %362, %cst_107 {dimension_numbers = #tpu.dot_dimension_numbers<[1], [0], [0], [1], [0, 0, 1, 1], [], []>} : vector<16x32xf32>, vector<32x32xf32>, vector<16x32xf32> -> vector<16x32xf32>
    %424 = vector.broadcast %363 : vector<1x32xf32> to vector<16x32xf32>
    %425 = arith.addf %423, %424 : vector<16x32xf32>
    %426 = arith.addf %47, %425 : vector<16x32xf32>
    %c600 = arith.constant 600 : index
    %c0_108 = arith.constant 0 : index
    %427 = vector.load %arg0[%c600, %c0_108] : memref<1160x128xf32, #tpu.memory_space<vmem>>, vector<1x32xf32>
    %c608 = arith.constant 608 : index
    %c0_109 = arith.constant 0 : index
    %428 = vector.load %arg0[%c608, %c0_109] : memref<1160x128xf32, #tpu.memory_space<vmem>>, vector<1x32xf32>
    %cst_110 = arith.constant dense<0.000000e+00> : vector<16xf32>
    %429 = vector.multi_reduction <add>, %426, %cst_110 [1] : vector<16x32xf32> to vector<16xf32>
    %430 = vector.shape_cast %429 : vector<16xf32> to vector<16x1xf32>
    %cst_111 = arith.constant 3.200000e+01 : f32
    %431 = vector.broadcast %cst_111 : f32 to vector<16x1xf32>
    %432 = arith.divf %430, %431 : vector<16x1xf32>
    %433 = vector.broadcast %432 : vector<16x1xf32> to vector<16x32xf32>
    %434 = arith.subf %426, %433 : vector<16x32xf32>
    %435 = arith.mulf %434, %434 : vector<16x32xf32>
    %cst_112 = arith.constant dense<0.000000e+00> : vector<16xf32>
    %436 = vector.multi_reduction <add>, %435, %cst_112 [1] : vector<16x32xf32> to vector<16xf32>
    %437 = vector.shape_cast %436 : vector<16xf32> to vector<16x1xf32>
    %cst_113 = arith.constant 0.0322580636 : f32
    %438 = vector.broadcast %cst_113 : f32 to vector<16x1xf32>
    %439 = arith.mulf %437, %438 : vector<16x1xf32>
    %440 = math.sqrt %439 : vector<16x1xf32>
    %cst_114 = arith.constant 9.99999997E-7 : f32
    %441 = vector.broadcast %cst_114 : f32 to vector<16x1xf32>
    %442 = arith.addf %440, %441 : vector<16x1xf32>
    %443 = tpu.reciprocal %442 {approx = true} : vector<16x1xf32> -> vector<16x1xf32>
    %444 = vector.broadcast %432 : vector<16x1xf32> to vector<16x32xf32>
    %445 = arith.subf %426, %444 : vector<16x32xf32>
    %446 = vector.broadcast %427 : vector<1x32xf32> to vector<16x32xf32>
    %447 = arith.mulf %446, %445 : vector<16x32xf32>
    %448 = vector.broadcast %443 : vector<16x1xf32> to vector<16x32xf32>
    %449 = arith.mulf %447, %448 : vector<16x32xf32>
    %450 = vector.broadcast %428 : vector<1x32xf32> to vector<16x32xf32>
    %451 = arith.addf %449, %450 : vector<16x32xf32>
    %c616 = arith.constant 616 : index
    %c0_115 = arith.constant 0 : index
    %452 = vector.load %arg0[%c616, %c0_115] : memref<1160x128xf32, #tpu.memory_space<vmem>>, vector<32x96xf32>
    %c648 = arith.constant 648 : index
    %c0_116 = arith.constant 0 : index
    %453 = vector.load %arg0[%c648, %c0_116] : memref<1160x128xf32, #tpu.memory_space<vmem>>, vector<1x96xf32>
    %c656 = arith.constant 656 : index
    %c0_117 = arith.constant 0 : index
    %454 = vector.load %arg0[%c656, %c0_117] : memref<1160x128xf32, #tpu.memory_space<vmem>>, vector<32x32xf32>
    %c688 = arith.constant 688 : index
    %c0_118 = arith.constant 0 : index
    %455 = vector.load %arg0[%c688, %c0_118] : memref<1160x128xf32, #tpu.memory_space<vmem>>, vector<1x32xf32>
    %456 = vector.extract_strided_slice %452 {offsets = [0, 0], sizes = [32, 32], strides = [1, 1]} : vector<32x96xf32> to vector<32x32xf32>
    %cst_119 = arith.constant dense<0.000000e+00> : vector<16x32xf32>
    %457 = tpu.matmul %451, %456, %cst_119 {dimension_numbers = #tpu.dot_dimension_numbers<[1], [0], [0], [1], [0, 0, 1, 1], [], []>} : vector<16x32xf32>, vector<32x32xf32>, vector<16x32xf32> -> vector<16x32xf32>
    %458 = vector.extract_strided_slice %453 {offsets = [0, 0], sizes = [1, 32], strides = [1, 1]} : vector<1x96xf32> to vector<1x32xf32>
    %459 = vector.broadcast %458 : vector<1x32xf32> to vector<16x32xf32>
    %460 = arith.addf %457, %459 : vector<16x32xf32>
    %461 = vector.extract_strided_slice %452 {offsets = [0, 32], sizes = [32, 64], strides = [1, 1]} : vector<32x96xf32> to vector<32x64xf32>
    %cst_120 = arith.constant dense<0.000000e+00> : vector<16x64xf32>
    %462 = tpu.matmul %334, %461, %cst_120 {dimension_numbers = #tpu.dot_dimension_numbers<[1], [0], [0], [1], [0, 0, 1, 1], [], []>} : vector<16x32xf32>, vector<32x64xf32>, vector<16x64xf32> -> vector<16x64xf32>
    %463 = vector.extract_strided_slice %453 {offsets = [0, 32], sizes = [1, 64], strides = [1, 1]} : vector<1x96xf32> to vector<1x64xf32>
    %464 = vector.broadcast %463 : vector<1x64xf32> to vector<16x64xf32>
    %465 = arith.addf %462, %464 : vector<16x64xf32>
    %466 = vector.extract_strided_slice %465 {offsets = [0, 0], sizes = [16, 32], strides = [1, 1]} : vector<16x64xf32> to vector<16x32xf32>
    %467 = vector.extract_strided_slice %465 {offsets = [0, 32], sizes = [16, 32], strides = [1, 1]} : vector<16x64xf32> to vector<16x32xf32>
    %468 = vector.extract_strided_slice %460 {offsets = [0, 0], sizes = [16, 8], strides = [1, 1]} : vector<16x32xf32> to vector<16x8xf32>
    %469 = vector.extract_strided_slice %460 {offsets = [0, 8], sizes = [16, 8], strides = [1, 1]} : vector<16x32xf32> to vector<16x8xf32>
    %470 = vector.extract_strided_slice %460 {offsets = [0, 16], sizes = [16, 8], strides = [1, 1]} : vector<16x32xf32> to vector<16x8xf32>
    %471 = vector.extract_strided_slice %460 {offsets = [0, 24], sizes = [16, 8], strides = [1, 1]} : vector<16x32xf32> to vector<16x8xf32>
    %472 = vector.shape_cast %468 : vector<16x8xf32> to vector<1x16x8xf32>
    %473 = vector.shape_cast %469 : vector<16x8xf32> to vector<1x16x8xf32>
    %474 = vector.shape_cast %470 : vector<16x8xf32> to vector<1x16x8xf32>
    %475 = vector.shape_cast %471 : vector<16x8xf32> to vector<1x16x8xf32>
    %476 = tpu.concatenate %472, %473, %474, %475 in 0 : vector<1x16x8xf32>, vector<1x16x8xf32>, vector<1x16x8xf32>, vector<1x16x8xf32> -> vector<4x16x8xf32>
    %477 = vector.shape_cast %476 : vector<4x16x8xf32> to vector<8x8x8xf32>
    %478 = vector.extract_strided_slice %466 {offsets = [0, 0], sizes = [16, 8], strides = [1, 1]} : vector<16x32xf32> to vector<16x8xf32>
    %479 = vector.extract_strided_slice %466 {offsets = [0, 8], sizes = [16, 8], strides = [1, 1]} : vector<16x32xf32> to vector<16x8xf32>
    %480 = vector.extract_strided_slice %466 {offsets = [0, 16], sizes = [16, 8], strides = [1, 1]} : vector<16x32xf32> to vector<16x8xf32>
    %481 = vector.extract_strided_slice %466 {offsets = [0, 24], sizes = [16, 8], strides = [1, 1]} : vector<16x32xf32> to vector<16x8xf32>
    %482 = vector.shape_cast %478 : vector<16x8xf32> to vector<1x16x8xf32>
    %483 = vector.shape_cast %479 : vector<16x8xf32> to vector<1x16x8xf32>
    %484 = vector.shape_cast %480 : vector<16x8xf32> to vector<1x16x8xf32>
    %485 = vector.shape_cast %481 : vector<16x8xf32> to vector<1x16x8xf32>
    %486 = tpu.concatenate %482, %483, %484, %485 in 0 : vector<1x16x8xf32>, vector<1x16x8xf32>, vector<1x16x8xf32>, vector<1x16x8xf32> -> vector<4x16x8xf32>
    %487 = vector.shape_cast %486 : vector<4x16x8xf32> to vector<8x8x8xf32>
    %488 = vector.extract_strided_slice %467 {offsets = [0, 0], sizes = [16, 8], strides = [1, 1]} : vector<16x32xf32> to vector<16x8xf32>
    %489 = vector.extract_strided_slice %467 {offsets = [0, 8], sizes = [16, 8], strides = [1, 1]} : vector<16x32xf32> to vector<16x8xf32>
    %490 = vector.extract_strided_slice %467 {offsets = [0, 16], sizes = [16, 8], strides = [1, 1]} : vector<16x32xf32> to vector<16x8xf32>
    %491 = vector.extract_strided_slice %467 {offsets = [0, 24], sizes = [16, 8], strides = [1, 1]} : vector<16x32xf32> to vector<16x8xf32>
    %492 = vector.shape_cast %488 : vector<16x8xf32> to vector<1x16x8xf32>
    %493 = vector.shape_cast %489 : vector<16x8xf32> to vector<1x16x8xf32>
    %494 = vector.shape_cast %490 : vector<16x8xf32> to vector<1x16x8xf32>
    %495 = vector.shape_cast %491 : vector<16x8xf32> to vector<1x16x8xf32>
    %496 = tpu.concatenate %492, %493, %494, %495 in 0 : vector<1x16x8xf32>, vector<1x16x8xf32>, vector<1x16x8xf32>, vector<1x16x8xf32> -> vector<4x16x8xf32>
    %497 = vector.shape_cast %496 : vector<4x16x8xf32> to vector<8x8x8xf32>
    "tpu.trace_start"() <{level = 10 : i32, message = "bqd,bkd->bqk"}> : () -> ()
    %cst_121 = arith.constant dense<0.000000e+00> : vector<8x8x8xf32>
    %498 = tpu.matmul %477, %487, %cst_121 {dimension_numbers = #tpu.dot_dimension_numbers<[2], [2], [1], [1], [0, 0, 0, 1, 1, 1], [0], [0]>} : vector<8x8x8xf32>, vector<8x8x8xf32>, vector<8x8x8xf32> -> vector<8x8x8xf32>
    "tpu.trace_stop"() : () -> ()
    %499 = vector.broadcast %9 : vector<8x1x8xf32> to vector<8x8x8xf32>
    %500 = arith.addf %498, %499 : vector<8x8x8xf32>
    %cst_122 = arith.constant dense<0xFF800000> : vector<8x8xf32>
    %501 = vector.multi_reduction <maximumf>, %500, %cst_122 [2] : vector<8x8x8xf32> to vector<8x8xf32>
    %502 = vector.shape_cast %501 : vector<8x8xf32> to vector<8x8x1xf32>
    %503 = vector.broadcast %502 : vector<8x8x1xf32> to vector<8x8x8xf32>
    %504 = arith.subf %500, %503 : vector<8x8x8xf32>
    %505 = math.exp %504 : vector<8x8x8xf32>
    %cst_123 = arith.constant dense<0.000000e+00> : vector<8x8xf32>
    %506 = vector.multi_reduction <add>, %505, %cst_123 [2] : vector<8x8x8xf32> to vector<8x8xf32>
    %507 = vector.shape_cast %506 : vector<8x8xf32> to vector<8x8x1xf32>
    %508 = tpu.reciprocal %507 {approx = true} : vector<8x8x1xf32> -> vector<8x8x1xf32>
    %509 = vector.broadcast %508 : vector<8x8x1xf32> to vector<8x8x8xf32>
    %510 = arith.mulf %505, %509 : vector<8x8x8xf32>
    "tpu.trace_start"() <{level = 10 : i32, message = "bqk,bkd->bqd"}> : () -> ()
    %cst_124 = arith.constant dense<0.000000e+00> : vector<8x8x8xf32>
    %511 = tpu.matmul %510, %497, %cst_124 {dimension_numbers = #tpu.dot_dimension_numbers<[2], [1], [1], [2], [0, 0, 0, 1, 1, 2], [0], [0]>} : vector<8x8x8xf32>, vector<8x8x8xf32>, vector<8x8x8xf32> -> vector<8x8x8xf32>
    "tpu.trace_stop"() : () -> ()
    %512 = vector.shape_cast %511 : vector<8x8x8xf32> to vector<4x16x8xf32>
    %513 = vector.extract_strided_slice %512 {offsets = [0, 0, 0], sizes = [1, 16, 8], strides = [1, 1, 1]} : vector<4x16x8xf32> to vector<1x16x8xf32>
    %514 = vector.shape_cast %513 : vector<1x16x8xf32> to vector<16x8xf32>
    %515 = vector.extract_strided_slice %512 {offsets = [1, 0, 0], sizes = [1, 16, 8], strides = [1, 1, 1]} : vector<4x16x8xf32> to vector<1x16x8xf32>
    %516 = vector.shape_cast %515 : vector<1x16x8xf32> to vector<16x8xf32>
    %517 = vector.extract_strided_slice %512 {offsets = [2, 0, 0], sizes = [1, 16, 8], strides = [1, 1, 1]} : vector<4x16x8xf32> to vector<1x16x8xf32>
    %518 = vector.shape_cast %517 : vector<1x16x8xf32> to vector<16x8xf32>
    %519 = vector.extract_strided_slice %512 {offsets = [3, 0, 0], sizes = [1, 16, 8], strides = [1, 1, 1]} : vector<4x16x8xf32> to vector<1x16x8xf32>
    %520 = vector.shape_cast %519 : vector<1x16x8xf32> to vector<16x8xf32>
    %521 = tpu.concatenate %514, %516, %518, %520 in 1 : vector<16x8xf32>, vector<16x8xf32>, vector<16x8xf32>, vector<16x8xf32> -> vector<16x32xf32>
    %cst_125 = arith.constant dense<0.000000e+00> : vector<16x32xf32>
    %522 = tpu.matmul %521, %454, %cst_125 {dimension_numbers = #tpu.dot_dimension_numbers<[1], [0], [0], [1], [0, 0, 1, 1], [], []>} : vector<16x32xf32>, vector<32x32xf32>, vector<16x32xf32> -> vector<16x32xf32>
    %523 = vector.broadcast %455 : vector<1x32xf32> to vector<16x32xf32>
    %524 = arith.addf %522, %523 : vector<16x32xf32>
    %525 = arith.addf %426, %524 : vector<16x32xf32>
    %c696 = arith.constant 696 : index
    %c0_126 = arith.constant 0 : index
    %526 = vector.load %arg0[%c696, %c0_126] : memref<1160x128xf32, #tpu.memory_space<vmem>>, vector<1x32xf32>
    %c704 = arith.constant 704 : index
    %c0_127 = arith.constant 0 : index
    %527 = vector.load %arg0[%c704, %c0_127] : memref<1160x128xf32, #tpu.memory_space<vmem>>, vector<1x32xf32>
    %cst_128 = arith.constant dense<0.000000e+00> : vector<16xf32>
    %528 = vector.multi_reduction <add>, %525, %cst_128 [1] : vector<16x32xf32> to vector<16xf32>
    %529 = vector.shape_cast %528 : vector<16xf32> to vector<16x1xf32>
    %cst_129 = arith.constant 3.200000e+01 : f32
    %530 = vector.broadcast %cst_129 : f32 to vector<16x1xf32>
    %531 = arith.divf %529, %530 : vector<16x1xf32>
    %532 = vector.broadcast %531 : vector<16x1xf32> to vector<16x32xf32>
    %533 = arith.subf %525, %532 : vector<16x32xf32>
    %534 = arith.mulf %533, %533 : vector<16x32xf32>
    %cst_130 = arith.constant dense<0.000000e+00> : vector<16xf32>
    %535 = vector.multi_reduction <add>, %534, %cst_130 [1] : vector<16x32xf32> to vector<16xf32>
    %536 = vector.shape_cast %535 : vector<16xf32> to vector<16x1xf32>
    %cst_131 = arith.constant 0.0322580636 : f32
    %537 = vector.broadcast %cst_131 : f32 to vector<16x1xf32>
    %538 = arith.mulf %536, %537 : vector<16x1xf32>
    %539 = math.sqrt %538 : vector<16x1xf32>
    %cst_132 = arith.constant 9.99999997E-7 : f32
    %540 = vector.broadcast %cst_132 : f32 to vector<16x1xf32>
    %541 = arith.addf %539, %540 : vector<16x1xf32>
    %542 = tpu.reciprocal %541 {approx = true} : vector<16x1xf32> -> vector<16x1xf32>
    %543 = vector.broadcast %531 : vector<16x1xf32> to vector<16x32xf32>
    %544 = arith.subf %525, %543 : vector<16x32xf32>
    %545 = vector.broadcast %526 : vector<1x32xf32> to vector<16x32xf32>
    %546 = arith.mulf %545, %544 : vector<16x32xf32>
    %547 = vector.broadcast %542 : vector<16x1xf32> to vector<16x32xf32>
    %548 = arith.mulf %546, %547 : vector<16x32xf32>
    %549 = vector.broadcast %527 : vector<1x32xf32> to vector<16x32xf32>
    %550 = arith.addf %548, %549 : vector<16x32xf32>
    %c712 = arith.constant 712 : index
    %c0_133 = arith.constant 0 : index
    %551 = vector.load %arg0[%c712, %c0_133] : memref<1160x128xf32, #tpu.memory_space<vmem>>, vector<32x64xf32>
    %c744 = arith.constant 744 : index
    %c0_134 = arith.constant 0 : index
    %552 = vector.load %arg0[%c744, %c0_134] : memref<1160x128xf32, #tpu.memory_space<vmem>>, vector<1x64xf32>
    %c752 = arith.constant 752 : index
    %c0_135 = arith.constant 0 : index
    %553 = vector.load %arg0[%c752, %c0_135] : memref<1160x128xf32, #tpu.memory_space<vmem>>, vector<64x32xf32>
    %c816 = arith.constant 816 : index
    %c0_136 = arith.constant 0 : index
    %554 = vector.load %arg0[%c816, %c0_136] : memref<1160x128xf32, #tpu.memory_space<vmem>>, vector<1x32xf32>
    %cst_137 = arith.constant dense<0.000000e+00> : vector<16x64xf32>
    %555 = tpu.matmul %550, %551, %cst_137 {dimension_numbers = #tpu.dot_dimension_numbers<[1], [0], [0], [1], [0, 0, 1, 1], [], []>} : vector<16x32xf32>, vector<32x64xf32>, vector<16x64xf32> -> vector<16x64xf32>
    %556 = vector.broadcast %552 : vector<1x64xf32> to vector<16x64xf32>
    %557 = arith.addf %555, %556 : vector<16x64xf32>
    %cst_138 = arith.constant 0.000000e+00 : f32
    %558 = vector.broadcast %cst_138 : f32 to vector<16x64xf32>
    %559 = arith.maximumf %557, %558 : vector<16x64xf32>
    %cst_139 = arith.constant dense<0.000000e+00> : vector<16x32xf32>
    %560 = tpu.matmul %559, %553, %cst_139 {dimension_numbers = #tpu.dot_dimension_numbers<[1], [0], [0], [1], [0, 0, 1, 1], [], []>} : vector<16x64xf32>, vector<64x32xf32>, vector<16x32xf32> -> vector<16x32xf32>
    %561 = vector.broadcast %554 : vector<1x32xf32> to vector<16x32xf32>
    %562 = arith.addf %560, %561 : vector<16x32xf32>
    %563 = arith.addf %525, %562 : vector<16x32xf32>
    %c824 = arith.constant 824 : index
    %c0_140 = arith.constant 0 : index
    %564 = vector.load %arg0[%c824, %c0_140] : memref<1160x128xf32, #tpu.memory_space<vmem>>, vector<1x32xf32>
    %c832 = arith.constant 832 : index
    %c0_141 = arith.constant 0 : index
    %565 = vector.load %arg0[%c832, %c0_141] : memref<1160x128xf32, #tpu.memory_space<vmem>>, vector<1x32xf32>
    %cst_142 = arith.constant dense<0.000000e+00> : vector<16xf32>
    %566 = vector.multi_reduction <add>, %563, %cst_142 [1] : vector<16x32xf32> to vector<16xf32>
    %567 = vector.shape_cast %566 : vector<16xf32> to vector<16x1xf32>
    %cst_143 = arith.constant 3.200000e+01 : f32
    %568 = vector.broadcast %cst_143 : f32 to vector<16x1xf32>
    %569 = arith.divf %567, %568 : vector<16x1xf32>
    %570 = vector.broadcast %569 : vector<16x1xf32> to vector<16x32xf32>
    %571 = arith.subf %563, %570 : vector<16x32xf32>
    %572 = arith.mulf %571, %571 : vector<16x32xf32>
    %cst_144 = arith.constant dense<0.000000e+00> : vector<16xf32>
    %573 = vector.multi_reduction <add>, %572, %cst_144 [1] : vector<16x32xf32> to vector<16xf32>
    %574 = vector.shape_cast %573 : vector<16xf32> to vector<16x1xf32>
    %cst_145 = arith.constant 0.0322580636 : f32
    %575 = vector.broadcast %cst_145 : f32 to vector<16x1xf32>
    %576 = arith.mulf %574, %575 : vector<16x1xf32>
    %577 = math.sqrt %576 : vector<16x1xf32>
    %cst_146 = arith.constant 9.99999997E-7 : f32
    %578 = vector.broadcast %cst_146 : f32 to vector<16x1xf32>
    %579 = arith.addf %577, %578 : vector<16x1xf32>
    %580 = tpu.reciprocal %579 {approx = true} : vector<16x1xf32> -> vector<16x1xf32>
    %581 = vector.broadcast %569 : vector<16x1xf32> to vector<16x32xf32>
    %582 = arith.subf %563, %581 : vector<16x32xf32>
    %583 = vector.broadcast %564 : vector<1x32xf32> to vector<16x32xf32>
    %584 = arith.mulf %583, %582 : vector<16x32xf32>
    %585 = vector.broadcast %580 : vector<16x1xf32> to vector<16x32xf32>
    %586 = arith.mulf %584, %585 : vector<16x32xf32>
    %587 = vector.broadcast %565 : vector<1x32xf32> to vector<16x32xf32>
    %588 = arith.addf %586, %587 : vector<16x32xf32>
    %c840 = arith.constant 840 : index
    %c0_147 = arith.constant 0 : index
    %589 = vector.load %arg0[%c840, %c0_147] : memref<1160x128xf32, #tpu.memory_space<vmem>>, vector<32x96xf32>
    %c872 = arith.constant 872 : index
    %c0_148 = arith.constant 0 : index
    %590 = vector.load %arg0[%c872, %c0_148] : memref<1160x128xf32, #tpu.memory_space<vmem>>, vector<1x96xf32>
    %c880 = arith.constant 880 : index
    %c0_149 = arith.constant 0 : index
    %591 = vector.load %arg0[%c880, %c0_149] : memref<1160x128xf32, #tpu.memory_space<vmem>>, vector<32x32xf32>
    %c912 = arith.constant 912 : index
    %c0_150 = arith.constant 0 : index
    %592 = vector.load %arg0[%c912, %c0_150] : memref<1160x128xf32, #tpu.memory_space<vmem>>, vector<1x32xf32>
    %cst_151 = arith.constant dense<0.000000e+00> : vector<16x96xf32>
    %593 = tpu.matmul %588, %589, %cst_151 {dimension_numbers = #tpu.dot_dimension_numbers<[1], [0], [0], [1], [0, 0, 1, 1], [], []>} : vector<16x32xf32>, vector<32x96xf32>, vector<16x96xf32> -> vector<16x96xf32>
    %594 = vector.broadcast %590 : vector<1x96xf32> to vector<16x96xf32>
    %595 = arith.addf %593, %594 : vector<16x96xf32>
    %596 = vector.extract_strided_slice %595 {offsets = [0, 0], sizes = [16, 32], strides = [1, 1]} : vector<16x96xf32> to vector<16x32xf32>
    %597 = vector.extract_strided_slice %595 {offsets = [0, 32], sizes = [16, 32], strides = [1, 1]} : vector<16x96xf32> to vector<16x32xf32>
    %598 = vector.extract_strided_slice %595 {offsets = [0, 64], sizes = [16, 32], strides = [1, 1]} : vector<16x96xf32> to vector<16x32xf32>
    %599 = vector.extract_strided_slice %596 {offsets = [0, 0], sizes = [16, 8], strides = [1, 1]} : vector<16x32xf32> to vector<16x8xf32>
    %600 = vector.extract_strided_slice %596 {offsets = [0, 8], sizes = [16, 8], strides = [1, 1]} : vector<16x32xf32> to vector<16x8xf32>
    %601 = vector.extract_strided_slice %596 {offsets = [0, 16], sizes = [16, 8], strides = [1, 1]} : vector<16x32xf32> to vector<16x8xf32>
    %602 = vector.extract_strided_slice %596 {offsets = [0, 24], sizes = [16, 8], strides = [1, 1]} : vector<16x32xf32> to vector<16x8xf32>
    %603 = vector.shape_cast %599 : vector<16x8xf32> to vector<1x16x8xf32>
    %604 = vector.shape_cast %600 : vector<16x8xf32> to vector<1x16x8xf32>
    %605 = vector.shape_cast %601 : vector<16x8xf32> to vector<1x16x8xf32>
    %606 = vector.shape_cast %602 : vector<16x8xf32> to vector<1x16x8xf32>
    %607 = tpu.concatenate %603, %604, %605, %606 in 0 : vector<1x16x8xf32>, vector<1x16x8xf32>, vector<1x16x8xf32>, vector<1x16x8xf32> -> vector<4x16x8xf32>
    %608 = vector.shape_cast %607 : vector<4x16x8xf32> to vector<8x8x8xf32>
    %609 = vector.extract_strided_slice %597 {offsets = [0, 0], sizes = [16, 8], strides = [1, 1]} : vector<16x32xf32> to vector<16x8xf32>
    %610 = vector.extract_strided_slice %597 {offsets = [0, 8], sizes = [16, 8], strides = [1, 1]} : vector<16x32xf32> to vector<16x8xf32>
    %611 = vector.extract_strided_slice %597 {offsets = [0, 16], sizes = [16, 8], strides = [1, 1]} : vector<16x32xf32> to vector<16x8xf32>
    %612 = vector.extract_strided_slice %597 {offsets = [0, 24], sizes = [16, 8], strides = [1, 1]} : vector<16x32xf32> to vector<16x8xf32>
    %613 = vector.shape_cast %609 : vector<16x8xf32> to vector<1x16x8xf32>
    %614 = vector.shape_cast %610 : vector<16x8xf32> to vector<1x16x8xf32>
    %615 = vector.shape_cast %611 : vector<16x8xf32> to vector<1x16x8xf32>
    %616 = vector.shape_cast %612 : vector<16x8xf32> to vector<1x16x8xf32>
    %617 = tpu.concatenate %613, %614, %615, %616 in 0 : vector<1x16x8xf32>, vector<1x16x8xf32>, vector<1x16x8xf32>, vector<1x16x8xf32> -> vector<4x16x8xf32>
    %618 = vector.shape_cast %617 : vector<4x16x8xf32> to vector<8x8x8xf32>
    %619 = vector.extract_strided_slice %598 {offsets = [0, 0], sizes = [16, 8], strides = [1, 1]} : vector<16x32xf32> to vector<16x8xf32>
    %620 = vector.extract_strided_slice %598 {offsets = [0, 8], sizes = [16, 8], strides = [1, 1]} : vector<16x32xf32> to vector<16x8xf32>
    %621 = vector.extract_strided_slice %598 {offsets = [0, 16], sizes = [16, 8], strides = [1, 1]} : vector<16x32xf32> to vector<16x8xf32>
    %622 = vector.extract_strided_slice %598 {offsets = [0, 24], sizes = [16, 8], strides = [1, 1]} : vector<16x32xf32> to vector<16x8xf32>
    %623 = vector.shape_cast %619 : vector<16x8xf32> to vector<1x16x8xf32>
    %624 = vector.shape_cast %620 : vector<16x8xf32> to vector<1x16x8xf32>
    %625 = vector.shape_cast %621 : vector<16x8xf32> to vector<1x16x8xf32>
    %626 = vector.shape_cast %622 : vector<16x8xf32> to vector<1x16x8xf32>
    %627 = tpu.concatenate %623, %624, %625, %626 in 0 : vector<1x16x8xf32>, vector<1x16x8xf32>, vector<1x16x8xf32>, vector<1x16x8xf32> -> vector<4x16x8xf32>
    %628 = vector.shape_cast %627 : vector<4x16x8xf32> to vector<8x8x8xf32>
    "tpu.trace_start"() <{level = 10 : i32, message = "bqd,bkd->bqk"}> : () -> ()
    %cst_152 = arith.constant dense<0.000000e+00> : vector<8x8x8xf32>
    %629 = tpu.matmul %608, %618, %cst_152 {dimension_numbers = #tpu.dot_dimension_numbers<[2], [2], [1], [1], [0, 0, 0, 1, 1, 1], [0], [0]>} : vector<8x8x8xf32>, vector<8x8x8xf32>, vector<8x8x8xf32> -> vector<8x8x8xf32>
    "tpu.trace_stop"() : () -> ()
    %630 = arith.addf %629, %19 : vector<8x8x8xf32>
    %cst_153 = arith.constant dense<0xFF800000> : vector<8x8xf32>
    %631 = vector.multi_reduction <maximumf>, %630, %cst_153 [2] : vector<8x8x8xf32> to vector<8x8xf32>
    %632 = vector.shape_cast %631 : vector<8x8xf32> to vector<8x8x1xf32>
    %633 = vector.broadcast %632 : vector<8x8x1xf32> to vector<8x8x8xf32>
    %634 = arith.subf %630, %633 : vector<8x8x8xf32>
    %635 = math.exp %634 : vector<8x8x8xf32>
    %cst_154 = arith.constant dense<0.000000e+00> : vector<8x8xf32>
    %636 = vector.multi_reduction <add>, %635, %cst_154 [2] : vector<8x8x8xf32> to vector<8x8xf32>
    %637 = vector.shape_cast %636 : vector<8x8xf32> to vector<8x8x1xf32>
    %638 = tpu.reciprocal %637 {approx = true} : vector<8x8x1xf32> -> vector<8x8x1xf32>
    %639 = vector.broadcast %638 : vector<8x8x1xf32> to vector<8x8x8xf32>
    %640 = arith.mulf %635, %639 : vector<8x8x8xf32>
    "tpu.trace_start"() <{level = 10 : i32, message = "bqk,bkd->bqd"}> : () -> ()
    %cst_155 = arith.constant dense<0.000000e+00> : vector<8x8x8xf32>
    %641 = tpu.matmul %640, %628, %cst_155 {dimension_numbers = #tpu.dot_dimension_numbers<[2], [1], [1], [2], [0, 0, 0, 1, 1, 2], [0], [0]>} : vector<8x8x8xf32>, vector<8x8x8xf32>, vector<8x8x8xf32> -> vector<8x8x8xf32>
    "tpu.trace_stop"() : () -> ()
    %642 = vector.shape_cast %641 : vector<8x8x8xf32> to vector<4x16x8xf32>
    %643 = vector.extract_strided_slice %642 {offsets = [0, 0, 0], sizes = [1, 16, 8], strides = [1, 1, 1]} : vector<4x16x8xf32> to vector<1x16x8xf32>
    %644 = vector.shape_cast %643 : vector<1x16x8xf32> to vector<16x8xf32>
    %645 = vector.extract_strided_slice %642 {offsets = [1, 0, 0], sizes = [1, 16, 8], strides = [1, 1, 1]} : vector<4x16x8xf32> to vector<1x16x8xf32>
    %646 = vector.shape_cast %645 : vector<1x16x8xf32> to vector<16x8xf32>
    %647 = vector.extract_strided_slice %642 {offsets = [2, 0, 0], sizes = [1, 16, 8], strides = [1, 1, 1]} : vector<4x16x8xf32> to vector<1x16x8xf32>
    %648 = vector.shape_cast %647 : vector<1x16x8xf32> to vector<16x8xf32>
    %649 = vector.extract_strided_slice %642 {offsets = [3, 0, 0], sizes = [1, 16, 8], strides = [1, 1, 1]} : vector<4x16x8xf32> to vector<1x16x8xf32>
    %650 = vector.shape_cast %649 : vector<1x16x8xf32> to vector<16x8xf32>
    %651 = tpu.concatenate %644, %646, %648, %650 in 1 : vector<16x8xf32>, vector<16x8xf32>, vector<16x8xf32>, vector<16x8xf32> -> vector<16x32xf32>
    %cst_156 = arith.constant dense<0.000000e+00> : vector<16x32xf32>
    %652 = tpu.matmul %651, %591, %cst_156 {dimension_numbers = #tpu.dot_dimension_numbers<[1], [0], [0], [1], [0, 0, 1, 1], [], []>} : vector<16x32xf32>, vector<32x32xf32>, vector<16x32xf32> -> vector<16x32xf32>
    %653 = vector.broadcast %592 : vector<1x32xf32> to vector<16x32xf32>
    %654 = arith.addf %652, %653 : vector<16x32xf32>
    %655 = arith.addf %563, %654 : vector<16x32xf32>
    %c920 = arith.constant 920 : index
    %c0_157 = arith.constant 0 : index
    %656 = vector.load %arg0[%c920, %c0_157] : memref<1160x128xf32, #tpu.memory_space<vmem>>, vector<1x32xf32>
    %c928 = arith.constant 928 : index
    %c0_158 = arith.constant 0 : index
    %657 = vector.load %arg0[%c928, %c0_158] : memref<1160x128xf32, #tpu.memory_space<vmem>>, vector<1x32xf32>
    %cst_159 = arith.constant dense<0.000000e+00> : vector<16xf32>
    %658 = vector.multi_reduction <add>, %655, %cst_159 [1] : vector<16x32xf32> to vector<16xf32>
    %659 = vector.shape_cast %658 : vector<16xf32> to vector<16x1xf32>
    %cst_160 = arith.constant 3.200000e+01 : f32
    %660 = vector.broadcast %cst_160 : f32 to vector<16x1xf32>
    %661 = arith.divf %659, %660 : vector<16x1xf32>
    %662 = vector.broadcast %661 : vector<16x1xf32> to vector<16x32xf32>
    %663 = arith.subf %655, %662 : vector<16x32xf32>
    %664 = arith.mulf %663, %663 : vector<16x32xf32>
    %cst_161 = arith.constant dense<0.000000e+00> : vector<16xf32>
    %665 = vector.multi_reduction <add>, %664, %cst_161 [1] : vector<16x32xf32> to vector<16xf32>
    %666 = vector.shape_cast %665 : vector<16xf32> to vector<16x1xf32>
    %cst_162 = arith.constant 0.0322580636 : f32
    %667 = vector.broadcast %cst_162 : f32 to vector<16x1xf32>
    %668 = arith.mulf %666, %667 : vector<16x1xf32>
    %669 = math.sqrt %668 : vector<16x1xf32>
    %cst_163 = arith.constant 9.99999997E-7 : f32
    %670 = vector.broadcast %cst_163 : f32 to vector<16x1xf32>
    %671 = arith.addf %669, %670 : vector<16x1xf32>
    %672 = tpu.reciprocal %671 {approx = true} : vector<16x1xf32> -> vector<16x1xf32>
    %673 = vector.broadcast %661 : vector<16x1xf32> to vector<16x32xf32>
    %674 = arith.subf %655, %673 : vector<16x32xf32>
    %675 = vector.broadcast %656 : vector<1x32xf32> to vector<16x32xf32>
    %676 = arith.mulf %675, %674 : vector<16x32xf32>
    %677 = vector.broadcast %672 : vector<16x1xf32> to vector<16x32xf32>
    %678 = arith.mulf %676, %677 : vector<16x32xf32>
    %679 = vector.broadcast %657 : vector<1x32xf32> to vector<16x32xf32>
    %680 = arith.addf %678, %679 : vector<16x32xf32>
    %c936 = arith.constant 936 : index
    %c0_164 = arith.constant 0 : index
    %681 = vector.load %arg0[%c936, %c0_164] : memref<1160x128xf32, #tpu.memory_space<vmem>>, vector<32x96xf32>
    %c968 = arith.constant 968 : index
    %c0_165 = arith.constant 0 : index
    %682 = vector.load %arg0[%c968, %c0_165] : memref<1160x128xf32, #tpu.memory_space<vmem>>, vector<1x96xf32>
    %c976 = arith.constant 976 : index
    %c0_166 = arith.constant 0 : index
    %683 = vector.load %arg0[%c976, %c0_166] : memref<1160x128xf32, #tpu.memory_space<vmem>>, vector<32x32xf32>
    %c1008 = arith.constant 1008 : index
    %c0_167 = arith.constant 0 : index
    %684 = vector.load %arg0[%c1008, %c0_167] : memref<1160x128xf32, #tpu.memory_space<vmem>>, vector<1x32xf32>
    %685 = vector.extract_strided_slice %681 {offsets = [0, 0], sizes = [32, 32], strides = [1, 1]} : vector<32x96xf32> to vector<32x32xf32>
    %cst_168 = arith.constant dense<0.000000e+00> : vector<16x32xf32>
    %686 = tpu.matmul %680, %685, %cst_168 {dimension_numbers = #tpu.dot_dimension_numbers<[1], [0], [0], [1], [0, 0, 1, 1], [], []>} : vector<16x32xf32>, vector<32x32xf32>, vector<16x32xf32> -> vector<16x32xf32>
    %687 = vector.extract_strided_slice %682 {offsets = [0, 0], sizes = [1, 32], strides = [1, 1]} : vector<1x96xf32> to vector<1x32xf32>
    %688 = vector.broadcast %687 : vector<1x32xf32> to vector<16x32xf32>
    %689 = arith.addf %686, %688 : vector<16x32xf32>
    %690 = vector.extract_strided_slice %681 {offsets = [0, 32], sizes = [32, 64], strides = [1, 1]} : vector<32x96xf32> to vector<32x64xf32>
    %cst_169 = arith.constant dense<0.000000e+00> : vector<16x64xf32>
    %691 = tpu.matmul %334, %690, %cst_169 {dimension_numbers = #tpu.dot_dimension_numbers<[1], [0], [0], [1], [0, 0, 1, 1], [], []>} : vector<16x32xf32>, vector<32x64xf32>, vector<16x64xf32> -> vector<16x64xf32>
    %692 = vector.extract_strided_slice %682 {offsets = [0, 32], sizes = [1, 64], strides = [1, 1]} : vector<1x96xf32> to vector<1x64xf32>
    %693 = vector.broadcast %692 : vector<1x64xf32> to vector<16x64xf32>
    %694 = arith.addf %691, %693 : vector<16x64xf32>
    %695 = vector.extract_strided_slice %694 {offsets = [0, 0], sizes = [16, 32], strides = [1, 1]} : vector<16x64xf32> to vector<16x32xf32>
    %696 = vector.extract_strided_slice %694 {offsets = [0, 32], sizes = [16, 32], strides = [1, 1]} : vector<16x64xf32> to vector<16x32xf32>
    %697 = vector.extract_strided_slice %689 {offsets = [0, 0], sizes = [16, 8], strides = [1, 1]} : vector<16x32xf32> to vector<16x8xf32>
    %698 = vector.extract_strided_slice %689 {offsets = [0, 8], sizes = [16, 8], strides = [1, 1]} : vector<16x32xf32> to vector<16x8xf32>
    %699 = vector.extract_strided_slice %689 {offsets = [0, 16], sizes = [16, 8], strides = [1, 1]} : vector<16x32xf32> to vector<16x8xf32>
    %700 = vector.extract_strided_slice %689 {offsets = [0, 24], sizes = [16, 8], strides = [1, 1]} : vector<16x32xf32> to vector<16x8xf32>
    %701 = vector.shape_cast %697 : vector<16x8xf32> to vector<1x16x8xf32>
    %702 = vector.shape_cast %698 : vector<16x8xf32> to vector<1x16x8xf32>
    %703 = vector.shape_cast %699 : vector<16x8xf32> to vector<1x16x8xf32>
    %704 = vector.shape_cast %700 : vector<16x8xf32> to vector<1x16x8xf32>
    %705 = tpu.concatenate %701, %702, %703, %704 in 0 : vector<1x16x8xf32>, vector<1x16x8xf32>, vector<1x16x8xf32>, vector<1x16x8xf32> -> vector<4x16x8xf32>
    %706 = vector.shape_cast %705 : vector<4x16x8xf32> to vector<8x8x8xf32>
    %707 = vector.extract_strided_slice %695 {offsets = [0, 0], sizes = [16, 8], strides = [1, 1]} : vector<16x32xf32> to vector<16x8xf32>
    %708 = vector.extract_strided_slice %695 {offsets = [0, 8], sizes = [16, 8], strides = [1, 1]} : vector<16x32xf32> to vector<16x8xf32>
    %709 = vector.extract_strided_slice %695 {offsets = [0, 16], sizes = [16, 8], strides = [1, 1]} : vector<16x32xf32> to vector<16x8xf32>
    %710 = vector.extract_strided_slice %695 {offsets = [0, 24], sizes = [16, 8], strides = [1, 1]} : vector<16x32xf32> to vector<16x8xf32>
    %711 = vector.shape_cast %707 : vector<16x8xf32> to vector<1x16x8xf32>
    %712 = vector.shape_cast %708 : vector<16x8xf32> to vector<1x16x8xf32>
    %713 = vector.shape_cast %709 : vector<16x8xf32> to vector<1x16x8xf32>
    %714 = vector.shape_cast %710 : vector<16x8xf32> to vector<1x16x8xf32>
    %715 = tpu.concatenate %711, %712, %713, %714 in 0 : vector<1x16x8xf32>, vector<1x16x8xf32>, vector<1x16x8xf32>, vector<1x16x8xf32> -> vector<4x16x8xf32>
    %716 = vector.shape_cast %715 : vector<4x16x8xf32> to vector<8x8x8xf32>
    %717 = vector.extract_strided_slice %696 {offsets = [0, 0], sizes = [16, 8], strides = [1, 1]} : vector<16x32xf32> to vector<16x8xf32>
    %718 = vector.extract_strided_slice %696 {offsets = [0, 8], sizes = [16, 8], strides = [1, 1]} : vector<16x32xf32> to vector<16x8xf32>
    %719 = vector.extract_strided_slice %696 {offsets = [0, 16], sizes = [16, 8], strides = [1, 1]} : vector<16x32xf32> to vector<16x8xf32>
    %720 = vector.extract_strided_slice %696 {offsets = [0, 24], sizes = [16, 8], strides = [1, 1]} : vector<16x32xf32> to vector<16x8xf32>
    %721 = vector.shape_cast %717 : vector<16x8xf32> to vector<1x16x8xf32>
    %722 = vector.shape_cast %718 : vector<16x8xf32> to vector<1x16x8xf32>
    %723 = vector.shape_cast %719 : vector<16x8xf32> to vector<1x16x8xf32>
    %724 = vector.shape_cast %720 : vector<16x8xf32> to vector<1x16x8xf32>
    %725 = tpu.concatenate %721, %722, %723, %724 in 0 : vector<1x16x8xf32>, vector<1x16x8xf32>, vector<1x16x8xf32>, vector<1x16x8xf32> -> vector<4x16x8xf32>
    %726 = vector.shape_cast %725 : vector<4x16x8xf32> to vector<8x8x8xf32>
    "tpu.trace_start"() <{level = 10 : i32, message = "bqd,bkd->bqk"}> : () -> ()
    %cst_170 = arith.constant dense<0.000000e+00> : vector<8x8x8xf32>
    %727 = tpu.matmul %706, %716, %cst_170 {dimension_numbers = #tpu.dot_dimension_numbers<[2], [2], [1], [1], [0, 0, 0, 1, 1, 1], [0], [0]>} : vector<8x8x8xf32>, vector<8x8x8xf32>, vector<8x8x8xf32> -> vector<8x8x8xf32>
    "tpu.trace_stop"() : () -> ()
    %728 = vector.broadcast %9 : vector<8x1x8xf32> to vector<8x8x8xf32>
    %729 = arith.addf %727, %728 : vector<8x8x8xf32>
    %cst_171 = arith.constant dense<0xFF800000> : vector<8x8xf32>
    %730 = vector.multi_reduction <maximumf>, %729, %cst_171 [2] : vector<8x8x8xf32> to vector<8x8xf32>
    %731 = vector.shape_cast %730 : vector<8x8xf32> to vector<8x8x1xf32>
    %732 = vector.broadcast %731 : vector<8x8x1xf32> to vector<8x8x8xf32>
    %733 = arith.subf %729, %732 : vector<8x8x8xf32>
    %734 = math.exp %733 : vector<8x8x8xf32>
    %cst_172 = arith.constant dense<0.000000e+00> : vector<8x8xf32>
    %735 = vector.multi_reduction <add>, %734, %cst_172 [2] : vector<8x8x8xf32> to vector<8x8xf32>
    %736 = vector.shape_cast %735 : vector<8x8xf32> to vector<8x8x1xf32>
    %737 = tpu.reciprocal %736 {approx = true} : vector<8x8x1xf32> -> vector<8x8x1xf32>
    %738 = vector.broadcast %737 : vector<8x8x1xf32> to vector<8x8x8xf32>
    %739 = arith.mulf %734, %738 : vector<8x8x8xf32>
    "tpu.trace_start"() <{level = 10 : i32, message = "bqk,bkd->bqd"}> : () -> ()
    %cst_173 = arith.constant dense<0.000000e+00> : vector<8x8x8xf32>
    %740 = tpu.matmul %739, %726, %cst_173 {dimension_numbers = #tpu.dot_dimension_numbers<[2], [1], [1], [2], [0, 0, 0, 1, 1, 2], [0], [0]>} : vector<8x8x8xf32>, vector<8x8x8xf32>, vector<8x8x8xf32> -> vector<8x8x8xf32>
    "tpu.trace_stop"() : () -> ()
    %741 = vector.shape_cast %740 : vector<8x8x8xf32> to vector<4x16x8xf32>
    %742 = vector.extract_strided_slice %741 {offsets = [0, 0, 0], sizes = [1, 16, 8], strides = [1, 1, 1]} : vector<4x16x8xf32> to vector<1x16x8xf32>
    %743 = vector.shape_cast %742 : vector<1x16x8xf32> to vector<16x8xf32>
    %744 = vector.extract_strided_slice %741 {offsets = [1, 0, 0], sizes = [1, 16, 8], strides = [1, 1, 1]} : vector<4x16x8xf32> to vector<1x16x8xf32>
    %745 = vector.shape_cast %744 : vector<1x16x8xf32> to vector<16x8xf32>
    %746 = vector.extract_strided_slice %741 {offsets = [2, 0, 0], sizes = [1, 16, 8], strides = [1, 1, 1]} : vector<4x16x8xf32> to vector<1x16x8xf32>
    %747 = vector.shape_cast %746 : vector<1x16x8xf32> to vector<16x8xf32>
    %748 = vector.extract_strided_slice %741 {offsets = [3, 0, 0], sizes = [1, 16, 8], strides = [1, 1, 1]} : vector<4x16x8xf32> to vector<1x16x8xf32>
    %749 = vector.shape_cast %748 : vector<1x16x8xf32> to vector<16x8xf32>
    %750 = tpu.concatenate %743, %745, %747, %749 in 1 : vector<16x8xf32>, vector<16x8xf32>, vector<16x8xf32>, vector<16x8xf32> -> vector<16x32xf32>
    %cst_174 = arith.constant dense<0.000000e+00> : vector<16x32xf32>
    %751 = tpu.matmul %750, %683, %cst_174 {dimension_numbers = #tpu.dot_dimension_numbers<[1], [0], [0], [1], [0, 0, 1, 1], [], []>} : vector<16x32xf32>, vector<32x32xf32>, vector<16x32xf32> -> vector<16x32xf32>
    %752 = vector.broadcast %684 : vector<1x32xf32> to vector<16x32xf32>
    %753 = arith.addf %751, %752 : vector<16x32xf32>
    %754 = arith.addf %655, %753 : vector<16x32xf32>
    %c1016 = arith.constant 1016 : index
    %c0_175 = arith.constant 0 : index
    %755 = vector.load %arg0[%c1016, %c0_175] : memref<1160x128xf32, #tpu.memory_space<vmem>>, vector<1x32xf32>
    %c1024 = arith.constant 1024 : index
    %c0_176 = arith.constant 0 : index
    %756 = vector.load %arg0[%c1024, %c0_176] : memref<1160x128xf32, #tpu.memory_space<vmem>>, vector<1x32xf32>
    %cst_177 = arith.constant dense<0.000000e+00> : vector<16xf32>
    %757 = vector.multi_reduction <add>, %754, %cst_177 [1] : vector<16x32xf32> to vector<16xf32>
    %758 = vector.shape_cast %757 : vector<16xf32> to vector<16x1xf32>
    %cst_178 = arith.constant 3.200000e+01 : f32
    %759 = vector.broadcast %cst_178 : f32 to vector<16x1xf32>
    %760 = arith.divf %758, %759 : vector<16x1xf32>
    %761 = vector.broadcast %760 : vector<16x1xf32> to vector<16x32xf32>
    %762 = arith.subf %754, %761 : vector<16x32xf32>
    %763 = arith.mulf %762, %762 : vector<16x32xf32>
    %cst_179 = arith.constant dense<0.000000e+00> : vector<16xf32>
    %764 = vector.multi_reduction <add>, %763, %cst_179 [1] : vector<16x32xf32> to vector<16xf32>
    %765 = vector.shape_cast %764 : vector<16xf32> to vector<16x1xf32>
    %cst_180 = arith.constant 0.0322580636 : f32
    %766 = vector.broadcast %cst_180 : f32 to vector<16x1xf32>
    %767 = arith.mulf %765, %766 : vector<16x1xf32>
    %768 = math.sqrt %767 : vector<16x1xf32>
    %cst_181 = arith.constant 9.99999997E-7 : f32
    %769 = vector.broadcast %cst_181 : f32 to vector<16x1xf32>
    %770 = arith.addf %768, %769 : vector<16x1xf32>
    %771 = tpu.reciprocal %770 {approx = true} : vector<16x1xf32> -> vector<16x1xf32>
    %772 = vector.broadcast %760 : vector<16x1xf32> to vector<16x32xf32>
    %773 = arith.subf %754, %772 : vector<16x32xf32>
    %774 = vector.broadcast %755 : vector<1x32xf32> to vector<16x32xf32>
    %775 = arith.mulf %774, %773 : vector<16x32xf32>
    %776 = vector.broadcast %771 : vector<16x1xf32> to vector<16x32xf32>
    %777 = arith.mulf %775, %776 : vector<16x32xf32>
    %778 = vector.broadcast %756 : vector<1x32xf32> to vector<16x32xf32>
    %779 = arith.addf %777, %778 : vector<16x32xf32>
    %c1032 = arith.constant 1032 : index
    %c0_182 = arith.constant 0 : index
    %780 = vector.load %arg0[%c1032, %c0_182] : memref<1160x128xf32, #tpu.memory_space<vmem>>, vector<32x64xf32>
    %c1064 = arith.constant 1064 : index
    %c0_183 = arith.constant 0 : index
    %781 = vector.load %arg0[%c1064, %c0_183] : memref<1160x128xf32, #tpu.memory_space<vmem>>, vector<1x64xf32>
    %c1072 = arith.constant 1072 : index
    %c0_184 = arith.constant 0 : index
    %782 = vector.load %arg0[%c1072, %c0_184] : memref<1160x128xf32, #tpu.memory_space<vmem>>, vector<64x32xf32>
    %c1136 = arith.constant 1136 : index
    %c0_185 = arith.constant 0 : index
    %783 = vector.load %arg0[%c1136, %c0_185] : memref<1160x128xf32, #tpu.memory_space<vmem>>, vector<1x32xf32>
    %cst_186 = arith.constant dense<0.000000e+00> : vector<16x64xf32>
    %784 = tpu.matmul %779, %780, %cst_186 {dimension_numbers = #tpu.dot_dimension_numbers<[1], [0], [0], [1], [0, 0, 1, 1], [], []>} : vector<16x32xf32>, vector<32x64xf32>, vector<16x64xf32> -> vector<16x64xf32>
    %785 = vector.broadcast %781 : vector<1x64xf32> to vector<16x64xf32>
    %786 = arith.addf %784, %785 : vector<16x64xf32>
    %cst_187 = arith.constant 0.000000e+00 : f32
    %787 = vector.broadcast %cst_187 : f32 to vector<16x64xf32>
    %788 = arith.maximumf %786, %787 : vector<16x64xf32>
    %cst_188 = arith.constant dense<0.000000e+00> : vector<16x32xf32>
    %789 = tpu.matmul %788, %782, %cst_188 {dimension_numbers = #tpu.dot_dimension_numbers<[1], [0], [0], [1], [0, 0, 1, 1], [], []>} : vector<16x64xf32>, vector<64x32xf32>, vector<16x32xf32> -> vector<16x32xf32>
    %790 = vector.broadcast %783 : vector<1x32xf32> to vector<16x32xf32>
    %791 = arith.addf %789, %790 : vector<16x32xf32>
    %792 = arith.addf %754, %791 : vector<16x32xf32>
    %c1144 = arith.constant 1144 : index
    %c0_189 = arith.constant 0 : index
    %793 = vector.load %arg0[%c1144, %c0_189] : memref<1160x128xf32, #tpu.memory_space<vmem>>, vector<1x32xf32>
    %c1152 = arith.constant 1152 : index
    %c0_190 = arith.constant 0 : index
    %794 = vector.load %arg0[%c1152, %c0_190] : memref<1160x128xf32, #tpu.memory_space<vmem>>, vector<1x32xf32>
    %cst_191 = arith.constant dense<0.000000e+00> : vector<16xf32>
    %795 = vector.multi_reduction <add>, %792, %cst_191 [1] : vector<16x32xf32> to vector<16xf32>
    %796 = vector.shape_cast %795 : vector<16xf32> to vector<16x1xf32>
    %cst_192 = arith.constant 3.200000e+01 : f32
    %797 = vector.broadcast %cst_192 : f32 to vector<16x1xf32>
    %798 = arith.divf %796, %797 : vector<16x1xf32>
    %799 = vector.broadcast %798 : vector<16x1xf32> to vector<16x32xf32>
    %800 = arith.subf %792, %799 : vector<16x32xf32>
    %801 = arith.mulf %800, %800 : vector<16x32xf32>
    %cst_193 = arith.constant dense<0.000000e+00> : vector<16xf32>
    %802 = vector.multi_reduction <add>, %801, %cst_193 [1] : vector<16x32xf32> to vector<16xf32>
    %803 = vector.shape_cast %802 : vector<16xf32> to vector<16x1xf32>
    %cst_194 = arith.constant 0.0322580636 : f32
    %804 = vector.broadcast %cst_194 : f32 to vector<16x1xf32>
    %805 = arith.mulf %803, %804 : vector<16x1xf32>
    %806 = math.sqrt %805 : vector<16x1xf32>
    %cst_195 = arith.constant 9.99999997E-7 : f32
    %807 = vector.broadcast %cst_195 : f32 to vector<16x1xf32>
    %808 = arith.addf %806, %807 : vector<16x1xf32>
    %809 = tpu.reciprocal %808 {approx = true} : vector<16x1xf32> -> vector<16x1xf32>
    %810 = vector.broadcast %798 : vector<16x1xf32> to vector<16x32xf32>
    %811 = arith.subf %792, %810 : vector<16x32xf32>
    %812 = vector.broadcast %793 : vector<1x32xf32> to vector<16x32xf32>
    %813 = arith.mulf %812, %811 : vector<16x32xf32>
    %814 = vector.broadcast %809 : vector<16x1xf32> to vector<16x32xf32>
    %815 = arith.mulf %813, %814 : vector<16x32xf32>
    %816 = vector.broadcast %794 : vector<1x32xf32> to vector<16x32xf32>
    %817 = arith.addf %815, %816 : vector<16x32xf32>
    %818 = vector.shape_cast %817 : vector<16x32xf32> to vector<2x8x32xf32>
    %c0_196 = arith.constant 0 : index
    %c0_197 = arith.constant 0 : index
    %c0_198 = arith.constant 0 : index
    %819 = vector.load %arg5[%c0_196, %c0_197, %c0_198] : memref<2x8x32xf32, #tpu.memory_space<vmem>>, vector<2x8x32xf32>
    tpu.vector_store %arg5[%c0_196, %c0_197, %c0_198], %818 {strides = array<i32>} : memref<2x8x32xf32, #tpu.memory_space<vmem>>, vector<2x8x32xf32>,
    return
  }
}

</mosaic_0001>

<bundles_post_ra>
// kernel: encoder_decoder_forward.1
= control target key start
LH: loop header
LB: loop body
LE: loop exit
PB: predicated region body
PF: predicated region fallthrough
CT: control target
= control target key end

     0   :  { %10 = vsyncpa [#allocation3], 0  ;;  %s14547_s0 = inlined_call_operand.hbm [shape: f32[1160,128], index: 0, kind: input, shape index: {}]   ;;  %s14548_s1 = inlined_call_operand.vmem [shape: s32[16,1], index: 1, kind: input, shape index: {}]   ;;  %s14549_s2 = inlined_call_operand.vmem [shape: s32[16,1], index: 2, kind: input, shape index: {}]   ;;  %s14550_s3 = inlined_call_operand.vmem [shape: f32[2,1,8], index: 3, kind: input, shape index: {}]   ;;  %s14551_s4 = inlined_call_operand.vmem [shape: f32[2,8,8], index: 4, kind: input, shape index: {}]   ;;  %s14552_s5 = inlined_call_operand.hbm [shape: f32[2,8,32], index: 5, kind: output, shape index: {}]  }
   0x1   :  { %11 = vsyncpa [#allocation4], 0  ;;  %s13002_s18 = smov [#allocation2]   ;;  %s12954_s22 = scalar_lea.hbm %s14547_s0, 18560 }
   0x2   :  { %s17_s19 = sshll.u32 %s13002_s18, 4  ;;  %p12955_p0 = scmp.ne.s32.totalorder %s14547_s0, %s12954_s22  ;;  %s18_s19 = int_to_ptr.vmem [resolvable:$true] %s17_s19 }
   0x3   :  { %p12958_p1 = scmp.lt.u32.totalorder %s12954_s22, %s14547_s0 }
   0x5   :  { %p12960_p2 = pnand %p12958_p1, %p12955_p0 }
   0x7   :  { %12963 = shalt.err (!%p12960_p2)
}
   0x8   :  { %s12964_s27 = scalar_lea.vmem %s18_s19, 18560  ;;  %p12969_p4 = scmp.lt.s32.totalorder %s18_s19, %s18_s19 }
   0x9   :  { %p12965_p3 = scmp.ne.s32.totalorder %s18_s19, %s12964_s27  ;;  %p12970_p5 = scmp.lt.s32.totalorder %s12964_s27, %s12964_s27 }
   0xb   :  { %p12971_p6 = por %p12970_p5, %p12969_p4 }
   0xd   :  { %p12972_p7 = pnand %p12971_p6, %p12965_p3 }
   0xf   :  { %12975 = shalt.err (!%p12972_p7)
}
  0x10   :  { %s13003_s28 = smov 128   ;;  %s13004_s29 = smov 8  }
  0x11   :  { %23 = dma.hbm_to_vmem [thread:$0]  %s14547_s0, 18560, %s18_s19, [#allocation3], %s13003_s28, %s13003_s28, %s13004_s29  }
  0x12   :  { %12998 = dma.done.wait [#allocation3], 18560  }
  0x13   :  { %12999 = vsyncadd [#allocation3], 4294948736  ;;  %v13005_v0 = vmov 0   ;;  %v47_v1 = vld [vmem:[%s14548_s1] sm:$0xff]  ;;  %v64_v3 = vld [vmem:[#allocation2 + $0x8] sm:$0xff]  ;;  %v13006_v6 = vmov 0.0   ;;  %v49_v7 = vlaneseq }
  0x14   :  { %12643 = vset.pattern.permute.xlu0 %v13005_v0  ;;  %12644 = vset.pattern.permute.xlu1 %v13005_v0  ;;  %v63_v2 = vld [vmem:[#allocation2] sm:$0xff]  ;;  %v48_v4 = vld [vmem:[%s14548_s1 + $0x8] sm:$0xff]  ;;  %vm65_vm0 = vcmask 130048   ;;  %vm251_vm3 = vcmask 261120   ;;  %v164_v32 = vld [vmem:[#allocation2 + $0x10] sm:$0xff]  ;;  %s13008_s13 = smov 112  }
  0x15   :  { %52 = vperm.xlu0 %12643, %v47_v1   ;;  %v12413_v5 = vpack.c.bf16 %v64_v3, %v63_v2  ;;  %v13069_v8 = vand.u32 127, %v49_v7  ;;  %v147_v13 = vld [vmem:[#allocation2 + $0x20] sm:$0xff]  ;;  %v151_v31 = vld [vmem:[%s14549_s2 + $0x8] sm:$0xff]  ;;  %v165_v33 = vld [vmem:[#allocation2 + $0x18] sm:$0xff]  ;;  %vm13009_vm10 = vmmov 0   ;;  %s13010_s14 = smov 104  }
  0x16   :  { %v150_v30 = vld [vmem:[%s14549_s2] sm:$0xff]  ;;  %v12417_v34 = vpack.c.bf16 %v165_v33, %v164_v32  ;;  %v305_v35 = vld [vmem:[#allocation2 + $0x38] sm:$0xff]  ;;  %v307_v44 = vld [vmem:[#allocation2 + $0x48] sm:$0xff]  ;;  %s13007_s2 = smov 120   ;;  %s13011_s15 = smov 96   ;;  %vm428_vm11 = vcmask 64512  }
  0x17   :  { %12414 = vmatprep.subr.bf16.mxu0 %v12413_v5  ;;  %v306_v36 = vld [vmem:[#allocation2 + $0x40] sm:$0xff]  ;;  %v308_v45 = vld [vmem:[#allocation2 + $0x50] sm:$0xff]  ;;  %v11065_v61 = vld [vmem:[#allocation2 + $0x28] ss:$0 sm:$0xff]  ;;  %v417_v33 = vshrl.u32 %v49_v7, 7  ;;  %s13013_s20 = smov 16  }
  0x18   :  { %12416 = vmatpush3.bf16.msra.mxu0 %v12413_v5  ;;  %12418 = vmatprep.subr.bf16.mxu1 %v12417_v34  ;;  %v12421_v37 = vpack.c.bf16 %v306_v36, %v305_v35  ;;  %v12425_v48 = vpack.c.bf16 %v308_v45, %v307_v44  ;;  %v11066_v0 = vld [vmem:[#allocation2 + $0x30] ss:$0 sm:$0xff]  ;;  %v35_v32 = vld [vmem:[%s14550_s3] sm:$0x1]  ;;  %s13014_s21 = smov 24   ;;  %vm1759_vm14 = vcmask 195584  }
  0x19   :  { %55 = vperm.xlu0 %12643, %v48_v4   ;;  %11680 = vmatprep.subr.mxu0 %v13006_v6  ;;  %vm37_vm12 = vcmp.eq.f32.partialorder %v35_v32, 0.0  ;;  %v418_v35 = vsub.s32 0, %v417_v33 }
  0x1a   :  { %12420 = vmatpush3.bf16.msra.mxu1 %v12417_v34  ;;  %v36_v34 = vld [vmem:[%s14550_s3 + $0x1] sm:$0x1]  ;;  %v39_v36 = vsel %vm37_vm12, -1e+09, %v13006_v6  ;;  %s13012_s3 = smov 64  }
  0x1b   :  { %12422 = vmatprep.subr.bf16.mxu1 %v12421_v37  ;;  %vm38_vm13 = vcmp.eq.f32.partialorder %v36_v34, 0.0 }
  0x94   :  { %v53_v9 = vpop.permute.xlu0 %52 }
  0x95   :  { %vm57_vm1 = vcmp.eq.s32.totalorder %v53_v9, %v13069_v8 }
  0x96   :  { %v11057_v10 = vsel %vm57_vm1, 1.0, %v13006_v6 }
  0x97   :  { %11649 = vmatprep.mubr.msk.f32.mxu0 %vm65_vm0, %v11057_v10 }
  0x98   :  { %v56_v11 = vpop.permute.xlu0 %55 }
  0x99   :  { %vm58_vm2 = vcmp.eq.s32.totalorder %v56_v11, %v13069_v8  ;;  %v11067_v11 = vld [vmem:[#allocation2 + $0x58] ss:$0 sm:$0xff] }
  0x9a   :  { %v11058_v12 = vsel %vm58_vm2, 1.0, %v13006_v6 }
  0x9b   :  { %11650 = vmatmul.mubr.msk.f32.vlgmr.msra.gmra.mrb[0].mxu0 %vm65_vm0, %v11058_v12 }
  0x9c   :  { %11682 = vmatprep.mubr.msk.f32.mxu0 %vm13009_vm10, %v13006_v6 }
 0x16e   :  { %v11651_v14 = vpop.f32.mrb[0].mxu0 }
 0x16f   :  { %v138_v15 = vpop.f32.mrb[1].mxu0  ;;  %v13079_v17 = vadd.f32 %v11651_v14, %v147_v13 }
 0x170   :  { %v13077_v16 = vadd.f32 %v147_v13, %v138_v15 }
 0x171   :  { %v255_v19 = vsel %vm251_vm3, %v13079_v17, 0.0 }
 0x172   :  { %v252_v18 = vsel %vm251_vm3, %v13077_v16, 0.0 }
 0x173   :  { %253 = vadd.xlane.f32.xlu1 %v252_v18 }
 0x177   :  { %256 = vadd.xlane.f32.xlu1 %v255_v19 }
 0x200   :  { %v254_v20 = vpop.xlane.xlu1 %253 }
 0x201   :  { %v259_v21 = vmul.f32 0.03125, %v254_v20 }
 0x203   :  { %v13086_v22 = vsub.f32 %v13077_v16, %v259_v21 }
 0x204   :  { %v257_v23 = vpop.xlane.xlu1 %256 }
 0x205   :  { %v260_v24 = vmul.f32 0.03125, %v257_v23  ;;  %v263_v25 = vmul.f32 %v13086_v22, %v13086_v22  ;;  %v295_v62 = vmul.f32 %v11065_v61, %v13086_v22 }
 0x207   :  { %v13091_v26 = vsub.f32 %v13079_v17, %v260_v24  ;;  %v265_v27 = vsel %vm251_vm3, %v263_v25, 0.0 }
 0x208   :  { %266 = vadd.xlane.f32.xlu0 %v265_v27 }
 0x209   :  { %v264_v28 = vmul.f32 %v13091_v26, %v13091_v26  ;;  %v296_v2 = vmul.f32 %v11065_v61, %v13091_v26 }
 0x20b   :  { %v268_v29 = vsel %vm251_vm3, %v264_v28, 0.0 }
 0x20c   :  { %269 = vadd.xlane.f32.xlu1 %v268_v29 }
 0x21d   :  { %153 = vperm.xlu1 %12644, %v150_v30  }
 0x221   :  { %156 = vperm.xlu1 %12644, %v151_v31  }
 0x295   :  { %v267_v38 = vpop.xlane.xlu0 %266 }
 0x296   :  { %v271_v39 = vmul.f32 0.032258064, %v267_v38  ;;  %v40_v38 = vsel %vm38_vm13, -1e+09, %v13006_v6 }
 0x298   :  { %12665 = vrsqrt.f32 %v271_v39  ;;  %vm275_vm6 = vcmp.eq.f32.partialorder %v271_v39, inf  ;;  %v278_v51 = vand.u32 2147483648, %v271_v39  ;;  %vm277_vm7 = vcmp.eq.f32.partialorder %v271_v39, 0.0 }
 0x299   :  { %v270_v40 = vpop.xlane.xlu1 %269 }
 0x29a   :  { %v272_v41 = vmul.f32 0.032258064, %v270_v40  ;;  %v13225_v40 = vrot.slane %v40_v38, %v418_v35 }
 0x29c   :  { %12667 = vrsqrt.f32 %v272_v41  ;;  %vm282_vm8 = vcmp.eq.f32.partialorder %v272_v41, inf  ;;  %v285_v57 = vand.u32 2147483648, %v272_v41  ;;  %vm284_vm9 = vcmp.eq.f32.partialorder %v272_v41, 0.0 }
 0x29d   :  { %v154_v42 = vpop.permute.xlu1 %153 }
 0x29e   :  { %vm158_vm4 = vcmp.eq.s32.totalorder %v154_v42, %v13069_v8 }
 0x29f   :  { %v11061_v43 = vsel %vm158_vm4, 1.0, %v13006_v6 }
 0x2a0   :  { %11656 = vmatprep.mubr.msk.f32.mxu1 %vm65_vm0, %v11061_v43 }
 0x2a1   :  { %v157_v46 = vpop.permute.xlu1 %156 }
 0x2a2   :  { %v12666_v47 = vpop.eup %12665  ;;  %vm159_vm5 = vcmp.eq.s32.totalorder %v157_v46, %v13069_v8 }
 0x2a3   :  { %v274_v49 = vmul.f32 %v12666_v47, %v271_v39  ;;  %v11062_v50 = vsel %vm159_vm5, 1.0, %v13006_v6  ;;  %vm2008_vm5 = vcmask 523264  }
 0x2a4   :  { %11657 = vmatmul.mubr.msk.f32.vlgmr.msra.gmra.mrb[0].mxu1 %vm65_vm0, %v11062_v50 }
 0x2a5   :  { %v276_v52 = vsel %vm275_vm6, %v271_v39, %v274_v49  ;;  %12424 = vmatpush3.bf16.msra.mxu1 %v12421_v37  ;;  %v13222_v37 = vrot.slane %v39_v36, %v418_v35 }
 0x2a6   :  { %v12668_v53 = vpop.eup %12667  ;;  %12426 = vmatprep.subr.bf16.mxu1 %v12425_v48  ;;  %v279_v54 = vsel %vm277_vm7, %v278_v51, %v276_v52 }
 0x2a7   :  { %v281_v55 = vmul.f32 %v12668_v53, %v272_v41  ;;  %v287_v56 = vadd.f32 1e-06, %v279_v54 }
 0x2a9   :  { %v283_v58 = vsel %vm282_vm8, %v272_v41, %v281_v55  ;;  %12669 = vrcp.f32 %v287_v56  ;;  %12428 = vmatpush3.bf16.msra.mxu1 %v12425_v48 }
 0x2aa   :  { %v286_v59 = vsel %vm284_vm9, %v285_v57, %v283_v58  ;;  %11670 = vmatprep.subr.mxu1 %v13006_v6 }
 0x2ab   :  { %v288_v60 = vadd.f32 1e-06, %v286_v59 }
 0x2ad   :  { %12671 = vrcp.f32 %v288_v60 }
 0x2b3   :  { %v12670_v63 = vpop.eup %12669 }
 0x2b4   :  { %v297_v1 = vmul.f32 %v12670_v63, %v295_v62 }
 0x2b6   :  { %v303_v3 = vadd.f32 %v11066_v0, %v297_v1 }
 0x2b7   :  { %v12672_v4 = vpop.eup %12671 }
 0x2b8   :  { %v298_v5 = vmul.f32 %v12672_v4, %v296_v2  ;;  %11667 = vmatprep.mubr.msk.f32.mxu1 %vm251_vm3, %v303_v3 }
 0x2ba   :  { %v304_v8 = vadd.f32 %v11066_v0, %v298_v5 }
 0x2bc   :  { %11668 = vmatmul.mubr.msk.f32.vlgmr.msra.gmra.mrb[2].mxu1 %vm251_vm3, %v304_v8 }
 0x2bd   :  { %11672 = vmatprep.mubr.msk.f32.mxu1 %vm13009_vm10, %v13006_v6 }
 0x377   :  { %v13114_v9 = vpop.f32.mrb[0].mxu1 }
 0x378   :  { %v13116_v10 = vpop.f32.mrb[1].mxu1 }
 0x38f   :  { %v11669_v12 = vpop.f32.mrb[2].mxu1 }
 0x390   :  { %v13118_v13 = vadd.f32 %v11669_v12, %v11067_v11  ;;  %v391_v14 = vpop.f32.mrb[3].mxu1 }
 0x391   :  { %v13120_v15 = vadd.f32 %v11067_v11, %v391_v14 }
 0x392   :  { %404 = vrot.lane.b32.xlu1 %v13118_v13, %s13007_s2 }
 0x393   :  { %406 = vrot.lane.b32.xlu0 %v13120_v15, %s13008_s13 }
 0x396   :  { %402 = vrot.lane.b32.xlu1 %v13120_v15, %s13007_s2 }
 0x39a   :  { %408 = vrot.lane.b32.xlu1 %v13118_v13, %s13008_s13 }
 0x39e   :  { %410 = vrot.lane.b32.xlu1 %v13120_v15, %s13010_s14 }
 0x3a2   :  { %412 = vrot.lane.b32.xlu1 %v13118_v13, %s13010_s14 }
 0x3a6   :  { %426 = vrot.lane.b32.xlu1 %v13120_v15, %s13011_s15 }
 0x3aa   :  { %503 = vrot.lane.b32.xlu1 %v13118_v13, %s13011_s15 }
 0x404   :  { %v13142_v18 = vpop.permute.xlu1 %404 }
 0x405   :  { %655 = vrot.lane.b32.xlu1 %v13142_v18, %s13011_s15  ;;  %v13150_v20 = vpop.permute.xlu0 %406 }
 0x408   :  { %v13146_v19 = vpop.permute.xlu1 %402 }
 0x409   :  { %579 = vrot.lane.b32.xlu0 %v13146_v19, %s13011_s15 }
 0x40c   :  { %v13152_v21 = vpop.permute.xlu1 %408 }
 0x40d   :  { %731 = vrot.lane.b32.xlu0 %v13150_v20, %s13011_s15  ;;  %807 = vrot.lane.b32.xlu1 %v13152_v21, %s13011_s15 }
 0x410   :  { %v13158_v22 = vpop.permute.xlu1 %410 }
 0x411   :  { %883 = vrot.lane.b32.xlu0 %v13158_v22, %s13011_s15 }
 0x414   :  { %v13162_v23 = vpop.permute.xlu1 %412 }
 0x415   :  { %959 = vrot.lane.b32.xlu1 %v13162_v23, %s13011_s15 }
 0x418   :  { %v427_v24 = vpop.permute.xlu1 %426 }
 0x419   :  { %11671 = vmatpush3.xpose.msk.msra.mxu1 %vm428_vm11, %v427_v24 }
 0x41a   :  { %11675 = vmatprep.subr.mxu1 %v13006_v6 }
 0x41c   :  { %11673 = vmatmul.mubr.msk.f32.vlgmr.msra.gmra.mrb[4].mxu1 %vm428_vm11, %v13120_v15  ;;  %v504_v25 = vpop.permute.xlu1 %503 }
 0x41d   :  { %11676 = vmatpush3.xpose.msk.msra.mxu1 %vm428_vm11, %v504_v25  ;;  %11677 = vmatprep.mubr.msk.f32.mxu1 %vm13009_vm10, %v13006_v6 }
 0x41e   :  { %11685 = vmatprep.subr.mxu1 %v13006_v6 }
 0x420   :  { %11678 = vmatmul.mubr.msk.f32.vlgmr.msra.gmra.mrb[6].mxu1 %vm428_vm11, %v13118_v13 }
 0x421   :  { %11687 = vmatprep.mubr.msk.f32.mxu1 %vm13009_vm10, %v13006_v6 }
 0x477   :  { %v656_v26 = vpop.permute.xlu1 %655 }
 0x478   :  { %11686 = vmatpush3.xpose.msk.msra.mxu1 %vm428_vm11, %v656_v26 }
 0x479   :  { %11695 = vmatprep.subr.mxu1 %v13006_v6 }
 0x47b   :  { %v580_v27 = vpop.permute.xlu0 %579  ;;  %11688 = vmatmul.mubr.msk.f32.vlgmr.msra.gmra.mrb[8].mxu1 %vm428_vm11, %v13142_v18 }
 0x47c   :  { %11681 = vmatpush3.xpose.msk.msra.mxu0 %vm428_vm11, %v580_v27  ;;  %11697 = vmatprep.mubr.msk.f32.mxu1 %vm13009_vm10, %v13006_v6 }
 0x47d   :  { %11690 = vmatprep.subr.mxu0 %v13006_v6 }
 0x47f   :  { %11683 = vmatmul.mubr.msk.f32.vlgmr.msra.gmra.mrb[2].mxu0 %vm428_vm11, %v13146_v19  ;;  %v732_v28 = vpop.permute.xlu0 %731  ;;  %v808_v29 = vpop.permute.xlu1 %807 }
 0x480   :  { %11691 = vmatpush3.xpose.msk.msra.mxu0 %vm428_vm11, %v732_v28  ;;  %11696 = vmatpush3.xpose.msk.msra.mxu1 %vm428_vm11, %v808_v29 }
 0x481   :  { %11692 = vmatprep.mubr.msk.f32.mxu0 %vm13009_vm10, %v13006_v6  ;;  %11700 = vmatprep.subr.mxu0 %v13006_v6 }
 0x482   :  { %11705 = vmatprep.subr.mxu1 %v13006_v6 }
 0x483   :  { %11693 = vmatmul.mubr.msk.f32.vlgmr.msra.gmra.mrb[4].mxu0 %vm428_vm11, %v13150_v20  ;;  %v884_v30 = vpop.permute.xlu0 %883  ;;  %11698 = vmatmul.mubr.msk.f32.vlgmr.msra.gmra.mrb[10].mxu1 %vm428_vm11, %v13152_v21 }
 0x484   :  { %11701 = vmatpush3.xpose.msk.msra.mxu0 %vm428_vm11, %v884_v30  ;;  %11702 = vmatprep.mubr.msk.f32.mxu0 %vm13009_vm10, %v13006_v6 }
 0x485   :  { %11707 = vmatprep.mubr.msk.f32.mxu1 %vm13009_vm10, %v13006_v6  ;;  %11710 = vmatprep.subr.mxu0 %v13006_v6 }
 0x487   :  { %11703 = vmatmul.mubr.msk.f32.vlgmr.msra.gmra.mrb[6].mxu0 %vm428_vm11, %v13158_v22  ;;  %v960_v31 = vpop.permute.xlu1 %959 }
 0x488   :  { %11706 = vmatpush3.xpose.msk.msra.mxu1 %vm428_vm11, %v960_v31  ;;  %11712 = vmatprep.mubr.msk.f32.mxu0 %vm13009_vm10, %v13006_v6 }
 0x489   :  { %11715 = vmatprep.subr.mxu1 %v13006_v6 }
 0x48b   :  { %11708 = vmatmul.mubr.msk.f32.vlgmr.msra.gmra.mrb[12].mxu1 %vm428_vm11, %v13162_v23 }
 0x48c   :  { %11717 = vmatprep.mubr.msk.f32.mxu1 %vm13009_vm10, %v13006_v6 }
 0x4ef   :  { %v499_v39 = vpop.f32.mrb[4].mxu1 }
 0x4f0   :  { %v500_v41 = vadd.f32 %v499_v39, %v13222_v37  ;;  %v11674_v42 = vpop.f32.mrb[5].mxu1 }
 0x4f2   :  { %v1035_v7 = vsel %vm428_vm11, %v500_v41, -inf }
 0x4f3   :  { %v575_v43 = vpop.f32.mrb[6].mxu1  ;;  %1036 = vmax.xlane.f32.xlu0 %v1035_v7 }
 0x4f4   :  { %v576_v44 = vadd.f32 %v575_v43, %v13225_v40  ;;  %v11679_v45 = vpop.f32.mrb[7].mxu1 }
 0x4f6   :  { %v1038_v46 = vsel %vm428_vm11, %v576_v44, -inf }
 0x4f7   :  { %1039 = vmax.xlane.f32.xlu1 %v1038_v46 }
 0x54e   :  { %v727_v47 = vpop.f32.mrb[8].mxu1 }
 0x54f   :  { %v11689_v48 = vpop.f32.mrb[9].mxu1  ;;  %v728_v52 = vadd.f32 %v727_v47, %v13225_v40 }
 0x551   :  { %v1044_v61 = vsel %vm428_vm11, %v728_v52, -inf }
 0x552   :  { %v651_v49 = vpop.f32.mrb[2].mxu0 }
 0x553   :  { %v652_v50 = vadd.f32 %v651_v49, %v13222_v37  ;;  %v11684_v51 = vpop.f32.mrb[3].mxu0 }
 0x555   :  { %v1041_v53 = vsel %vm428_vm11, %v652_v50, -inf }
 0x556   :  { %v803_v54 = vpop.f32.mrb[4].mxu0  ;;  %v879_v55 = vpop.f32.mrb[10].mxu1  ;;  %1042 = vmax.xlane.f32.xlu0 %v1041_v53 }
 0x557   :  { %v804_v56 = vadd.f32 %v803_v54, %v13222_v37  ;;  %v11694_v57 = vpop.f32.mrb[5].mxu0  ;;  %v11699_v58 = vpop.f32.mrb[11].mxu1  ;;  %v880_v59 = vadd.f32 %v879_v55, %v13225_v40 }
 0x559   :  { %v1047_v60 = vsel %vm428_vm11, %v804_v56, -inf  ;;  %v1050_v2 = vsel %vm428_vm11, %v880_v59, -inf }
 0x55a   :  { %v955_v62 = vpop.f32.mrb[6].mxu0  ;;  %1048 = vmax.xlane.f32.xlu1 %v1047_v60  ;;  %1045 = vmax.xlane.f32.xlu0 %v1044_v61 }
 0x55b   :  { %v956_v63 = vadd.f32 %v955_v62, %v13222_v37  ;;  %v11704_v0 = vpop.f32.mrb[7].mxu0 }
 0x55d   :  { %v1053_v1 = vsel %vm428_vm11, %v956_v63, -inf }
 0x55e   :  { %v1031_v3 = vpop.f32.mrb[12].mxu1  ;;  %1054 = vmax.xlane.f32.xlu1 %v1053_v1  ;;  %1051 = vmax.xlane.f32.xlu0 %v1050_v2 }
 0x55f   :  { %v1032_v4 = vadd.f32 %v1031_v3, %v13225_v40  ;;  %v11709_v5 = vpop.f32.mrb[13].mxu1 }
 0x561   :  { %v1056_v8 = vsel %vm428_vm11, %v1032_v4, -inf }
 0x562   :  { %1057 = vmax.xlane.f32.xlu0 %v1056_v8 }
 0x56f   :  { %1123 = vrot.lane.b32.xlu1 %v13120_v15, %s13012_s3 }
 0x573   :  { %1275 = vrot.lane.b32.xlu1 %v13146_v19, %s13012_s3 }
 0x577   :  { %1351 = vrot.lane.b32.xlu1 %v13142_v18, %s13012_s3 }
 0x578   :  { %1199 = vrot.lane.b32.xlu0 %v13118_v13, %s13012_s3 }
 0x57b   :  { %1503 = vrot.lane.b32.xlu1 %v13152_v21, %s13012_s3 }
 0x57c   :  { %1427 = vrot.lane.b32.xlu0 %v13150_v20, %s13012_s3 }
 0x580   :  { %v1037_v14 = vpop.xlane.xlu0 %1036 }
 0x581   :  { %v1059_v24 = vsub.f32 %v500_v41, %v1037_v14 }
 0x583   :  { %v1067_v25 = vmul.f32 1.442695, %v1059_v24 }
 0x584   :  { %v1040_v11 = vpop.xlane.xlu1 %1039 }
 0x585   :  { %v1060_v12 = vsub.f32 %v576_v44, %v1040_v11 }
 0x587   :  { %v1069_v15 = vmul.f32 1.442695, %v1060_v12 }
 0x589   :  { %12673 = vpow2.f32 %v1069_v15 }
 0x58a   :  { %12675 = vpow2.f32 %v1067_v25 }
 0x593   :  { %v13255_v19 = vpop.eup %12673 }
 0x594   :  { %v1086_v18 = vsel %vm428_vm11, %v13255_v19, 0.0  ;;  %v13259_v13 = vpop.eup %12675 }
 0x595   :  { %v1083_v21 = vsel %vm428_vm11, %v13259_v13, 0.0 }
 0x59b   :  { %1087 = vadd.xlane.f32.xlu0 %v1086_v18 }
 0x59f   :  { %1084 = vadd.xlane.f32.xlu1 %v1083_v21 }
 0x5e3   :  { %v1043_v20 = vpop.xlane.xlu0 %1042 }
 0x5e4   :  { %v1061_v26 = vsub.f32 %v652_v50, %v1043_v20 }
 0x5e6   :  { %v1071_v27 = vmul.f32 1.442695, %v1061_v26 }
 0x5e7   :  { %v1049_v28 = vpop.xlane.xlu1 %1048  ;;  %v1046_v29 = vpop.xlane.xlu0 %1045 }
 0x5e8   :  { %12677 = vpow2.f32 %v1071_v27  ;;  %v1063_v30 = vsub.f32 %v804_v56, %v1049_v28  ;;  %v1062_v31 = vsub.f32 %v728_v52, %v1046_v29 }
 0x5ea   :  { %v1075_v32 = vmul.f32 1.442695, %v1063_v30  ;;  %v1073_v33 = vmul.f32 1.442695, %v1062_v31 }
 0x5eb   :  { %v1055_v34 = vpop.xlane.xlu1 %1054  ;;  %v1052_v35 = vpop.xlane.xlu0 %1051 }
 0x5ec   :  { %12679 = vpow2.f32 %v1075_v32  ;;  %v1065_v36 = vsub.f32 %v956_v63, %v1055_v34  ;;  %v1064_v38 = vsub.f32 %v880_v59, %v1052_v35  ;;  %v310_v34 = vld [vmem:[#allocation2 + $0x60] sm:$0xff]  ;;  %v311_v35 = vld [vmem:[#allocation2 + $0x68] sm:$0xff] }
 0x5ed   :  { %12681 = vpow2.f32 %v1073_v33 }
 0x5ee   :  { %v1079_v39 = vmul.f32 1.442695, %v1065_v36  ;;  %v1077_v41 = vmul.f32 1.442695, %v1064_v38  ;;  %v12429_v36 = vpack.c.bf16 %v311_v35, %v310_v34  ;;  %v312_v38 = vld [vmem:[#allocation2 + $0x70] sm:$0xff]  ;;  %v1911_v34 = vld [vmem:[#allocation2 + $0xd8] sm:$0xff] }
 0x5ef   :  { %v1124_v42 = vpop.permute.xlu1 %1123  ;;  %v1058_v7 = vpop.xlane.xlu0 %1057 }
 0x5f0   :  { %12683 = vpow2.f32 %v1079_v39  ;;  %v1066_v43 = vsub.f32 %v1032_v4, %v1058_v7  ;;  %11711 = vmatpush3.msra.mxu0 %v1124_v42  ;;  %v313_v39 = vld [vmem:[#allocation2 + $0x78] sm:$0xff] }
 0x5f1   :  { %12685 = vpow2.f32 %v1077_v41  ;;  %11720 = vmatprep.subr.mxu0 %v13006_v6  ;;  %v12433_v41 = vpack.c.bf16 %v313_v39, %v312_v38  ;;  %v1913_v38 = vld [vmem:[#allocation2 + $0xe8] sm:$0xff] }
 0x5f2   :  { %v12678_v44 = vpop.eup %12677  ;;  %v1081_v45 = vmul.f32 1.442695, %v1066_v43 }
 0x5f3   :  { %v1200_v46 = vpop.permute.xlu0 %1199  ;;  %v1089_v47 = vsel %vm428_vm11, %v12678_v44, 0.0  ;;  %v1276_v58 = vpop.permute.xlu1 %1275 }
 0x5f4   :  { %12687 = vpow2.f32 %v1081_v45  ;;  %1090 = vadd.xlane.f32.xlu1 %v1089_v47  ;;  %11716 = vmatpush3.msra.mxu1 %v1200_v46 }
 0x5f5   :  { %11725 = vmatprep.subr.mxu1 %v13006_v6 }
 0x5f6   :  { %v12680_v48 = vpop.eup %12679 }
 0x5f7   :  { %v12682_v49 = vpop.eup %12681  ;;  %v1095_v50 = vsel %vm428_vm11, %v12680_v48, 0.0  ;;  %v1352_v59 = vpop.permute.xlu1 %1351 }
 0x5f8   :  { %1096 = vadd.xlane.f32.xlu1 %v1095_v50  ;;  %v1092_v51 = vsel %vm428_vm11, %v12682_v49, 0.0  ;;  %v1428_v60 = vpop.permute.xlu0 %1427 }
 0x5f9   :  { %1093 = vadd.xlane.f32.xlu0 %v1092_v51 }
 0x5fa   :  { %v12684_v52 = vpop.eup %12683 }
 0x5fb   :  { %v13268_v53 = vpop.eup %12685  ;;  %v1101_v54 = vsel %vm428_vm11, %v12684_v52, 0.0  ;;  %v1504_v61 = vpop.permute.xlu1 %1503 }
 0x5fc   :  { %1102 = vadd.xlane.f32.xlu1 %v1101_v54  ;;  %v1098_v55 = vsel %vm428_vm11, %v13268_v53, 0.0 }
 0x5fd   :  { %1099 = vadd.xlane.f32.xlu0 %v1098_v55 }
 0x5fe   :  { %v13273_v56 = vpop.eup %12687 }
 0x5ff   :  { %v1104_v57 = vsel %vm428_vm11, %v13273_v56, 0.0 }
 0x601   :  { %1105 = vadd.xlane.f32.xlu0 %v1104_v57 }
 0x60d   :  { %1655 = vrot.lane.b32.xlu1 %v13162_v23, %s13012_s3 }
 0x617   :  { %1579 = vrot.lane.b32.xlu0 %v13158_v22, %s13012_s3 }
 0x628   :  { %v1088_v62 = vpop.xlane.xlu0 %1087 }
 0x629   :  { %12689 = vrcp.f32 %v1088_v62 }
 0x62c   :  { %v1085_v63 = vpop.xlane.xlu1 %1084 }
 0x62d   :  { %12691 = vrcp.f32 %v1085_v63 }
 0x633   :  { %v12690_v0 = vpop.eup %12689 }
 0x634   :  { %v1116_v1 = vmul.f32 %v12690_v0, %v13255_v19 }
 0x636   :  { %11718 = vmatmul.mubr.msk.f32.vlgmr.msra.gmra.mrb[14].mxu1 %vm428_vm11, %v1116_v1  ;;  %v11094_v1 = vld [vmem:[#allocation2 + $0x80] ss:$0 sm:$0xff] }
 0x637   :  { %v12692_v2 = vpop.eup %12691  ;;  %11726 = vmatpush3.msra.mxu1 %v1352_v59  ;;  %11727 = vmatprep.mubr.msk.f32.mxu1 %vm13009_vm10, %v13006_v6 }
 0x638   :  { %v1115_v22 = vmul.f32 %v12692_v2, %v13259_v13  ;;  %11735 = vmatprep.subr.mxu1 %v13006_v6 }
 0x63a   :  { %11713 = vmatmul.mubr.msk.f32.vlgmr.msra.gmra.mrb[8].mxu0 %vm428_vm11, %v1115_v22 }
 0x63b   :  { %11721 = vmatpush3.msra.mxu0 %v1276_v58  ;;  %11722 = vmatprep.mubr.msk.f32.mxu0 %vm13009_vm10, %v13006_v6 }
 0x63c   :  { %11730 = vmatprep.subr.mxu0 %v13006_v6 }
 0x681   :  { %v1091_v23 = vpop.xlane.xlu1 %1090 }
 0x682   :  { %12693 = vrcp.f32 %v1091_v23 }
 0x685   :  { %v1097_v3 = vpop.xlane.xlu1 %1096 }
 0x686   :  { %12695 = vrcp.f32 %v1097_v3  ;;  %v1094_v4 = vpop.xlane.xlu0 %1093 }
 0x687   :  { %12697 = vrcp.f32 %v1094_v4 }
 0x689   :  { %v1103_v5 = vpop.xlane.xlu1 %1102 }
 0x68a   :  { %12699 = vrcp.f32 %v1103_v5  ;;  %v1100_v8 = vpop.xlane.xlu0 %1099 }
 0x68b   :  { %12701 = vrcp.f32 %v1100_v8 }
 0x68c   :  { %v12694_v11 = vpop.eup %12693 }
 0x68d   :  { %v1117_v12 = vmul.f32 %v12694_v11, %v12678_v44  ;;  %v1656_v27 = vpop.permute.xlu1 %1655 }
 0x68e   :  { %v1106_v14 = vpop.xlane.xlu0 %1105 }
 0x68f   :  { %12703 = vrcp.f32 %v1106_v14  ;;  %11723 = vmatmul.mubr.msk.f32.vlgmr.msra.gmra.mrb[10].mxu0 %vm428_vm11, %v1117_v12 }
 0x690   :  { %v12696_v24 = vpop.eup %12695  ;;  %11731 = vmatpush3.msra.mxu0 %v1428_v60  ;;  %11732 = vmatprep.mubr.msk.f32.mxu0 %vm13009_vm10, %v13006_v6 }
 0x691   :  { %v12698_v15 = vpop.eup %12697  ;;  %11740 = vmatprep.subr.mxu0 %v13006_v6  ;;  %v1119_v25 = vmul.f32 %v12696_v24, %v12680_v48 }
 0x692   :  { %v1580_v19 = vpop.permute.xlu0 %1579  ;;  %v1118_v18 = vmul.f32 %v12698_v15, %v12682_v49 }
 0x693   :  { %11733 = vmatmul.mubr.msk.f32.vlgmr.msra.gmra.mrb[12].mxu0 %vm428_vm11, %v1119_v25 }
 0x694   :  { %v12700_v13 = vpop.eup %12699  ;;  %11728 = vmatmul.mubr.msk.f32.vlgmr.msra.gmra.mrb[16].mxu1 %vm428_vm11, %v1118_v18  ;;  %11741 = vmatpush3.msra.mxu0 %v1580_v19 }
 0x695   :  { %v12702_v21 = vpop.eup %12701  ;;  %11736 = vmatpush3.msra.mxu1 %v1504_v61  ;;  %11737 = vmatprep.mubr.msk.f32.mxu1 %vm13009_vm10, %v13006_v6  ;;  %v1121_v20 = vmul.f32 %v12700_v13, %v12684_v52 }
 0x696   :  { %11742 = vmatprep.mubr.msk.f32.mxu0 %vm13009_vm10, %v13006_v6  ;;  %11745 = vmatprep.subr.mxu1 %v13006_v6  ;;  %v1120_v26 = vmul.f32 %v12702_v21, %v13268_v53  ;;  %v1903_v21 = vld [vmem:[#allocation2 + $0x98] sm:$0xff] }
 0x697   :  { %11743 = vmatmul.mubr.msk.f32.vlgmr.msra.gmra.mrb[14].mxu0 %vm428_vm11, %v1121_v20  ;;  %12430 = vmatprep.subr.bf16.mxu0 %v12429_v36  ;;  %v1904_v20 = vld [vmem:[#allocation2 + $0xa0] sm:$0xff] }
 0x698   :  { %11738 = vmatmul.mubr.msk.f32.vlgmr.msra.gmra.mrb[18].mxu1 %vm428_vm11, %v1120_v26  ;;  %12432 = vmatpush3.bf16.msra.mxu0 %v12429_v36  ;;  %v1905_v26 = vld [vmem:[#allocation2 + $0xa8] sm:$0xff]  ;;  %v1912_v36 = vld [vmem:[#allocation2 + $0xe0] sm:$0xff] }
 0x699   :  { %v12704_v28 = vpop.eup %12703  ;;  %11746 = vmatpush3.msra.mxu1 %v1656_v27  ;;  %11747 = vmatprep.mubr.msk.f32.mxu1 %vm13009_vm10, %v13006_v6  ;;  %v12437_v27 = vpack.c.bf16 %v1904_v20, %v1903_v21  ;;  %v12453_v39 = vpack.c.bf16 %v1913_v38, %v1912_v36  ;;  %v2147_v36 = vld [vmem:[#allocation2 + $0x120] sm:$0xff]  ;;  %v2148_v38 = vld [vmem:[#allocation2 + $0x128] sm:$0xff] }
 0x69a   :  { %v1122_v29 = vmul.f32 %v12704_v28, %v13273_v56  ;;  %12434 = vmatprep.subr.bf16.mxu0 %v12433_v41  ;;  %v1906_v28 = vld [vmem:[#allocation2 + $0xb0] sm:$0xff] }
 0x69b   :  { %12438 = vmatprep.subr.bf16.mxu1 %v12437_v27 }
 0x69c   :  { %11748 = vmatmul.mubr.msk.f32.vlgmr.msra.gmra.mrb[20].mxu1 %vm428_vm11, %v1122_v29  ;;  %12436 = vmatpush3.bf16.msra.mxu0 %v12433_v41  ;;  %v12441_v29 = vpack.c.bf16 %v1906_v28, %v1905_v26 }
 0x69d   :  { %12440 = vmatpush3.bf16.msra.mxu1 %v12437_v27 }
 0x69e   :  { %12442 = vmatprep.subr.bf16.mxu1 %v12441_v29 }
 0x6a1   :  { %12444 = vmatpush3.bf16.msra.mxu1 %v12441_v29 }
 0x709   :  { %v1271_v30 = vpop.f32.mrb[14].mxu1 }
 0x70a   :  { %v11719_v31 = vpop.f32.mrb[15].mxu1 }
 0x70b   :  { %v1909_v31 = vld [vmem:[#allocation2 + $0xc8] sm:$0xff] }
 0x70d   :  { %v1195_v32 = vpop.f32.mrb[8].mxu0 }
 0x70e   :  { %v11714_v33 = vpop.f32.mrb[9].mxu0 }
 0x762   :  { %v1347_v42 = vpop.f32.mrb[10].mxu0 }
 0x763   :  { %v11724_v7 = vpop.f32.mrb[11].mxu0  ;;  %1733 = vrot.lane.b32.xlu0 %v1347_v42, %s13004_s29 }
 0x766   :  { %v1499_v43 = vpop.f32.mrb[12].mxu0 }
 0x767   :  { %v1423_v44 = vpop.f32.mrb[16].mxu1  ;;  %1741 = vrot.lane.b32.xlu0 %v1499_v43, %s13013_s20  ;;  %v11734_v45 = vpop.f32.mrb[13].mxu0 }
 0x768   :  { %1735 = vrot.lane.b32.xlu1 %v1423_v44, %s13004_s29  ;;  %v11729_v46 = vpop.f32.mrb[17].mxu1 }
 0x76a   :  { %v1651_v47 = vpop.f32.mrb[14].mxu0 }
 0x76b   :  { %v1575_v48 = vpop.f32.mrb[18].mxu1  ;;  %1749 = vrot.lane.b32.xlu0 %v1651_v47, %s13014_s21  ;;  %v11744_v49 = vpop.f32.mrb[15].mxu0 }
 0x76c   :  { %1743 = vrot.lane.b32.xlu1 %v1575_v48, %s13013_s20  ;;  %v11739_v50 = vpop.f32.mrb[19].mxu1 }
 0x76f   :  { %v1727_v51 = vpop.f32.mrb[20].mxu1 }
 0x770   :  { %1751 = vrot.lane.b32.xlu1 %v1727_v51, %s13014_s21  ;;  %v11749_v52 = vpop.f32.mrb[21].mxu1 }
 0x7d5   :  { %v1734_v53 = vpop.permute.xlu0 %1733 }
 0x7d6   :  { %v1755_v56 = vsel %vm428_vm11, %v1195_v32, %v1734_v53  ;;  %v1910_v32 = vld [vmem:[#allocation2 + $0xd0] sm:$0xff] }
 0x7d7   :  { %v12449_v35 = vpack.c.bf16 %v1911_v34, %v1910_v32 }
 0x7d9   :  { %v1742_v54 = vpop.permute.xlu0 %1741 }
 0x7da   :  { %v1736_v55 = vpop.permute.xlu1 %1735  ;;  %v1757_v57 = vsel %vm65_vm0, %v1755_v56, %v1742_v54  ;;  %v11097_v56 = vld [vmem:[#allocation2 + $0x88] ss:$0 sm:$0xff] }
 0x7db   :  { %v1756_v61 = vsel %vm428_vm11, %v1271_v30, %v1736_v55  ;;  %v1908_v30 = vld [vmem:[#allocation2 + $0xc0] sm:$0xff] }
 0x7dc   :  { %v12445_v33 = vpack.c.bf16 %v1909_v31, %v1908_v30 }
 0x7dd   :  { %v1750_v58 = vpop.permute.xlu0 %1749 }
 0x7de   :  { %v1744_v59 = vpop.permute.xlu1 %1743  ;;  %v1760_v60 = vsel %vm1759_vm14, %v1757_v57, %v1750_v58  ;;  %12446 = vmatprep.subr.bf16.mxu0 %v12445_v33 }
 0x7df   :  { %11758 = vmatprep.mubr.msk.f32.mxu0 %vm251_vm3, %v1760_v60  ;;  %v1758_v62 = vsel %vm65_vm0, %v1756_v61, %v1744_v59  ;;  %v11098_v59 = vld [vmem:[#allocation2 + $0x90] ss:$0 sm:$0xff] }
 0x7e2   :  { %v1752_v63 = vpop.permute.xlu1 %1751 }
 0x7e3   :  { %v1761_v0 = vsel %vm1759_vm14, %v1758_v62, %v1752_v63 }
 0x7e4   :  { %11759 = vmatmul.mubr.msk.f32.vlgmr.msra.gmra.mrb[16].mxu0 %vm251_vm3, %v1761_v0 }
 0x7e5   :  { %12448 = vmatpush3.bf16.msra.mxu0 %v12445_v33 }
 0x7e6   :  { %12450 = vmatprep.subr.bf16.mxu0 %v12449_v35 }
 0x7e9   :  { %12452 = vmatpush3.bf16.msra.mxu0 %v12449_v35  ;;  %v2146_v35 = vld [vmem:[#allocation2 + $0x118] sm:$0xff] }
 0x7ea   :  { %12454 = vmatprep.subr.bf16.mxu0 %v12453_v39 }
 0x7ed   :  { %12456 = vmatpush3.bf16.msra.mxu0 %v12453_v39  ;;  %v12461_v39 = vpack.c.bf16 %v2147_v36, %v2146_v35 }
 0x7ef   :  { %12462 = vmatprep.subr.bf16.mxu1 %v12461_v39 }
 0x8b7   :  { %v11760_v2 = vpop.f32.mrb[16].mxu0 }
 0x8b8   :  { %v1844_v22 = vadd.f32 %v11760_v2, %v11094_v1  ;;  %v1838_v23 = vpop.f32.mrb[17].mxu0  ;;  %v1914_v2 = vld [vmem:[#allocation2 + $0xf0] sm:$0xff] }
 0x8b9   :  { %v1839_v3 = vadd.f32 %v11094_v1, %v1838_v23 }
 0x8ba   :  { %v13324_v4 = vadd.f32 %v1844_v22, %v13079_v17  ;;  %v1915_v22 = vld [vmem:[#allocation2 + $0xf8] sm:$0xff] }
 0x8bb   :  { %v13327_v5 = vadd.f32 %v1839_v3, %v13077_v16  ;;  %v12457_v23 = vpack.c.bf16 %v1915_v22, %v1914_v2  ;;  %v11099_v3 = vld [vmem:[#allocation2 + $0xb8] ss:$0 sm:$0xff] }
 0x8bc   :  { %v1854_v8 = vsel %vm251_vm3, %v13324_v4, 0.0 }
 0x8bd   :  { %1855 = vadd.xlane.f32.xlu1 %v1854_v8  ;;  %v1851_v11 = vsel %vm251_vm3, %v13327_v5, 0.0  ;;  %12458 = vmatprep.subr.bf16.mxu0 %v12457_v23 }
 0x8be   :  { %1852 = vadd.xlane.f32.xlu0 %v1851_v11  ;;  %12460 = vmatpush3.bf16.msra.mxu0 %v12457_v23  ;;  %v11107_v23 = vld [vmem:[#allocation2 + $0x138] ss:$0 sm:$0xff] }
 0x8bf   :  { %11812 = vmatprep.subr.mxu0 %v13006_v6 }
 0x94a   :  { %v1856_v12 = vpop.xlane.xlu1 %1855 }
 0x94b   :  { %v1858_v14 = vmul.f32 0.03125, %v1856_v12  ;;  %v1853_v24 = vpop.xlane.xlu0 %1852 }
 0x94c   :  { %v1857_v15 = vmul.f32 0.03125, %v1853_v24 }
 0x94d   :  { %v1860_v25 = vsub.f32 %v13324_v4, %v1858_v14 }
 0x94e   :  { %v1859_v17 = vsub.f32 %v13327_v5, %v1857_v15 }
 0x94f   :  { %v1862_v18 = vmul.f32 %v1860_v25, %v1860_v25  ;;  %v1894_v61 = vmul.f32 %v11097_v56, %v1860_v25  ;;  %v11102_v25 = vld [vmem:[#allocation2 + $0x100] ss:$0 sm:$0xff] }
 0x950   :  { %v1861_v19 = vmul.f32 %v1859_v17, %v1859_v17  ;;  %v1893_v57 = vmul.f32 %v11097_v56, %v1859_v17 }
 0x951   :  { %v1866_v13 = vsel %vm251_vm3, %v1862_v18, 0.0 }
 0x952   :  { %v1863_v16 = vsel %vm251_vm3, %v1861_v19, 0.0 }
 0x953   :  { %1864 = vadd.xlane.f32.xlu0 %v1863_v16 }
 0x957   :  { %1867 = vadd.xlane.f32.xlu0 %v1866_v13 }
 0x9e0   :  { %v1865_v41 = vpop.xlane.xlu0 %1864 }
 0x9e1   :  { %v1869_v42 = vmul.f32 0.032258064, %v1865_v41  ;;  %v2149_v41 = vld [vmem:[#allocation2 + $0x130] sm:$0xff] }
 0x9e3   :  { %12705 = vrsqrt.f32 %v1869_v42  ;;  %vm1873_vm15 = vcmp.eq.f32.partialorder %v1869_v42, inf  ;;  %v1876_v46 = vand.u32 2147483648, %v1869_v42  ;;  %vm1875_vm1 = vcmp.eq.f32.partialorder %v1869_v42, 0.0 }
 0x9e4   :  { %v1868_v7 = vpop.xlane.xlu0 %1867 }
 0x9e5   :  { %v1870_v43 = vmul.f32 0.032258064, %v1868_v7 }
 0x9e7   :  { %12707 = vrsqrt.f32 %v1870_v43  ;;  %vm1880_vm2 = vcmp.eq.f32.partialorder %v1870_v43, inf  ;;  %v1883_v52 = vand.u32 2147483648, %v1870_v43  ;;  %vm1882_vm4 = vcmp.eq.f32.partialorder %v1870_v43, 0.0 }
 0x9ed   :  { %v12706_v44 = vpop.eup %12705 }
 0x9ee   :  { %v1872_v45 = vmul.f32 %v12706_v44, %v1869_v42 }
 0x9f0   :  { %v1874_v47 = vsel %vm1873_vm15, %v1869_v42, %v1872_v45  ;;  %v12465_v42 = vpack.c.bf16 %v2149_v41, %v2148_v38 }
 0x9f1   :  { %v12708_v48 = vpop.eup %12707  ;;  %v1877_v49 = vsel %vm1875_vm1, %v1876_v46, %v1874_v47 }
 0x9f2   :  { %v1879_v50 = vmul.f32 %v12708_v48, %v1870_v43  ;;  %v1885_v51 = vadd.f32 1e-06, %v1877_v49 }
 0x9f4   :  { %v1881_v53 = vsel %vm1880_vm2, %v1870_v43, %v1879_v50  ;;  %12709 = vrcp.f32 %v1885_v51 }
 0x9f5   :  { %v1884_v54 = vsel %vm1882_vm4, %v1883_v52, %v1881_v53 }
 0x9f6   :  { %v1886_v55 = vadd.f32 1e-06, %v1884_v54 }
 0x9f8   :  { %12711 = vrcp.f32 %v1886_v55 }
 0x9fe   :  { %v12710_v58 = vpop.eup %12709 }
 0x9ff   :  { %v1895_v60 = vmul.f32 %v12710_v58, %v1893_v57  ;;  %v11105_v58 = vld [vmem:[#allocation2 + $0x108] ss:$0 sm:$0xff] }
 0xa01   :  { %v1901_v62 = vadd.f32 %v11098_v59, %v1895_v60 }
 0xa02   :  { %v12712_v63 = vpop.eup %12711 }
 0xa03   :  { %v1896_v0 = vmul.f32 %v12712_v63, %v1894_v61  ;;  %11769 = vmatprep.mubr.msk.f32.mxu1 %vm251_vm3, %v1901_v62  ;;  %v11106_v63 = vld [vmem:[#allocation2 + $0x110] ss:$0 sm:$0xff] }
 0xa05   :  { %v1902_v1 = vadd.f32 %v11098_v59, %v1896_v0 }
 0xa07   :  { %11770 = vmatmul.mubr.msk.f32.vlgmr.msra.gmra.mrb[22].mxu1 %vm251_vm3, %v1902_v1 }
 0xa08   :  { %12464 = vmatpush3.bf16.msra.mxu1 %v12461_v39 }
 0xa09   :  { %12466 = vmatprep.subr.bf16.mxu1 %v12465_v42 }
 0xa0c   :  { %12468 = vmatpush3.bf16.msra.mxu1 %v12465_v42 }
 0xa0d   :  { %11802 = vmatprep.subr.mxu1 %v13006_v6 }
 0xada   :  { %v11771_v8 = vpop.f32.mrb[22].mxu1 }
 0xadb   :  { %v1999_v11 = vadd.f32 %v11771_v8, %v11099_v3  ;;  %v1993_v12 = vpop.f32.mrb[23].mxu1 }
 0xadc   :  { %v1994_v14 = vadd.f32 %v11099_v3, %v1993_v12 }
 0xadd   :  { %v2003_v15 = vmax.f32 %v1999_v11, 0.0 }
 0xade   :  { %v2002_v24 = vmax.f32 %v1994_v14, 0.0 }
 0xae0   :  { %11788 = vmatprep.mubr.msk.f32.mxu0 %vm2008_vm5, %v2002_v24 }
 0xae1   :  { %11789 = vmatmul.mubr.msk.f32.vlgmr.msra.gmra.mrb[18].mxu0 %vm2008_vm5, %v2003_v15 }
 0xae2   :  { %11814 = vmatprep.mubr.msk.f32.mxu0 %vm13009_vm10, %v13006_v6 }
 0xbb4   :  { %v11790_v17 = vpop.f32.mrb[18].mxu0 }
 0xbb5   :  { %v2087_v19 = vadd.f32 %v11790_v17, %v11102_v25  ;;  %v2081_v16 = vpop.f32.mrb[19].mxu0 }
 0xbb6   :  { %v2082_v18 = vadd.f32 %v11102_v25, %v2081_v16 }
 0xbb7   :  { %v13345_v13 = vadd.f32 %v2087_v19, %v13324_v4 }
 0xbb8   :  { %v13348_v21 = vadd.f32 %v2082_v18, %v13327_v5 }
 0xbb9   :  { %v2097_v20 = vsel %vm251_vm3, %v13345_v13, 0.0 }
 0xbba   :  { %2098 = vadd.xlane.f32.xlu0 %v2097_v20  ;;  %v2094_v26 = vsel %vm251_vm3, %v13348_v21, 0.0 }
 0xbbb   :  { %2095 = vadd.xlane.f32.xlu1 %v2094_v26 }
 0xc47   :  { %v2099_v27 = vpop.xlane.xlu0 %2098 }
 0xc48   :  { %v2101_v28 = vmul.f32 0.03125, %v2099_v27  ;;  %v2096_v29 = vpop.xlane.xlu1 %2095 }
 0xc49   :  { %v2100_v30 = vmul.f32 0.03125, %v2096_v29 }
 0xc4a   :  { %v2103_v31 = vsub.f32 %v13345_v13, %v2101_v28 }
 0xc4b   :  { %v2102_v4 = vsub.f32 %v13348_v21, %v2100_v30 }
 0xc4c   :  { %v2105_v32 = vmul.f32 %v2103_v31, %v2103_v31  ;;  %v2137_v59 = vmul.f32 %v11105_v58, %v2103_v31 }
 0xc4d   :  { %v2104_v33 = vmul.f32 %v2102_v4, %v2102_v4  ;;  %v2136_v61 = vmul.f32 %v11105_v58, %v2102_v4 }
 0xc4e   :  { %v2109_v5 = vsel %vm251_vm3, %v2105_v32, 0.0 }
 0xc4f   :  { %2110 = vadd.xlane.f32.xlu0 %v2109_v5  ;;  %v2106_v34 = vsel %vm251_vm3, %v2104_v33, 0.0 }
 0xc50   :  { %2107 = vadd.xlane.f32.xlu1 %v2106_v34 }
 0xcdc   :  { %v2111_v7 = vpop.xlane.xlu0 %2110 }
 0xcdd   :  { %v2113_v43 = vmul.f32 0.032258064, %v2111_v7  ;;  %v2108_v44 = vpop.xlane.xlu1 %2107 }
 0xcde   :  { %v2112_v45 = vmul.f32 0.032258064, %v2108_v44 }
 0xcdf   :  { %12713 = vrsqrt.f32 %v2113_v43  ;;  %vm2123_vm6 = vcmp.eq.f32.partialorder %v2113_v43, inf  ;;  %v2126_v49 = vand.u32 2147483648, %v2113_v43  ;;  %vm2125_vm7 = vcmp.eq.f32.partialorder %v2113_v43, 0.0 }
 0xce0   :  { %12715 = vrsqrt.f32 %v2112_v45  ;;  %vm2116_vm8 = vcmp.eq.f32.partialorder %v2112_v45, inf  ;;  %v2119_v52 = vand.u32 2147483648, %v2112_v45  ;;  %vm2118_vm9 = vcmp.eq.f32.partialorder %v2112_v45, 0.0 }
 0xce9   :  { %v12714_v46 = vpop.eup %12713 }
 0xcea   :  { %v12716_v47 = vpop.eup %12715  ;;  %v2122_v48 = vmul.f32 %v12714_v46, %v2113_v43 }
 0xceb   :  { %v2115_v50 = vmul.f32 %v12716_v47, %v2112_v45 }
 0xcec   :  { %v2124_v51 = vsel %vm2123_vm6, %v2113_v43, %v2122_v48 }
 0xced   :  { %v2127_v53 = vsel %vm2125_vm7, %v2126_v49, %v2124_v51  ;;  %v2117_v54 = vsel %vm2116_vm8, %v2112_v45, %v2115_v50 }
 0xcee   :  { %v2129_v55 = vadd.f32 1e-06, %v2127_v53  ;;  %v2120_v56 = vsel %vm2118_vm9, %v2119_v52, %v2117_v54 }
 0xcef   :  { %v2128_v57 = vadd.f32 1e-06, %v2120_v56 }
 0xcf0   :  { %12717 = vrcp.f32 %v2129_v55 }
 0xcf1   :  { %12719 = vrcp.f32 %v2128_v57 }
 0xcfa   :  { %v12718_v60 = vpop.eup %12717 }
 0xcfb   :  { %v12720_v62 = vpop.eup %12719  ;;  %v2139_v0 = vmul.f32 %v12718_v60, %v2137_v59 }
 0xcfc   :  { %v2138_v1 = vmul.f32 %v12720_v62, %v2136_v61 }
 0xcfd   :  { %v2145_v22 = vadd.f32 %v11106_v63, %v2139_v0 }
 0xcfe   :  { %v2144_v2 = vadd.f32 %v11106_v63, %v2138_v1 }
 0xd00   :  { %11799 = vmatprep.mubr.msk.f32.mxu1 %vm251_vm3, %v2144_v2 }
 0xd01   :  { %11800 = vmatmul.mubr.msk.f32.vlgmr.msra.gmra.mrb[24].mxu1 %vm251_vm3, %v2145_v22 }
 0xd02   :  { %11804 = vmatprep.mubr.msk.f32.mxu1 %vm13009_vm10, %v13006_v6 }
 0xdd4   :  { %v11801_v3 = vpop.f32.mrb[24].mxu1 }
 0xdd5   :  { %v13363_v8 = vadd.f32 %v11801_v3, %v11107_v23  ;;  %v2232_v11 = vpop.f32.mrb[25].mxu1 }
 0xdd6   :  { %v13365_v12 = vadd.f32 %v11107_v23, %v2232_v11 }
 0xdd7   :  { %2245 = vrot.lane.b32.xlu0 %v13363_v8, %s13007_s2 }
 0xdd8   :  { %2243 = vrot.lane.b32.xlu1 %v13365_v12, %s13007_s2 }
 0xddb   :  { %2251 = vrot.lane.b32.xlu0 %v13365_v12, %s13010_s14 }
 0xddc   :  { %2247 = vrot.lane.b32.xlu1 %v13365_v12, %s13008_s13 }
 0xddf   :  { %2255 = vrot.lane.b32.xlu0 %v13365_v12, %s13011_s15 }
 0xde0   :  { %2249 = vrot.lane.b32.xlu1 %v13363_v8, %s13008_s13 }
 0xde4   :  { %2253 = vrot.lane.b32.xlu1 %v13363_v8, %s13010_s14 }
 0xde8   :  { %2331 = vrot.lane.b32.xlu1 %v13363_v8, %s13011_s15 }
 0xe49   :  { %v13383_v14 = vpop.permute.xlu0 %2245 }
 0xe4a   :  { %2483 = vrot.lane.b32.xlu1 %v13383_v14, %s13011_s15  ;;  %v13387_v24 = vpop.permute.xlu1 %2243 }
 0xe4b   :  { %2407 = vrot.lane.b32.xlu0 %v13387_v24, %s13011_s15 }
 0xe4d   :  { %v13391_v15 = vpop.permute.xlu0 %2251 }
 0xe4e   :  { %v13393_v25 = vpop.permute.xlu1 %2247 }
 0xe4f   :  { %2559 = vrot.lane.b32.xlu0 %v13393_v25, %s13011_s15 }
 0xe51   :  { %v2256_v17 = vpop.permute.xlu0 %2255 }
 0xe52   :  { %11803 = vmatpush3.xpose.msk.msra.mxu1 %vm428_vm11, %v2256_v17  ;;  %v13398_v19 = vpop.permute.xlu1 %2249 }
 0xe53   :  { %2711 = vrot.lane.b32.xlu0 %v13391_v15, %s13011_s15  ;;  %2635 = vrot.lane.b32.xlu1 %v13398_v19, %s13011_s15 }
 0xe54   :  { %11807 = vmatprep.subr.mxu1 %v13006_v6 }
 0xe55   :  { %11805 = vmatmul.mubr.msk.f32.vlgmr.msra.gmra.mrb[26].mxu1 %vm428_vm11, %v13365_v12 }
 0xe56   :  { %v13407_v16 = vpop.permute.xlu1 %2253  ;;  %11809 = vmatprep.mubr.msk.f32.mxu1 %vm13009_vm10, %v13006_v6 }
 0xe57   :  { %2787 = vrot.lane.b32.xlu1 %v13407_v16, %s13011_s15 }
 0xe5a   :  { %v2332_v18 = vpop.permute.xlu1 %2331 }
 0xe5b   :  { %11808 = vmatpush3.xpose.msk.msra.mxu1 %vm428_vm11, %v2332_v18 }
 0xe5c   :  { %11817 = vmatprep.subr.mxu1 %v13006_v6 }
 0xe5e   :  { %11810 = vmatmul.mubr.msk.f32.vlgmr.msra.gmra.mrb[28].mxu1 %vm428_vm11, %v13363_v8 }
 0xe5f   :  { %11819 = vmatprep.mubr.msk.f32.mxu1 %vm13009_vm10, %v13006_v6 }
 0xebc   :  { %v2484_v20 = vpop.permute.xlu1 %2483 }
 0xebd   :  { %v2408_v26 = vpop.permute.xlu0 %2407  ;;  %11818 = vmatpush3.xpose.msk.msra.mxu1 %vm428_vm11, %v2484_v20 }
 0xebe   :  { %11813 = vmatpush3.xpose.msk.msra.mxu0 %vm428_vm11, %v2408_v26  ;;  %11827 = vmatprep.subr.mxu1 %v13006_v6 }
 0xebf   :  { %11822 = vmatprep.subr.mxu0 %v13006_v6 }
 0xec0   :  { %11820 = vmatmul.mubr.msk.f32.vlgmr.msra.gmra.mrb[30].mxu1 %vm428_vm11, %v13383_v14 }
 0xec1   :  { %11815 = vmatmul.mubr.msk.f32.vlgmr.msra.gmra.mrb[20].mxu0 %vm428_vm11, %v13387_v24  ;;  %v2560_v27 = vpop.permute.xlu0 %2559  ;;  %11829 = vmatprep.mubr.msk.f32.mxu1 %vm13009_vm10, %v13006_v6 }
 0xec2   :  { %11823 = vmatpush3.xpose.msk.msra.mxu0 %vm428_vm11, %v2560_v27  ;;  %11824 = vmatprep.mubr.msk.f32.mxu0 %vm13009_vm10, %v13006_v6 }
 0xec3   :  { %11832 = vmatprep.subr.mxu0 %v13006_v6 }
 0xec5   :  { %11825 = vmatmul.mubr.msk.f32.vlgmr.msra.gmra.mrb[22].mxu0 %vm428_vm11, %v13393_v25  ;;  %v2712_v28 = vpop.permute.xlu0 %2711  ;;  %v2636_v29 = vpop.permute.xlu1 %2635 }
 0xec6   :  { %11828 = vmatpush3.xpose.msk.msra.mxu1 %vm428_vm11, %v2636_v29  ;;  %11833 = vmatpush3.xpose.msk.msra.mxu0 %vm428_vm11, %v2712_v28 }
 0xec7   :  { %11834 = vmatprep.mubr.msk.f32.mxu0 %vm13009_vm10, %v13006_v6  ;;  %11837 = vmatprep.subr.mxu1 %v13006_v6 }
 0xec8   :  { %11842 = vmatprep.subr.mxu0 %v13006_v6 }
 0xec9   :  { %11830 = vmatmul.mubr.msk.f32.vlgmr.msra.gmra.mrb[32].mxu1 %vm428_vm11, %v13398_v19  ;;  %11835 = vmatmul.mubr.msk.f32.vlgmr.msra.gmra.mrb[24].mxu0 %vm428_vm11, %v13391_v15  ;;  %v2788_v30 = vpop.permute.xlu1 %2787 }
 0xeca   :  { %11838 = vmatpush3.xpose.msk.msra.mxu1 %vm428_vm11, %v2788_v30  ;;  %11839 = vmatprep.mubr.msk.f32.mxu1 %vm13009_vm10, %v13006_v6 }
 0xecb   :  { %11847 = vmatprep.subr.mxu1 %v13006_v6  ;;  %11844 = vmatprep.mubr.msk.f32.mxu0 %vm13009_vm10, %v13006_v6 }
 0xecd   :  { %11840 = vmatmul.mubr.msk.f32.vlgmr.msra.gmra.mrb[34].mxu1 %vm428_vm11, %v13407_v16 }
 0xece   :  { %11849 = vmatprep.mubr.msk.f32.mxu1 %vm13009_vm10, %v13006_v6 }
 0xf28   :  { %v2327_v31 = vpop.f32.mrb[26].mxu1 }
 0xf29   :  { %v2328_v4 = vadd.f32 %v2327_v31, %v13222_v37  ;;  %v11806_v32 = vpop.f32.mrb[27].mxu1 }
 0xf2b   :  { %v2863_v33 = vsel %vm428_vm11, %v2328_v4, -inf }
 0xf2c   :  { %2864 = vmax.xlane.f32.xlu0 %v2863_v33 }
 0xf31   :  { %v2403_v5 = vpop.f32.mrb[28].mxu1 }
 0xf32   :  { %v2404_v34 = vadd.f32 %v2403_v5, %v13225_v40  ;;  %v11811_v35 = vpop.f32.mrb[29].mxu1 }
 0xf34   :  { %v2866_v36 = vsel %vm428_vm11, %v2404_v34, -inf }
 0xf35   :  { %2867 = vmax.xlane.f32.xlu1 %v2866_v36 }
 0xf93   :  { %v2555_v38 = vpop.f32.mrb[30].mxu1 }
 0xf94   :  { %v2479_v39 = vpop.f32.mrb[20].mxu0  ;;  %v11821_v41 = vpop.f32.mrb[31].mxu1  ;;  %v2556_v43 = vadd.f32 %v2555_v38, %v13225_v40 }
 0xf95   :  { %v2480_v42 = vadd.f32 %v2479_v39, %v13222_v37  ;;  %v11816_v7 = vpop.f32.mrb[21].mxu0 }
 0xf96   :  { %v2872_v49 = vsel %vm428_vm11, %v2556_v43, -inf }
 0xf97   :  { %v2869_v44 = vsel %vm428_vm11, %v2480_v42, -inf }
 0xf98   :  { %2870 = vmax.xlane.f32.xlu0 %v2869_v44  ;;  %v2631_v45 = vpop.f32.mrb[22].mxu0 }
 0xf99   :  { %v2632_v46 = vadd.f32 %v2631_v45, %v13222_v37  ;;  %v11826_v47 = vpop.f32.mrb[23].mxu0 }
 0xf9b   :  { %v2875_v48 = vsel %vm428_vm11, %v2632_v46, -inf }
 0xf9c   :  { %v2783_v50 = vpop.f32.mrb[24].mxu0  ;;  %2876 = vmax.xlane.f32.xlu1 %v2875_v48  ;;  %2873 = vmax.xlane.f32.xlu0 %v2872_v49  ;;  %v2707_v51 = vpop.f32.mrb[32].mxu1 }
 0xf9d   :  { %v2784_v52 = vadd.f32 %v2783_v50, %v13222_v37  ;;  %v2708_v53 = vadd.f32 %v2707_v51, %v13225_v40  ;;  %v11831_v54 = vpop.f32.mrb[33].mxu1  ;;  %v11836_v55 = vpop.f32.mrb[25].mxu0 }
 0xf9f   :  { %v2881_v56 = vsel %vm428_vm11, %v2784_v52, -inf  ;;  %v2878_v57 = vsel %vm428_vm11, %v2708_v53, -inf }
 0xfa0   :  { %2882 = vmax.xlane.f32.xlu1 %v2881_v56  ;;  %2879 = vmax.xlane.f32.xlu0 %v2878_v57  ;;  %v2859_v58 = vpop.f32.mrb[34].mxu1 }
 0xfa1   :  { %v2860_v59 = vadd.f32 %v2859_v58, %v13225_v40  ;;  %v11841_v60 = vpop.f32.mrb[35].mxu1 }
 0xfa3   :  { %v2884_v61 = vsel %vm428_vm11, %v2860_v59, -inf }
 0xfa4   :  { %2885 = vmax.xlane.f32.xlu0 %v2884_v61 }
 0xfb1   :  { %2951 = vrot.lane.b32.xlu1 %v13365_v12, %s13012_s3 }
 0xfb5   :  { %3103 = vrot.lane.b32.xlu1 %v13387_v24, %s13012_s3 }
 0xfb9   :  { %3179 = vrot.lane.b32.xlu1 %v13383_v14, %s13012_s3  ;;  %v2865_v0 = vpop.xlane.xlu0 %2864 }
 0xfba   :  { %3027 = vrot.lane.b32.xlu0 %v13363_v8, %s13012_s3  ;;  %v2887_v1 = vsub.f32 %v2328_v4, %v2865_v0 }
 0xfbc   :  { %v2895_v22 = vmul.f32 1.442695, %v2887_v1 }
 0xfbd   :  { %3331 = vrot.lane.b32.xlu1 %v13398_v19, %s13012_s3 }
 0xfbe   :  { %3255 = vrot.lane.b32.xlu0 %v13393_v25, %s13012_s3 }
 0xfc2   :  { %v2868_v62 = vpop.xlane.xlu1 %2867 }
 0xfc3   :  { %v2888_v63 = vsub.f32 %v2404_v34, %v2868_v62 }
 0xfc5   :  { %v2897_v2 = vmul.f32 1.442695, %v2888_v63 }
 0xfc7   :  { %12721 = vpow2.f32 %v2897_v2 }
 0xfc8   :  { %12723 = vpow2.f32 %v2895_v22 }
 0xfd1   :  { %v13483_v23 = vpop.eup %12721 }
 0xfd2   :  { %v2914_v3 = vsel %vm428_vm11, %v13483_v23, 0.0  ;;  %v13487_v8 = vpop.eup %12723 }
 0xfd3   :  { %v2911_v11 = vsel %vm428_vm11, %v13487_v8, 0.0 }
 0xfdd   :  { %2915 = vadd.xlane.f32.xlu0 %v2914_v3 }
 0xfe1   :  { %2912 = vadd.xlane.f32.xlu1 %v2911_v11 }
0x1025   :  { %v2871_v12 = vpop.xlane.xlu0 %2870 }
0x1026   :  { %v2889_v14 = vsub.f32 %v2480_v42, %v2871_v12 }
0x1028   :  { %v2899_v24 = vmul.f32 1.442695, %v2889_v14 }
0x1029   :  { %v2874_v25 = vpop.xlane.xlu0 %2873  ;;  %v2877_v17 = vpop.xlane.xlu1 %2876 }
0x102a   :  { %12725 = vpow2.f32 %v2899_v24  ;;  %v2890_v19 = vsub.f32 %v2556_v43, %v2874_v25  ;;  %v2891_v18 = vsub.f32 %v2632_v46, %v2877_v17 }
0x102c   :  { %v2901_v20 = vmul.f32 1.442695, %v2890_v19  ;;  %v2903_v26 = vmul.f32 1.442695, %v2891_v18 }
0x102d   :  { %v2880_v27 = vpop.xlane.xlu0 %2879  ;;  %v2883_v28 = vpop.xlane.xlu1 %2882 }
0x102e   :  { %12727 = vpow2.f32 %v2901_v20  ;;  %v2892_v29 = vsub.f32 %v2708_v53, %v2880_v27  ;;  %v2893_v30 = vsub.f32 %v2784_v52, %v2883_v28  ;;  %v2151_v27 = vld [vmem:[#allocation2 + $0x140] sm:$0xff]  ;;  %v2152_v28 = vld [vmem:[#allocation2 + $0x148] sm:$0xff] }
0x102f   :  { %12729 = vpow2.f32 %v2903_v26 }
0x1030   :  { %v2905_v31 = vmul.f32 1.442695, %v2892_v29  ;;  %v2907_v4 = vmul.f32 1.442695, %v2893_v30  ;;  %v12469_v29 = vpack.c.bf16 %v2152_v28, %v2151_v27  ;;  %v2153_v30 = vld [vmem:[#allocation2 + $0x150] sm:$0xff] }
0x1031   :  { %v2886_v32 = vpop.xlane.xlu0 %2885  ;;  %v2952_v33 = vpop.permute.xlu1 %2951 }
0x1032   :  { %12731 = vpow2.f32 %v2905_v31  ;;  %v2894_v5 = vsub.f32 %v2860_v59, %v2886_v32  ;;  %11843 = vmatpush3.msra.mxu0 %v2952_v33  ;;  %v2154_v31 = vld [vmem:[#allocation2 + $0x158] sm:$0xff] }
0x1033   :  { %12733 = vpow2.f32 %v2907_v4  ;;  %11852 = vmatprep.subr.mxu0 %v13006_v6  ;;  %v12473_v4 = vpack.c.bf16 %v2154_v31, %v2153_v30  ;;  %v3730_v30 = vld [vmem:[#allocation2 + $0x178] sm:$0xff]  ;;  %v3731_v31 = vld [vmem:[#allocation2 + $0x180] sm:$0xff] }
0x1034   :  { %v12726_v34 = vpop.eup %12725  ;;  %v2909_v35 = vmul.f32 1.442695, %v2894_v5 }
0x1035   :  { %v3028_v36 = vpop.permute.xlu0 %3027  ;;  %v2917_v38 = vsel %vm428_vm11, %v12726_v34, 0.0  ;;  %v3104_v49 = vpop.permute.xlu1 %3103 }
0x1036   :  { %12735 = vpow2.f32 %v2909_v35  ;;  %2918 = vadd.xlane.f32.xlu1 %v2917_v38  ;;  %11848 = vmatpush3.msra.mxu1 %v3028_v36 }
0x1037   :  { %11857 = vmatprep.subr.mxu1 %v13006_v6 }
0x1038   :  { %v12728_v39 = vpop.eup %12727 }
0x1039   :  { %v12730_v41 = vpop.eup %12729  ;;  %v2920_v42 = vsel %vm428_vm11, %v12728_v39, 0.0  ;;  %v3180_v50 = vpop.permute.xlu1 %3179 }
0x103a   :  { %2921 = vadd.xlane.f32.xlu0 %v2920_v42  ;;  %v2923_v7 = vsel %vm428_vm11, %v12730_v41, 0.0  ;;  %v3256_v51 = vpop.permute.xlu0 %3255 }
0x103b   :  { %2924 = vadd.xlane.f32.xlu1 %v2923_v7 }
0x103c   :  { %v12732_v43 = vpop.eup %12731 }
0x103d   :  { %v13496_v44 = vpop.eup %12733  ;;  %v2926_v45 = vsel %vm428_vm11, %v12732_v43, 0.0  ;;  %v3332_v52 = vpop.permute.xlu1 %3331 }
0x103e   :  { %2927 = vadd.xlane.f32.xlu0 %v2926_v45  ;;  %v2929_v46 = vsel %vm428_vm11, %v13496_v44, 0.0 }
0x103f   :  { %2930 = vadd.xlane.f32.xlu1 %v2929_v46 }
0x1040   :  { %v13501_v47 = vpop.eup %12735 }
0x1041   :  { %v2932_v48 = vsel %vm428_vm11, %v13501_v47, 0.0 }
0x1042   :  { %2933 = vadd.xlane.f32.xlu0 %v2932_v48 }
0x1050   :  { %3483 = vrot.lane.b32.xlu1 %v13407_v16, %s13012_s3 }
0x1058   :  { %3407 = vrot.lane.b32.xlu0 %v13391_v15, %s13012_s3 }
0x106a   :  { %v2916_v53 = vpop.xlane.xlu0 %2915 }
0x106b   :  { %12737 = vrcp.f32 %v2916_v53 }
0x106e   :  { %v2913_v54 = vpop.xlane.xlu1 %2912 }
0x106f   :  { %12739 = vrcp.f32 %v2913_v54 }
0x1075   :  { %v12738_v55 = vpop.eup %12737 }
0x1076   :  { %v2944_v56 = vmul.f32 %v12738_v55, %v13483_v23 }
0x1078   :  { %11850 = vmatmul.mubr.msk.f32.vlgmr.msra.gmra.mrb[36].mxu1 %vm428_vm11, %v2944_v56  ;;  %v11134_v56 = vld [vmem:[#allocation2 + $0x160] ss:$0 sm:$0xff] }
0x1079   :  { %v12740_v57 = vpop.eup %12739  ;;  %11858 = vmatpush3.msra.mxu1 %v3180_v50  ;;  %11859 = vmatprep.mubr.msk.f32.mxu1 %vm13009_vm10, %v13006_v6 }
0x107a   :  { %v2943_v15 = vmul.f32 %v12740_v57, %v13487_v8  ;;  %11867 = vmatprep.subr.mxu1 %v13006_v6 }
0x107c   :  { %11845 = vmatmul.mubr.msk.f32.vlgmr.msra.gmra.mrb[26].mxu0 %vm428_vm11, %v2943_v15 }
0x107d   :  { %11853 = vmatpush3.msra.mxu0 %v3104_v49  ;;  %11854 = vmatprep.mubr.msk.f32.mxu0 %vm13009_vm10, %v13006_v6 }
0x107e   :  { %11862 = vmatprep.subr.mxu0 %v13006_v6 }
0x10c3   :  { %v2919_v16 = vpop.xlane.xlu1 %2918 }
0x10c4   :  { %12741 = vrcp.f32 %v2919_v16 }
0x10c7   :  { %v2922_v58 = vpop.xlane.xlu0 %2921 }
0x10c8   :  { %12743 = vrcp.f32 %v2922_v58  ;;  %v2925_v59 = vpop.xlane.xlu1 %2924 }
0x10c9   :  { %12745 = vrcp.f32 %v2925_v59 }
0x10cb   :  { %v2928_v60 = vpop.xlane.xlu0 %2927 }
0x10cc   :  { %12747 = vrcp.f32 %v2928_v60  ;;  %v2931_v61 = vpop.xlane.xlu1 %2930 }
0x10cd   :  { %12749 = vrcp.f32 %v2931_v61 }
0x10ce   :  { %v12742_v62 = vpop.eup %12741 }
0x10cf   :  { %v2934_v63 = vpop.xlane.xlu0 %2933  ;;  %v2945_v0 = vmul.f32 %v12742_v62, %v12726_v34  ;;  %v12953_v62 = vld [vmem:[#allocation2 + $0x20] sm:$0xff] }
0x10d0   :  { %12751 = vrcp.f32 %v2934_v63  ;;  %v3484_v24 = vpop.permute.xlu1 %3483  ;;  %v13560_v63 = vadd.f32 %v12953_v62, %v13116_v10 }
0x10d1   :  { %11855 = vmatmul.mubr.msk.f32.vlgmr.msra.gmra.mrb[28].mxu0 %vm428_vm11, %v2945_v0 }
0x10d2   :  { %v12744_v1 = vpop.eup %12743  ;;  %11863 = vmatpush3.msra.mxu0 %v3256_v51  ;;  %11864 = vmatprep.mubr.msk.f32.mxu0 %vm13009_vm10, %v13006_v6 }
0x10d3   :  { %v12746_v2 = vpop.eup %12745  ;;  %11872 = vmatprep.subr.mxu0 %v13006_v6  ;;  %v2946_v22 = vmul.f32 %v12744_v1, %v12728_v39  ;;  %v3408_v23 = vpop.permute.xlu0 %3407  ;;  %v13565_v1 = vadd.f32 %v12953_v62, %v13114_v9 }
0x10d4   :  { %v2947_v3 = vmul.f32 %v12746_v2, %v12730_v41 }
0x10d5   :  { %11860 = vmatmul.mubr.msk.f32.vlgmr.msra.gmra.mrb[38].mxu1 %vm428_vm11, %v2946_v22 }
0x10d6   :  { %v12748_v8 = vpop.eup %12747  ;;  %11865 = vmatmul.mubr.msk.f32.vlgmr.msra.gmra.mrb[30].mxu0 %vm428_vm11, %v2947_v3  ;;  %11868 = vmatpush3.msra.mxu1 %v3332_v52 }
0x10d7   :  { %v12750_v11 = vpop.eup %12749  ;;  %11873 = vmatpush3.msra.mxu0 %v3408_v23  ;;  %11869 = vmatprep.mubr.msk.f32.mxu1 %vm13009_vm10, %v13006_v6  ;;  %v2948_v12 = vmul.f32 %v12748_v8, %v12732_v43 }
0x10d8   :  { %11874 = vmatprep.mubr.msk.f32.mxu0 %vm13009_vm10, %v13006_v6  ;;  %11877 = vmatprep.subr.mxu1 %v13006_v6  ;;  %v2949_v14 = vmul.f32 %v12750_v11, %v13496_v44 }
0x10d9   :  { %11870 = vmatmul.mubr.msk.f32.vlgmr.msra.gmra.mrb[40].mxu1 %vm428_vm11, %v2948_v12  ;;  %12470 = vmatprep.subr.bf16.mxu0 %v12469_v29 }
0x10da   :  { %v12752_v25 = vpop.eup %12751  ;;  %11875 = vmatmul.mubr.msk.f32.vlgmr.msra.gmra.mrb[32].mxu0 %vm428_vm11, %v2949_v14  ;;  %11878 = vmatpush3.msra.mxu1 %v3484_v24 }
0x10db   :  { %11879 = vmatprep.mubr.msk.f32.mxu1 %vm13009_vm10, %v13006_v6  ;;  %v2950_v17 = vmul.f32 %v12752_v25, %v13501_v47  ;;  %12472 = vmatpush3.bf16.msra.mxu0 %v12469_v29 }
0x10dc   :  { %12474 = vmatprep.subr.bf16.mxu0 %v12473_v4 }
0x10dd   :  { %11880 = vmatmul.mubr.msk.f32.vlgmr.msra.gmra.mrb[42].mxu1 %vm428_vm11, %v2950_v17 }
0x10df   :  { %12476 = vmatpush3.bf16.msra.mxu0 %v12473_v4  ;;  %v3732_v4 = vld [vmem:[#allocation2 + $0x188] sm:$0xff] }
0x114b   :  { %v3099_v19 = vpop.f32.mrb[36].mxu1 }
0x114c   :  { %v11851_v18 = vpop.f32.mrb[37].mxu1 }
0x114f   :  { %v3023_v20 = vpop.f32.mrb[26].mxu0 }
0x1150   :  { %v11846_v26 = vpop.f32.mrb[27].mxu0 }
0x11a4   :  { %v3175_v32 = vpop.f32.mrb[28].mxu0 }
0x11a5   :  { %3561 = vrot.lane.b32.xlu0 %v3175_v32, %s13004_s29  ;;  %v11856_v33 = vpop.f32.mrb[29].mxu0  ;;  %v12477_v32 = vpack.c.bf16 %v3731_v31, %v3730_v30 }
0x11a6   :  { %v3733_v33 = vld [vmem:[#allocation2 + $0x190] sm:$0xff] }
0x11a7   :  { %12478 = vmatprep.subr.bf16.mxu1 %v12477_v32 }
0x11a8   :  { %v3251_v5 = vpop.f32.mrb[38].mxu1  ;;  %12480 = vmatpush3.bf16.msra.mxu1 %v12477_v32  ;;  %v11138_v32 = vld [vmem:[#allocation2 + $0x170] ss:$0 sm:$0xff] }
0x11a9   :  { %v3327_v34 = vpop.f32.mrb[30].mxu0  ;;  %3563 = vrot.lane.b32.xlu1 %v3251_v5, %s13004_s29  ;;  %v11861_v35 = vpop.f32.mrb[39].mxu1  ;;  %v12481_v5 = vpack.c.bf16 %v3733_v33, %v3732_v4  ;;  %v11147_v4 = vld [vmem:[#allocation2 + $0x1f8] ss:$0 sm:$0xff] }
0x11aa   :  { %3569 = vrot.lane.b32.xlu0 %v3327_v34, %s13013_s20  ;;  %v11866_v36 = vpop.f32.mrb[31].mxu0  ;;  %v4026_v34 = vld [vmem:[#allocation2 + $0x208] sm:$0xff]  ;;  %v4027_v35 = vld [vmem:[#allocation2 + $0x210] sm:$0xff] }
0x11ab   :  { %12482 = vmatprep.subr.bf16.mxu1 %v12481_v5  ;;  %v13595_v36 = vpack.c.bf16 %v4027_v35, %v4026_v34  ;;  %v4028_v34 = vld [vmem:[#allocation2 + $0x218] sm:$0xff]  ;;  %v4029_v35 = vld [vmem:[#allocation2 + $0x220] sm:$0xff] }
0x11ac   :  { %v3403_v38 = vpop.f32.mrb[40].mxu1  ;;  %12484 = vmatpush3.bf16.msra.mxu1 %v12481_v5 }
0x11ad   :  { %v3479_v39 = vpop.f32.mrb[32].mxu0  ;;  %3571 = vrot.lane.b32.xlu1 %v3403_v38, %s13013_s20  ;;  %v11871_v41 = vpop.f32.mrb[41].mxu1  ;;  %12502 = vmatprep.subr.bf16.mxu1 %v13595_v36  ;;  %v3735_v38 = vld [vmem:[#allocation2 + $0x1a0] sm:$0xff] }
0x11ae   :  { %3577 = vrot.lane.b32.xlu0 %v3479_v39, %s13014_s21  ;;  %v11876_v42 = vpop.f32.mrb[33].mxu0  ;;  %v3736_v39 = vld [vmem:[#allocation2 + $0x1a8] sm:$0xff]  ;;  %v3737_v41 = vld [vmem:[#allocation2 + $0x1b0] sm:$0xff] }
0x11af   :  { %v12485_v42 = vpack.c.bf16 %v3736_v39, %v3735_v38 }
0x11b0   :  { %v3555_v7 = vpop.f32.mrb[42].mxu1 }
0x11b1   :  { %3579 = vrot.lane.b32.xlu1 %v3555_v7, %s13014_s21  ;;  %v11881_v43 = vpop.f32.mrb[43].mxu1  ;;  %v3738_v7 = vld [vmem:[#allocation2 + $0x1b8] sm:$0xff]  ;;  %12486 = vmatprep.subr.bf16.mxu0 %v12485_v42 }
0x11b2   :  { %v12489_v43 = vpack.c.bf16 %v3738_v7, %v3737_v41  ;;  %v12505_v7 = vpack.c.bf16 %v4029_v35, %v4028_v34 }
0x1217   :  { %v3562_v44 = vpop.permute.xlu0 %3561 }
0x1218   :  { %v3583_v47 = vsel %vm428_vm11, %v3023_v20, %v3562_v44  ;;  %v3739_v44 = vld [vmem:[#allocation2 + $0x1c0] sm:$0xff] }
0x121b   :  { %v3564_v45 = vpop.permute.xlu1 %3563 }
0x121c   :  { %v3570_v46 = vpop.permute.xlu0 %3569  ;;  %v3584_v52 = vsel %vm428_vm11, %v3099_v19, %v3564_v45  ;;  %v3740_v45 = vld [vmem:[#allocation2 + $0x1c8] sm:$0xff] }
0x121d   :  { %v3585_v49 = vsel %vm65_vm0, %v3583_v47, %v3570_v46  ;;  %v12493_v46 = vpack.c.bf16 %v3740_v45, %v3739_v44 }
0x121f   :  { %v3572_v48 = vpop.permute.xlu1 %3571 }
0x1220   :  { %v3578_v50 = vpop.permute.xlu0 %3577  ;;  %v3586_v53 = vsel %vm65_vm0, %v3584_v52, %v3572_v48 }
0x1221   :  { %v3587_v51 = vsel %vm1759_vm14, %v3585_v49, %v3578_v50 }
0x1222   :  { %11890 = vmatprep.mubr.msk.f32.mxu0 %vm251_vm3, %v3587_v51 }
0x1223   :  { %v3580_v54 = vpop.permute.xlu1 %3579 }
0x1224   :  { %v3588_v55 = vsel %vm1759_vm14, %v3586_v53, %v3580_v54 }
0x1225   :  { %11891 = vmatmul.mubr.msk.f32.vlgmr.msra.gmra.mrb[34].mxu0 %vm251_vm3, %v3588_v55 }
0x1226   :  { %12488 = vmatpush3.bf16.msra.mxu0 %v12485_v42 }
0x1227   :  { %12490 = vmatprep.subr.bf16.mxu0 %v12489_v43 }
0x122a   :  { %12492 = vmatpush3.bf16.msra.mxu0 %v12489_v43  ;;  %v11148_v43 = vld [vmem:[#allocation2 + $0x200] ss:$0 sm:$0xff] }
0x122b   :  { %12494 = vmatprep.subr.bf16.mxu0 %v12493_v46 }
0x122e   :  { %12496 = vmatpush3.bf16.msra.mxu0 %v12493_v46 }
0x12f8   :  { %v11892_v57 = vpop.f32.mrb[34].mxu0 }
0x12f9   :  { %v3671_v15 = vadd.f32 %v11892_v57, %v11134_v56  ;;  %v3665_v16 = vpop.f32.mrb[35].mxu0 }
0x12fa   :  { %v3666_v58 = vadd.f32 %v11134_v56, %v3665_v16 }
0x12fb   :  { %v13552_v59 = vadd.f32 %v3671_v15, %v13345_v13  ;;  %v3974_v13 = vsel %vm251_vm3, %v13560_v63, 0.0 }
0x12fc   :  { %v13555_v60 = vadd.f32 %v3666_v58, %v13348_v21  ;;  %v3977_v21 = vsel %vm251_vm3, %v13565_v1, 0.0 }
0x12fd   :  { %v3681_v61 = vsel %vm251_vm3, %v13552_v59, 0.0 }
0x12fe   :  { %3682 = vadd.xlane.f32.xlu1 %v3681_v61  ;;  %v3678_v0 = vsel %vm251_vm3, %v13555_v60, 0.0 }
0x12ff   :  { %3679 = vadd.xlane.f32.xlu0 %v3678_v0 }
0x1303   :  { %3975 = vadd.xlane.f32.xlu0 %v3974_v13 }
0x1307   :  { %3978 = vadd.xlane.f32.xlu0 %v3977_v21 }
0x138b   :  { %v3683_v2 = vpop.xlane.xlu1 %3682 }
0x138c   :  { %v3685_v22 = vmul.f32 0.03125, %v3683_v2  ;;  %v3680_v10 = vpop.xlane.xlu0 %3679 }
0x138d   :  { %v3684_v23 = vmul.f32 0.03125, %v3680_v10 }
0x138e   :  { %v13572_v3 = vsub.f32 %v13552_v59, %v3685_v22 }
0x138f   :  { %v13575_v8 = vsub.f32 %v13555_v60, %v3684_v23 }
0x1390   :  { %v3976_v9 = vpop.xlane.xlu0 %3975  ;;  %v3689_v11 = vmul.f32 %v13572_v3, %v13572_v3 }
0x1391   :  { %v3980_v12 = vmul.f32 0.03125, %v3976_v9  ;;  %v3688_v14 = vmul.f32 %v13575_v8, %v13575_v8 }
0x1392   :  { %v3693_v24 = vsel %vm251_vm3, %v3689_v11, 0.0 }
0x1393   :  { %v13583_v25 = vsub.f32 %v13560_v63, %v3980_v12  ;;  %3694 = vadd.xlane.f32.xlu0 %v3693_v24  ;;  %v3690_v17 = vsel %vm251_vm3, %v3688_v14, 0.0 }
0x1394   :  { %3691 = vadd.xlane.f32.xlu1 %v3690_v17  ;;  %v3979_v19 = vpop.xlane.xlu0 %3978 }
0x1395   :  { %v3981_v18 = vmul.f32 0.03125, %v3979_v19  ;;  %v3984_v20 = vmul.f32 %v13583_v25, %v13583_v25  ;;  %v4016_v38 = vmul.f32 %v11147_v4, %v13583_v25 }
0x1397   :  { %v13589_v26 = vsub.f32 %v13565_v1, %v3981_v18  ;;  %v3986_v27 = vsel %vm251_vm3, %v3984_v20, 0.0  ;;  %v11137_v18 = vld [vmem:[#allocation2 + $0x168] ss:$0 sm:$0xff] }
0x1398   :  { %3987 = vadd.xlane.f32.xlu1 %v3986_v27  ;;  %v3720_v30 = vmul.f32 %v11137_v18, %v13575_v8 }
0x1399   :  { %v3985_v28 = vmul.f32 %v13589_v26, %v13589_v26  ;;  %v4017_v8 = vmul.f32 %v11147_v4, %v13589_v26 }
0x139b   :  { %v3989_v29 = vsel %vm251_vm3, %v3985_v28, 0.0  ;;  %v3721_v28 = vmul.f32 %v11137_v18, %v13572_v3 }
0x139c   :  { %3990 = vadd.xlane.f32.xlu0 %v3989_v29 }
0x1420   :  { %v3695_v47 = vpop.xlane.xlu0 %3694 }
0x1421   :  { %v3697_v48 = vmul.f32 0.032258064, %v3695_v47  ;;  %v3692_v49 = vpop.xlane.xlu1 %3691  ;;  %v3741_v47 = vld [vmem:[#allocation2 + $0x1d0] sm:$0xff] }
0x1422   :  { %v3696_v50 = vmul.f32 0.032258064, %v3692_v49 }
0x1423   :  { %12753 = vrsqrt.f32 %v3697_v48  ;;  %vm3707_vm12 = vcmp.eq.f32.partialorder %v3697_v48, inf  ;;  %v3710_v15 = vand.u32 2147483648, %v3697_v48  ;;  %vm3709_vm13 = vcmp.eq.f32.partialorder %v3697_v48, 0.0 }
0x1424   :  { %12755 = vrsqrt.f32 %v3696_v50  ;;  %vm3700_vm15 = vcmp.eq.f32.partialorder %v3696_v50, inf  ;;  %v3703_v61 = vand.u32 2147483648, %v3696_v50  ;;  %vm3702_vm1 = vcmp.eq.f32.partialorder %v3696_v50, 0.0 }
0x1425   :  { %v3988_v51 = vpop.xlane.xlu1 %3987 }
0x1426   :  { %v3992_v52 = vmul.f32 0.032258064, %v3988_v51 }
0x1428   :  { %12757 = vrsqrt.f32 %v3992_v52  ;;  %vm3996_vm2 = vcmp.eq.f32.partialorder %v3992_v52, inf  ;;  %v3999_v23 = vand.u32 2147483648, %v3992_v52  ;;  %vm3998_vm4 = vcmp.eq.f32.partialorder %v3992_v52, 0.0 }
0x1429   :  { %v3991_v53 = vpop.xlane.xlu0 %3990 }
0x142a   :  { %v3993_v54 = vmul.f32 0.032258064, %v3991_v53 }
0x142c   :  { %12759 = vrsqrt.f32 %v3993_v54  ;;  %vm4003_vm6 = vcmp.eq.f32.partialorder %v3993_v54, inf  ;;  %v4006_v17 = vand.u32 2147483648, %v3993_v54  ;;  %vm4005_vm7 = vcmp.eq.f32.partialorder %v3993_v54, 0.0 }
0x142d   :  { %v12754_v55 = vpop.eup %12753 }
0x142e   :  { %v12756_v56 = vpop.eup %12755  ;;  %v3706_v57 = vmul.f32 %v12754_v55, %v3697_v48  ;;  %v11149_v55 = vld [vmem:[#allocation2 + $0x228] ss:$0 sm:$0xff] }
0x142f   :  { %v3699_v16 = vmul.f32 %v12756_v56, %v3696_v50 }
0x1430   :  { %v3708_v58 = vsel %vm3707_vm12, %v3697_v48, %v3706_v57  ;;  %v3742_v48 = vld [vmem:[#allocation2 + $0x1d8] sm:$0xff] }
0x1431   :  { %v3711_v62 = vsel %vm3709_vm13, %v3710_v15, %v3708_v58  ;;  %v3701_v0 = vsel %vm3700_vm15, %v3696_v50, %v3699_v16  ;;  %v12497_v26 = vpack.c.bf16 %v3742_v48, %v3741_v47 }
0x1432   :  { %v12758_v13 = vpop.eup %12757  ;;  %v3713_v21 = vadd.f32 1e-06, %v3711_v62  ;;  %v3704_v2 = vsel %vm3702_vm1, %v3703_v61, %v3701_v0 }
0x1433   :  { %v3995_v22 = vmul.f32 %v12758_v13, %v3992_v52  ;;  %v3712_v10 = vadd.f32 1e-06, %v3704_v2  ;;  %12498 = vmatprep.subr.bf16.mxu0 %v12497_v26 }
0x1434   :  { %12761 = vrcp.f32 %v3713_v21  ;;  %12500 = vmatpush3.bf16.msra.mxu0 %v12497_v26 }
0x1435   :  { %v3997_v9 = vsel %vm3996_vm2, %v3992_v52, %v3995_v22  ;;  %12763 = vrcp.f32 %v3712_v10  ;;  %11944 = vmatprep.subr.mxu0 %v13006_v6 }
0x1436   :  { %v12760_v11 = vpop.eup %12759  ;;  %v4000_v12 = vsel %vm3998_vm4, %v3999_v23, %v3997_v9 }
0x1437   :  { %v4002_v14 = vmul.f32 %v12760_v11, %v3993_v54  ;;  %v4008_v24 = vadd.f32 1e-06, %v4000_v12 }
0x1439   :  { %v4004_v19 = vsel %vm4003_vm6, %v3993_v54, %v4002_v14  ;;  %12765 = vrcp.f32 %v4008_v24 }
0x143a   :  { %v4007_v20 = vsel %vm4005_vm7, %v4006_v17, %v4004_v19  ;;  %v41_v19 = vld [vmem:[%s14551_s4] sm:$0xff] }
0x143b   :  { %v4009_v27 = vadd.f32 1e-06, %v4007_v20  ;;  %vm43_vm8 = vcmp.eq.f32.partialorder %v41_v19, 0.0 }
0x143c   :  { %v13715_v18 = vsel %vm43_vm8, -1e+09, %v13006_v6 }
0x143d   :  { %12767 = vrcp.f32 %v4009_v27 }
0x143e   :  { %v12762_v29 = vpop.eup %12761 }
0x143f   :  { %v12764_v31 = vpop.eup %12763  ;;  %v3723_v33 = vmul.f32 %v12762_v29, %v3721_v28  ;;  %v42_v29 = vld [vmem:[%s14551_s4 + $0x8] sm:$0xff]  ;;  %s13015_s4 = smov [#allocation5]  }
0x1440   :  { %v3722_v5 = vmul.f32 %v12764_v31, %v3720_v30  ;;  %vm44_vm9 = vcmp.eq.f32.partialorder %v42_v29, 0.0  ;;  %s11045_s26 = sshll.u32 %s13015_s4, 4  ;;  %s11046_s26 = int_to_ptr.vmem [resolvable:$true] %s11045_s26 }
0x1441   :  { %v3729_v42 = vadd.f32 %v11138_v32, %v3723_v33  ;;  %v13723_v31 = vsel %vm44_vm9, -1e+09, %v13006_v6  ;;  %s12976_s27 = scalar_lea.vmem %s11046_s26, 256  ;;  %p12981_p9 = scmp.lt.s32.totalorder %s11046_s26, %s11046_s26 }
0x1442   :  { %v3728_v39 = vadd.f32 %v11138_v32, %v3722_v5  ;;  %p12977_p8 = scmp.ne.s32.totalorder %s11046_s26, %s12976_s27  ;;  %p12982_p10 = scmp.lt.s32.totalorder %s12976_s27, %s12976_s27 }
0x1443   :  { %v12766_v41 = vpop.eup %12765 }
0x1444   :  { %11901 = vmatprep.mubr.msk.f32.mxu1 %vm251_vm3, %v3728_v39  ;;  %v4018_v3 = vmul.f32 %v12766_v41, %v4016_v38  ;;  %p12983_p11 = por %p12982_p10, %p12981_p9 }
0x1445   :  { %11902 = vmatmul.mubr.msk.f32.vlgmr.msra.gmra.mrb[44].mxu1 %vm251_vm3, %v3729_v42 }
0x1446   :  { %12504 = vmatpush3.bf16.msra.mxu1 %v13595_v36  ;;  %v4024_v44 = vadd.f32 %v11148_v43, %v4018_v3  ;;  %v11139_v36 = vld [vmem:[#allocation2 + $0x198] ss:$0 sm:$0xff]  ;;  %p12984_p12 = pnand %p12983_p11, %p12977_p8 }
0x1447   :  { %v12768_v45 = vpop.eup %12767  ;;  %12506 = vmatprep.subr.bf16.mxu1 %v12505_v7 }
0x1448   :  { %v4019_v46 = vmul.f32 %v12768_v45, %v4017_v8  ;;  %11931 = vmatprep.mubr.msk.f32.mxu1 %vm251_vm3, %v4024_v44 }
0x144a   :  { %v4025_v25 = vadd.f32 %v11148_v43, %v4019_v46  ;;  %12508 = vmatpush3.bf16.msra.mxu1 %v12505_v7 }
0x144b   :  { %11934 = vmatprep.subr.mxu1 %v13006_v6 }
0x144d   :  { %11932 = vmatmul.mubr.msk.f32.vlgmr.msra.gmra.mrb[46].mxu1 %vm251_vm3, %v4025_v25 }
0x144e   :  { %11936 = vmatprep.mubr.msk.f32.mxu1 %vm13009_vm10, %v13006_v6 }
0x1518   :  { %v11903_v49 = vpop.f32.mrb[44].mxu1 }
0x1519   :  { %v3826_v50 = vadd.f32 %v11903_v49, %v11139_v36  ;;  %v3820_v51 = vpop.f32.mrb[45].mxu1 }
0x151a   :  { %v3821_v52 = vadd.f32 %v11139_v36, %v3820_v51 }
0x151b   :  { %v3830_v54 = vmax.f32 %v3826_v50, 0.0 }
0x151c   :  { %v3829_v53 = vmax.f32 %v3821_v52, 0.0 }
0x151e   :  { %11920 = vmatprep.mubr.msk.f32.mxu0 %vm2008_vm5, %v3829_v53 }
0x151f   :  { %11921 = vmatmul.mubr.msk.f32.vlgmr.msra.gmra.mrb[36].mxu0 %vm2008_vm5, %v3830_v54 }
0x1520   :  { %v11933_v56 = vpop.f32.mrb[46].mxu1  ;;  %11946 = vmatprep.mubr.msk.f32.mxu0 %vm13009_vm10, %v13006_v6 }
0x1521   :  { %v13615_v57 = vadd.f32 %v11933_v56, %v11149_v55  ;;  %v4112_v15 = vpop.f32.mrb[47].mxu1 }
0x1522   :  { %v13617_v16 = vadd.f32 %v11149_v55, %v4112_v15 }
0x1523   :  { %4125 = vrot.lane.b32.xlu0 %v13615_v57, %s13007_s2 }
0x1524   :  { %4123 = vrot.lane.b32.xlu1 %v13617_v16, %s13007_s2 }
0x1527   :  { %4131 = vrot.lane.b32.xlu0 %v13617_v16, %s13010_s14 }
0x1528   :  { %4127 = vrot.lane.b32.xlu1 %v13617_v16, %s13008_s13 }
0x152b   :  { %4135 = vrot.lane.b32.xlu0 %v13617_v16, %s13011_s15 }
0x152c   :  { %4129 = vrot.lane.b32.xlu1 %v13615_v57, %s13008_s13 }
0x1530   :  { %4133 = vrot.lane.b32.xlu1 %v13615_v57, %s13010_s14 }
0x1534   :  { %4211 = vrot.lane.b32.xlu1 %v13615_v57, %s13011_s15 }
0x1595   :  { %v13635_v58 = vpop.permute.xlu0 %4125 }
0x1596   :  { %4363 = vrot.lane.b32.xlu1 %v13635_v58, %s13011_s15  ;;  %v13639_v61 = vpop.permute.xlu1 %4123 }
0x1597   :  { %4287 = vrot.lane.b32.xlu0 %v13639_v61, %s13011_s15 }
0x1599   :  { %v13643_v62 = vpop.permute.xlu0 %4131 }
0x159a   :  { %v13645_v0 = vpop.permute.xlu1 %4127 }
0x159b   :  { %4439 = vrot.lane.b32.xlu0 %v13645_v0, %s13011_s15 }
0x159d   :  { %v4136_v13 = vpop.permute.xlu0 %4135 }
0x159e   :  { %11935 = vmatpush3.xpose.msk.msra.mxu1 %vm428_vm11, %v4136_v13  ;;  %v13650_v21 = vpop.permute.xlu1 %4129 }
0x159f   :  { %4591 = vrot.lane.b32.xlu0 %v13643_v62, %s13011_s15  ;;  %4515 = vrot.lane.b32.xlu1 %v13650_v21, %s13011_s15 }
0x15a0   :  { %11939 = vmatprep.subr.mxu1 %v13006_v6 }
0x15a1   :  { %11937 = vmatmul.mubr.msk.f32.vlgmr.msra.gmra.mrb[48].mxu1 %vm428_vm11, %v13617_v16 }
0x15a2   :  { %v13659_v2 = vpop.permute.xlu1 %4133  ;;  %11941 = vmatprep.mubr.msk.f32.mxu1 %vm13009_vm10, %v13006_v6 }
0x15a3   :  { %4667 = vrot.lane.b32.xlu1 %v13659_v2, %s13011_s15 }
0x15a6   :  { %v4212_v22 = vpop.permute.xlu1 %4211 }
0x15a7   :  { %11940 = vmatpush3.xpose.msk.msra.mxu1 %vm428_vm11, %v4212_v22 }
0x15a8   :  { %11949 = vmatprep.subr.mxu1 %v13006_v6 }
0x15aa   :  { %11942 = vmatmul.mubr.msk.f32.vlgmr.msra.gmra.mrb[50].mxu1 %vm428_vm11, %v13615_v57 }
0x15ab   :  { %11951 = vmatprep.mubr.msk.f32.mxu1 %vm13009_vm10, %v13006_v6 }
0x15f2   :  { %v13671_v10 = vpop.f32.mrb[36].mxu0 }
0x15f3   :  { %v13673_v23 = vpop.f32.mrb[37].mxu0 }
0x1608   :  { %v4364_v9 = vpop.permute.xlu1 %4363 }
0x1609   :  { %v4288_v11 = vpop.permute.xlu0 %4287  ;;  %11950 = vmatpush3.xpose.msk.msra.mxu1 %vm428_vm11, %v4364_v9 }
0x160a   :  { %11945 = vmatpush3.xpose.msk.msra.mxu0 %vm428_vm11, %v4288_v11  ;;  %11959 = vmatprep.subr.mxu1 %v13006_v6 }
0x160b   :  { %11954 = vmatprep.subr.mxu0 %v13006_v6 }
0x160c   :  { %11952 = vmatmul.mubr.msk.f32.vlgmr.msra.gmra.mrb[52].mxu1 %vm428_vm11, %v13635_v58 }
0x160d   :  { %11947 = vmatmul.mubr.msk.f32.vlgmr.msra.gmra.mrb[38].mxu0 %vm428_vm11, %v13639_v61  ;;  %v4440_v12 = vpop.permute.xlu0 %4439  ;;  %11961 = vmatprep.mubr.msk.f32.mxu1 %vm13009_vm10, %v13006_v6 }
0x160e   :  { %11955 = vmatpush3.xpose.msk.msra.mxu0 %vm428_vm11, %v4440_v12  ;;  %11956 = vmatprep.mubr.msk.f32.mxu0 %vm13009_vm10, %v13006_v6 }
0x160f   :  { %11964 = vmatprep.subr.mxu0 %v13006_v6 }
0x1611   :  { %11957 = vmatmul.mubr.msk.f32.vlgmr.msra.gmra.mrb[40].mxu0 %vm428_vm11, %v13645_v0  ;;  %v4592_v14 = vpop.permute.xlu0 %4591  ;;  %v4516_v24 = vpop.permute.xlu1 %4515 }
0x1612   :  { %11960 = vmatpush3.xpose.msk.msra.mxu1 %vm428_vm11, %v4516_v24  ;;  %11965 = vmatpush3.xpose.msk.msra.mxu0 %vm428_vm11, %v4592_v14 }
0x1613   :  { %11966 = vmatprep.mubr.msk.f32.mxu0 %vm13009_vm10, %v13006_v6  ;;  %11969 = vmatprep.subr.mxu1 %v13006_v6 }
0x1614   :  { %11974 = vmatprep.subr.mxu0 %v13006_v6 }
0x1615   :  { %11962 = vmatmul.mubr.msk.f32.vlgmr.msra.gmra.mrb[54].mxu1 %vm428_vm11, %v13650_v21  ;;  %11967 = vmatmul.mubr.msk.f32.vlgmr.msra.gmra.mrb[42].mxu0 %vm428_vm11, %v13643_v62  ;;  %v4668_v17 = vpop.permute.xlu1 %4667 }
0x1616   :  { %11970 = vmatpush3.xpose.msk.msra.mxu1 %vm428_vm11, %v4668_v17  ;;  %11971 = vmatprep.mubr.msk.f32.mxu1 %vm13009_vm10, %v13006_v6 }
0x1617   :  { %11979 = vmatprep.subr.mxu1 %v13006_v6  ;;  %11976 = vmatprep.mubr.msk.f32.mxu0 %vm13009_vm10, %v13006_v6 }
0x1619   :  { %11972 = vmatmul.mubr.msk.f32.vlgmr.msra.gmra.mrb[56].mxu1 %vm428_vm11, %v13659_v2 }
0x161a   :  { %11981 = vmatprep.mubr.msk.f32.mxu1 %vm13009_vm10, %v13006_v6 }
0x1674   :  { %v4207_v20 = vpop.f32.mrb[48].mxu1 }
0x1675   :  { %v4208_v27 = vadd.f32 %v4207_v20, %v13715_v18  ;;  %v11938_v28 = vpop.f32.mrb[49].mxu1 }
0x1677   :  { %v4743_v30 = vsel %vm428_vm11, %v4208_v27, -inf }
0x1678   :  { %4744 = vmax.xlane.f32.xlu0 %v4743_v30 }
0x167d   :  { %v4283_v4 = vpop.f32.mrb[50].mxu1 }
0x167e   :  { %v4284_v32 = vadd.f32 %v4283_v4, %v13723_v31  ;;  %v11943_v33 = vpop.f32.mrb[51].mxu1 }
0x1680   :  { %v4746_v5 = vsel %vm428_vm11, %v4284_v32, -inf }
0x1681   :  { %4747 = vmax.xlane.f32.xlu1 %v4746_v5 }
0x16df   :  { %v4435_v34 = vpop.f32.mrb[52].mxu1 }
0x16e0   :  { %v4359_v35 = vpop.f32.mrb[38].mxu0  ;;  %v11953_v38 = vpop.f32.mrb[53].mxu1  ;;  %v4436_v42 = vadd.f32 %v4435_v34, %v13723_v31 }
0x16e1   :  { %v4360_v39 = vadd.f32 %v4359_v35, %v13715_v18  ;;  %v11948_v41 = vpop.f32.mrb[39].mxu0 }
0x16e2   :  { %v4752_v45 = vsel %vm428_vm11, %v4436_v42, -inf }
0x16e3   :  { %v4749_v7 = vsel %vm428_vm11, %v4360_v39, -inf }
0x16e4   :  { %4750 = vmax.xlane.f32.xlu0 %v4749_v7  ;;  %v4511_v43 = vpop.f32.mrb[40].mxu0 }
0x16e5   :  { %v4512_v3 = vadd.f32 %v4511_v43, %v13715_v18  ;;  %v11958_v8 = vpop.f32.mrb[41].mxu0 }
0x16e7   :  { %v4755_v44 = vsel %vm428_vm11, %v4512_v3, -inf }
0x16e8   :  { %v4663_v46 = vpop.f32.mrb[42].mxu0  ;;  %4756 = vmax.xlane.f32.xlu1 %v4755_v44  ;;  %4753 = vmax.xlane.f32.xlu0 %v4752_v45  ;;  %v4587_v25 = vpop.f32.mrb[54].mxu1 }
0x16e9   :  { %v4664_v47 = vadd.f32 %v4663_v46, %v13715_v18  ;;  %v4588_v48 = vadd.f32 %v4587_v25, %v13723_v31  ;;  %v11963_v26 = vpop.f32.mrb[55].mxu1  ;;  %v11968_v36 = vpop.f32.mrb[43].mxu0 }
0x16eb   :  { %v4761_v49 = vsel %vm428_vm11, %v4664_v47, -inf  ;;  %v4758_v50 = vsel %vm428_vm11, %v4588_v48, -inf }
0x16ec   :  { %4762 = vmax.xlane.f32.xlu1 %v4761_v49  ;;  %4759 = vmax.xlane.f32.xlu0 %v4758_v50  ;;  %v4739_v51 = vpop.f32.mrb[56].mxu1 }
0x16ed   :  { %v4740_v52 = vadd.f32 %v4739_v51, %v13723_v31  ;;  %v11973_v53 = vpop.f32.mrb[57].mxu1 }
0x16ef   :  { %v4764_v54 = vsel %vm428_vm11, %v4740_v52, -inf }
0x16f0   :  { %4765 = vmax.xlane.f32.xlu0 %v4764_v54 }
0x16fd   :  { %4831 = vrot.lane.b32.xlu1 %v13617_v16, %s13012_s3 }
0x1701   :  { %4983 = vrot.lane.b32.xlu1 %v13639_v61, %s13012_s3 }
0x1705   :  { %5059 = vrot.lane.b32.xlu1 %v13635_v58, %s13012_s3  ;;  %v4745_v15 = vpop.xlane.xlu0 %4744 }
0x1706   :  { %4907 = vrot.lane.b32.xlu0 %v13615_v57, %s13012_s3  ;;  %v4767_v13 = vsub.f32 %v4208_v27, %v4745_v15 }
0x1708   :  { %v4775_v22 = vmul.f32 1.442695, %v4767_v13 }
0x1709   :  { %5211 = vrot.lane.b32.xlu1 %v13650_v21, %s13012_s3 }
0x170a   :  { %5135 = vrot.lane.b32.xlu0 %v13645_v0, %s13012_s3 }
0x170e   :  { %v4748_v55 = vpop.xlane.xlu1 %4747 }
0x170f   :  { %v4768_v56 = vsub.f32 %v4284_v32, %v4748_v55 }
0x1711   :  { %v4777_v16 = vmul.f32 1.442695, %v4768_v56 }
0x1713   :  { %12769 = vpow2.f32 %v4777_v16 }
0x1714   :  { %12771 = vpow2.f32 %v4775_v22 }
0x171d   :  { %v13751_v61 = vpop.eup %12769 }
0x171e   :  { %v4794_v58 = vsel %vm428_vm11, %v13751_v61, 0.0  ;;  %v13755_v57 = vpop.eup %12771 }
0x171f   :  { %v4791_v21 = vsel %vm428_vm11, %v13755_v57, 0.0 }
0x1729   :  { %4795 = vadd.xlane.f32.xlu0 %v4794_v58 }
0x172d   :  { %4792 = vadd.xlane.f32.xlu1 %v4791_v21 }
0x1771   :  { %v4751_v0 = vpop.xlane.xlu0 %4750 }
0x1772   :  { %v4769_v9 = vsub.f32 %v4360_v39, %v4751_v0 }
0x1774   :  { %v4779_v11 = vmul.f32 1.442695, %v4769_v9 }
0x1775   :  { %v4754_v12 = vpop.xlane.xlu0 %4753  ;;  %v4757_v14 = vpop.xlane.xlu1 %4756 }
0x1776   :  { %12773 = vpow2.f32 %v4779_v11  ;;  %v4770_v24 = vsub.f32 %v4436_v42, %v4754_v12  ;;  %v4771_v17 = vsub.f32 %v4512_v3, %v4757_v14 }
0x1778   :  { %v4781_v19 = vmul.f32 1.442695, %v4770_v24  ;;  %v4783_v20 = vmul.f32 1.442695, %v4771_v17 }
0x1779   :  { %v4760_v27 = vpop.xlane.xlu0 %4759  ;;  %v4763_v28 = vpop.xlane.xlu1 %4762 }
0x177a   :  { %12775 = vpow2.f32 %v4781_v19  ;;  %v4772_v29 = vsub.f32 %v4588_v48, %v4760_v27  ;;  %v4773_v30 = vsub.f32 %v4664_v47, %v4763_v28 }
0x177b   :  { %12777 = vpow2.f32 %v4783_v20 }
0x177c   :  { %v4785_v4 = vmul.f32 1.442695, %v4772_v29  ;;  %v4787_v32 = vmul.f32 1.442695, %v4773_v30 }
0x177d   :  { %v4766_v33 = vpop.xlane.xlu0 %4765  ;;  %v4832_v5 = vpop.permute.xlu1 %4831 }
0x177e   :  { %12779 = vpow2.f32 %v4785_v4  ;;  %v4774_v34 = vsub.f32 %v4740_v52, %v4766_v33  ;;  %11975 = vmatpush3.msra.mxu0 %v4832_v5  ;;  %v4031_v4 = vld [vmem:[#allocation2 + $0x230] sm:$0xff]  ;;  %v4033_v5 = vld [vmem:[#allocation2 + $0x240] sm:$0xff] }
0x177f   :  { %12781 = vpow2.f32 %v4787_v32  ;;  %11984 = vmatprep.subr.mxu0 %v13006_v6  ;;  %v4032_v32 = vld [vmem:[#allocation2 + $0x238] sm:$0xff] }
0x1780   :  { %v12774_v35 = vpop.eup %12773  ;;  %v4789_v38 = vmul.f32 1.442695, %v4774_v34  ;;  %v12509_v33 = vpack.c.bf16 %v4032_v32, %v4031_v4  ;;  %v4034_v34 = vld [vmem:[#allocation2 + $0x248] sm:$0xff] }
0x1781   :  { %v4908_v39 = vpop.permute.xlu0 %4907  ;;  %v4797_v41 = vsel %vm428_vm11, %v12774_v35, 0.0  ;;  %v4984_v48 = vpop.permute.xlu1 %4983 }
0x1782   :  { %12783 = vpow2.f32 %v4789_v38  ;;  %4798 = vadd.xlane.f32.xlu1 %v4797_v41  ;;  %11980 = vmatpush3.msra.mxu1 %v4908_v39 }
0x1783   :  { %11989 = vmatprep.subr.mxu1 %v13006_v6 }
0x1784   :  { %v12776_v42 = vpop.eup %12775 }
0x1785   :  { %v12778_v7 = vpop.eup %12777  ;;  %v4800_v43 = vsel %vm428_vm11, %v12776_v42, 0.0  ;;  %v5060_v26 = vpop.permute.xlu1 %5059 }
0x1786   :  { %4801 = vadd.xlane.f32.xlu0 %v4800_v43  ;;  %v4803_v3 = vsel %vm428_vm11, %v12778_v7, 0.0  ;;  %v5136_v36 = vpop.permute.xlu0 %5135 }
0x1787   :  { %4804 = vadd.xlane.f32.xlu1 %v4803_v3 }
0x1788   :  { %v12780_v8 = vpop.eup %12779 }
0x1789   :  { %v13764_v44 = vpop.eup %12781  ;;  %v4806_v45 = vsel %vm428_vm11, %v12780_v8, 0.0  ;;  %v5212_v49 = vpop.permute.xlu1 %5211 }
0x178a   :  { %4807 = vadd.xlane.f32.xlu0 %v4806_v45  ;;  %v4809_v46 = vsel %vm428_vm11, %v13764_v44, 0.0 }
0x178b   :  { %4810 = vadd.xlane.f32.xlu1 %v4809_v46 }
0x178c   :  { %v13769_v25 = vpop.eup %12783 }
0x178d   :  { %v4812_v47 = vsel %vm428_vm11, %v13769_v25, 0.0 }
0x178e   :  { %4813 = vadd.xlane.f32.xlu0 %v4812_v47  ;;  %v11142_v47 = vld [vmem:[#allocation2 + $0x1e0] ss:$0 sm:$0xff] }
0x179c   :  { %5363 = vrot.lane.b32.xlu1 %v13659_v2, %s13012_s3 }
0x17a4   :  { %5287 = vrot.lane.b32.xlu0 %v13643_v62, %s13012_s3 }
0x17b6   :  { %v4796_v50 = vpop.xlane.xlu0 %4795 }
0x17b7   :  { %12785 = vrcp.f32 %v4796_v50 }
0x17ba   :  { %v4793_v51 = vpop.xlane.xlu1 %4792 }
0x17bb   :  { %12787 = vrcp.f32 %v4793_v51 }
0x17c1   :  { %v12786_v52 = vpop.eup %12785 }
0x17c2   :  { %v4824_v53 = vmul.f32 %v12786_v52, %v13751_v61 }
0x17c4   :  { %11982 = vmatmul.mubr.msk.f32.vlgmr.msra.gmra.mrb[58].mxu1 %vm428_vm11, %v4824_v53 }
0x17c5   :  { %v12788_v54 = vpop.eup %12787  ;;  %11990 = vmatpush3.msra.mxu1 %v5060_v26  ;;  %11991 = vmatprep.mubr.msk.f32.mxu1 %vm13009_vm10, %v13006_v6 }
0x17c6   :  { %v4823_v62 = vmul.f32 %v12788_v54, %v13755_v57  ;;  %11999 = vmatprep.subr.mxu1 %v13006_v6 }
0x17c8   :  { %11977 = vmatmul.mubr.msk.f32.vlgmr.msra.gmra.mrb[44].mxu0 %vm428_vm11, %v4823_v62 }
0x17c9   :  { %11985 = vmatpush3.msra.mxu0 %v4984_v48  ;;  %11986 = vmatprep.mubr.msk.f32.mxu0 %vm13009_vm10, %v13006_v6  ;;  %v3908_v48 = vadd.f32 %v11142_v47, %v13673_v23 }
0x17ca   :  { %11994 = vmatprep.subr.mxu0 %v13006_v6 }
0x17cb   :  { %v3916_v26 = vadd.f32 %v3908_v48, %v13555_v60 }
0x180f   :  { %v4799_v2 = vpop.xlane.xlu1 %4798 }
0x1810   :  { %12789 = vrcp.f32 %v4799_v2 }
0x1813   :  { %v4802_v55 = vpop.xlane.xlu0 %4801 }
0x1814   :  { %12791 = vrcp.f32 %v4802_v55  ;;  %v4805_v56 = vpop.xlane.xlu1 %4804 }
0x1815   :  { %12793 = vrcp.f32 %v4805_v56 }
0x1817   :  { %v4808_v15 = vpop.xlane.xlu0 %4807 }
0x1818   :  { %12795 = vrcp.f32 %v4808_v15  ;;  %v4811_v13 = vpop.xlane.xlu1 %4810 }
0x1819   :  { %12797 = vrcp.f32 %v4811_v13 }
0x181a   :  { %v12790_v16 = vpop.eup %12789 }
0x181b   :  { %v4814_v22 = vpop.xlane.xlu0 %4813  ;;  %v4825_v61 = vmul.f32 %v12790_v16, %v12774_v35  ;;  %v12513_v35 = vpack.c.bf16 %v4034_v34, %v4033_v5 }
0x181c   :  { %12799 = vrcp.f32 %v4814_v22  ;;  %v5364_v17 = vpop.permute.xlu1 %5363 }
0x181d   :  { %11987 = vmatmul.mubr.msk.f32.vlgmr.msra.gmra.mrb[46].mxu0 %vm428_vm11, %v4825_v61 }
0x181e   :  { %v12792_v58 = vpop.eup %12791  ;;  %11995 = vmatpush3.msra.mxu0 %v5136_v36  ;;  %11996 = vmatprep.mubr.msk.f32.mxu0 %vm13009_vm10, %v13006_v6  ;;  %v3913_v36 = vadd.f32 %v13671_v10, %v11142_v47 }
0x181f   :  { %v12794_v57 = vpop.eup %12793  ;;  %12004 = vmatprep.subr.mxu0 %v13006_v6  ;;  %v4826_v21 = vmul.f32 %v12792_v58, %v12776_v42  ;;  %v5288_v0 = vpop.permute.xlu0 %5287 }
0x1820   :  { %v4827_v9 = vmul.f32 %v12794_v57, %v12778_v7  ;;  %v3917_v50 = vadd.f32 %v3913_v36, %v13552_v59 }
0x1821   :  { %11992 = vmatmul.mubr.msk.f32.vlgmr.msra.gmra.mrb[60].mxu1 %vm428_vm11, %v4826_v21 }
0x1822   :  { %v12796_v11 = vpop.eup %12795  ;;  %11997 = vmatmul.mubr.msk.f32.vlgmr.msra.gmra.mrb[48].mxu0 %vm428_vm11, %v4827_v9  ;;  %12000 = vmatpush3.msra.mxu1 %v5212_v49  ;;  %v3920_v49 = vsel %vm251_vm3, %v3916_v26, 0.0  ;;  %v3923_v51 = vsel %vm251_vm3, %v3917_v50, 0.0  ;;  %v11145_v9 = vld [vmem:[#allocation2 + $0x1e8] ss:$0 sm:$0xff] }
0x1823   :  { %v12798_v12 = vpop.eup %12797  ;;  %12005 = vmatpush3.msra.mxu0 %v5288_v0  ;;  %12001 = vmatprep.mubr.msk.f32.mxu1 %vm13009_vm10, %v13006_v6  ;;  %v4828_v14 = vmul.f32 %v12796_v11, %v12780_v8 }
0x1824   :  { %12006 = vmatprep.mubr.msk.f32.mxu0 %vm13009_vm10, %v13006_v6  ;;  %12009 = vmatprep.subr.mxu1 %v13006_v6  ;;  %v4829_v24 = vmul.f32 %v12798_v12, %v13764_v44 }
0x1825   :  { %12002 = vmatmul.mubr.msk.f32.vlgmr.msra.gmra.mrb[62].mxu1 %vm428_vm11, %v4828_v14  ;;  %12510 = vmatprep.subr.bf16.mxu0 %v12509_v33 }
0x1826   :  { %v12800_v19 = vpop.eup %12799  ;;  %12007 = vmatmul.mubr.msk.f32.vlgmr.msra.gmra.mrb[50].mxu0 %vm428_vm11, %v4829_v24  ;;  %12010 = vmatpush3.msra.mxu1 %v5364_v17  ;;  %v11176_v24 = vld [vmem:[#allocation2 + $0x250] ss:$0 sm:$0xff] }
0x1827   :  { %12011 = vmatprep.mubr.msk.f32.mxu1 %vm13009_vm10, %v13006_v6  ;;  %v4830_v20 = vmul.f32 %v12800_v19, %v13769_v25  ;;  %12512 = vmatpush3.bf16.msra.mxu0 %v12509_v33 }
0x1828   :  { %12514 = vmatprep.subr.bf16.mxu0 %v12513_v35 }
0x1829   :  { %12012 = vmatmul.mubr.msk.f32.vlgmr.msra.gmra.mrb[64].mxu1 %vm428_vm11, %v4830_v20 }
0x182b   :  { %12516 = vmatpush3.bf16.msra.mxu0 %v12513_v35 }
0x1897   :  { %v4979_v27 = vpop.f32.mrb[58].mxu1 }
0x1898   :  { %v11983_v28 = vpop.f32.mrb[59].mxu1 }
0x189b   :  { %v4903_v29 = vpop.f32.mrb[44].mxu0 }
0x189c   :  { %v11978_v30 = vpop.f32.mrb[45].mxu0 }
0x18f0   :  { %v5055_v38 = vpop.f32.mrb[46].mxu0 }
0x18f1   :  { %5441 = vrot.lane.b32.xlu0 %v5055_v38, %s13004_s29  ;;  %v11988_v39 = vpop.f32.mrb[47].mxu0 }
0x18f4   :  { %v5131_v41 = vpop.f32.mrb[60].mxu1 }
0x18f5   :  { %v5207_v42 = vpop.f32.mrb[48].mxu0  ;;  %5443 = vrot.lane.b32.xlu1 %v5131_v41, %s13004_s29  ;;  %v11993_v7 = vpop.f32.mrb[61].mxu1 }
0x18f6   :  { %5449 = vrot.lane.b32.xlu0 %v5207_v42, %s13013_s20  ;;  %v11998_v43 = vpop.f32.mrb[49].mxu0  ;;  %v13839_v42 = vld [vmem:[#allocation2 + $0x1f0] ss:$0 sm:$0xff] }
0x18f8   :  { %v5283_v3 = vpop.f32.mrb[62].mxu1 }
0x18f9   :  { %v5359_v8 = vpop.f32.mrb[50].mxu0  ;;  %5451 = vrot.lane.b32.xlu1 %v5283_v3, %s13013_s20  ;;  %v12003_v44 = vpop.f32.mrb[63].mxu1 }
0x18fa   :  { %5457 = vrot.lane.b32.xlu0 %v5359_v8, %s13014_s21  ;;  %v12008_v45 = vpop.f32.mrb[51].mxu0 }
0x18fc   :  { %v5435_v46 = vpop.f32.mrb[64].mxu1 }
0x18fd   :  { %5459 = vrot.lane.b32.xlu1 %v5435_v46, %s13014_s21  ;;  %v12013_v25 = vpop.f32.mrb[65].mxu1 }
0x1919   :  { %3921 = vadd.xlane.f32.xlu0 %v3920_v49  ;;  %v5610_v49 = vld [vmem:[#allocation2 + $0x268] sm:$0xff] }
0x1921   :  { %3924 = vadd.xlane.f32.xlu1 %v3923_v51 }
0x1963   :  { %v5442_v52 = vpop.permute.xlu0 %5441 }
0x1964   :  { %v5463_v62 = vsel %vm428_vm11, %v4903_v29, %v5442_v52  ;;  %v5612_v52 = vld [vmem:[#allocation2 + $0x278] sm:$0xff] }
0x1967   :  { %v5444_v53 = vpop.permute.xlu1 %5443 }
0x1968   :  { %v5450_v54 = vpop.permute.xlu0 %5449  ;;  %v5464_v10 = vsel %vm428_vm11, %v4979_v27, %v5444_v53  ;;  %v5613_v53 = vld [vmem:[#allocation2 + $0x280] sm:$0xff] }
0x1969   :  { %v5465_v23 = vsel %vm65_vm0, %v5463_v62, %v5450_v54  ;;  %v12650_v54 = vpack.i.bf16 %v5613_v53, %v5612_v52 }
0x196b   :  { %v5452_v2 = vpop.permute.xlu1 %5451 }
0x196c   :  { %v5458_v55 = vpop.permute.xlu0 %5457  ;;  %v5466_v59 = vsel %vm65_vm0, %v5464_v10, %v5452_v2  ;;  %v12521_v2 = vpack.c.bf16 %v5613_v53, %v5612_v52 }
0x196d   :  { %v5467_v60 = vsel %vm1759_vm14, %v5465_v23, %v5458_v55  ;;  %v13861_v23 = vld [vmem:[#allocation2 + $0x288] ss:$0 sm:$0xff] }
0x196e   :  { %12022 = vmatprep.mubr.msk.f32.mxu0 %vm251_vm3, %v5467_v60 }
0x196f   :  { %v5460_v56 = vpop.permute.xlu1 %5459 }
0x1970   :  { %v5468_v15 = vsel %vm1759_vm14, %v5466_v59, %v5460_v56 }
0x1971   :  { %12023 = vmatmul.mubr.msk.f32.vlgmr.msra.gmra.mrb[52].mxu0 %vm251_vm3, %v5468_v15 }
0x19a6   :  { %v3922_v13 = vpop.xlane.xlu0 %3921 }
0x19a7   :  { %v3926_v16 = vmul.f32 0.03125, %v3922_v13 }
0x19a9   :  { %v3928_v22 = vsub.f32 %v3916_v26, %v3926_v16 }
0x19ab   :  { %v3930_v61 = vmul.f32 %v3928_v22, %v3928_v22  ;;  %v3962_v41 = vmul.f32 %v11145_v9, %v3928_v22 }
0x19ad   :  { %v3932_v58 = vsel %vm251_vm3, %v3930_v61, 0.0 }
0x19ae   :  { %3933 = vadd.xlane.f32.xlu1 %v3932_v58  ;;  %v3925_v57 = vpop.xlane.xlu1 %3924 }
0x19af   :  { %v3927_v21 = vmul.f32 0.03125, %v3925_v57 }
0x19b1   :  { %v3929_v0 = vsub.f32 %v3917_v50, %v3927_v21  ;;  %v5611_v50 = vld [vmem:[#allocation2 + $0x270] sm:$0xff] }
0x19b2   :  { %v12645_v51 = vpack.i.bf16 %v5611_v50, %v5610_v49  ;;  %v12517_v62 = vpack.c.bf16 %v5611_v50, %v5610_v49 }
0x19b3   :  { %v13826_v11 = vmul.f32 %v11145_v9, %v3929_v0  ;;  %v3931_v39 = vmul.f32 %v3929_v0, %v3929_v0 }
0x19b4   :  { %12518 = vmatprep.subr.bf16.mxu1 %v12517_v62 }
0x19b5   :  { %12520 = vmatpush3.bf16.msra.mxu1 %v12517_v62 }
0x19b6   :  { %12522 = vmatprep.subr.bf16.mxu1 %v12521_v2 }
0x19b9   :  { %12524 = vmatpush3.bf16.msra.mxu1 %v12521_v2 }
0x19ba   :  { %12047 = vmatprep.subr.mxu1 %v13006_v6 }
0x1a3b   :  { %v3934_v12 = vpop.xlane.xlu1 %3933 }
0x1a3c   :  { %v3938_v14 = vmul.f32 0.032258064, %v3934_v12 }
0x1a3e   :  { %12801 = vrsqrt.f32 %v3938_v14  ;;  %vm3942_vm12 = vcmp.eq.f32.partialorder %v3938_v14, inf  ;;  %v3945_v4 = vand.u32 2147483648, %v3938_v14  ;;  %vm3944_vm13 = vcmp.eq.f32.partialorder %v3938_v14, 0.0 }
0x1a44   :  { %v12024_v17 = vpop.f32.mrb[52].mxu0 }
0x1a45   :  { %v5545_v19 = vpop.f32.mrb[53].mxu0  ;;  %v5551_v20 = vadd.f32 %v12024_v17, %v11176_v24 }
0x1a46   :  { %v5546_v27 = vadd.f32 %v11176_v24, %v5545_v19 }
0x1a47   :  { %v13832_v32 = vadd.f32 %v5551_v20, %v13565_v1 }
0x1a48   :  { %v12802_v28 = vpop.eup %12801  ;;  %v13829_v29 = vadd.f32 %v5546_v27, %v13560_v63  ;;  %v3935_v63 = vsel %vm251_vm3, %v3931_v39, 0.0 }
0x1a49   :  { %v3941_v30 = vmul.f32 %v12802_v28, %v3938_v14  ;;  %v5561_v38 = vsel %vm251_vm3, %v13832_v32, 0.0 }
0x1a4a   :  { %v5558_v33 = vsel %vm251_vm3, %v13829_v29, 0.0 }
0x1a4b   :  { %v3943_v5 = vsel %vm3942_vm12, %v3938_v14, %v3941_v30  ;;  %5559 = vadd.xlane.f32.xlu0 %v5558_v33 }
0x1a4c   :  { %v3946_v34 = vsel %vm3944_vm13, %v3945_v4, %v3943_v5 }
0x1a4d   :  { %v3954_v35 = vadd.f32 1e-06, %v3946_v34 }
0x1a4f   :  { %5562 = vadd.xlane.f32.xlu0 %v5561_v38  ;;  %12803 = vrcp.f32 %v3954_v35 }
0x1a53   :  { %3936 = vadd.xlane.f32.xlu0 %v3935_v63 }
0x1a59   :  { %v12804_v1 = vpop.eup %12803 }
0x1a5a   :  { %v3964_v7 = vmul.f32 %v12804_v1, %v3962_v41 }
0x1a5c   :  { %v13842_v43 = vadd.f32 %v13839_v42, %v3964_v7 }
0x1a5e   :  { %12044 = vmatprep.mubr.msk.f32.mxu0 %vm251_vm3, %v13842_v43 }
0x1ad8   :  { %v5560_v3 = vpop.xlane.xlu0 %5559 }
0x1ad9   :  { %v5564_v8 = vmul.f32 0.03125, %v5560_v3 }
0x1adb   :  { %v13847_v44 = vsub.f32 %v13829_v29, %v5564_v8  ;;  %v11180_v8 = vld [vmem:[#allocation2 + $0x260] ss:$0 sm:$0xff] }
0x1adc   :  { %v5563_v45 = vpop.xlane.xlu0 %5562 }
0x1add   :  { %v5565_v46 = vmul.f32 0.03125, %v5563_v45  ;;  %v5568_v25 = vmul.f32 %v13847_v44, %v13847_v44 }
0x1adf   :  { %v13852_v47 = vsub.f32 %v13832_v32, %v5565_v46  ;;  %v5570_v48 = vsel %vm251_vm3, %v5568_v25, 0.0 }
0x1ae0   :  { %5571 = vadd.xlane.f32.xlu1 %v5570_v48  ;;  %v3937_v55 = vpop.xlane.xlu0 %3936 }
0x1ae1   :  { %v5569_v26 = vmul.f32 %v13852_v47, %v13852_v47  ;;  %v3939_v60 = vmul.f32 0.032258064, %v3937_v55 }
0x1ae3   :  { %v5573_v36 = vsel %vm251_vm3, %v5569_v26, 0.0  ;;  %12805 = vrsqrt.f32 %v3939_v60  ;;  %vm3949_vm15 = vcmp.eq.f32.partialorder %v3939_v60, inf  ;;  %v3952_v15 = vand.u32 2147483648, %v3939_v60 }
0x1ae4   :  { %5574 = vadd.xlane.f32.xlu0 %v5573_v36  ;;  %vm3951_vm1 = vcmp.eq.f32.partialorder %v3939_v60, 0.0 }
0x1aed   :  { %v12806_v10 = vpop.eup %12805 }
0x1aee   :  { %v3948_v59 = vmul.f32 %v12806_v10, %v3939_v60 }
0x1af0   :  { %v3950_v56 = vsel %vm3949_vm15, %v3939_v60, %v3948_v59 }
0x1af1   :  { %12646 = vrot.lane.b32.xlu1 %v12645_v51, %s13011_s15  ;;  %v3953_v13 = vsel %vm3951_vm1, %v3952_v15, %v3950_v56 }
0x1af2   :  { %v3955_v16 = vadd.f32 1e-06, %v3953_v13 }
0x1af4   :  { %12807 = vrcp.f32 %v3955_v16 }
0x1af5   :  { %5722 = vrot.lane.b32.xlu1 %v13861_v23, %s13011_s15 }
0x1afa   :  { %12651 = vrot.lane.b32.xlu0 %v12650_v54, %s13011_s15 }
0x1afe   :  { %v12808_v14 = vpop.eup %12807 }
0x1aff   :  { %v3965_v27 = vmul.f32 %v12808_v14, %v13826_v11 }
0x1b01   :  { %v13867_v5 = vadd.f32 %v13839_v42, %v3965_v27  ;;  %v11179_v42 = vld [vmem:[#allocation2 + $0x258] ss:$0 sm:$0xff] }
0x1b02   :  { %v5600_v7 = vmul.f32 %v11179_v42, %v13847_v44  ;;  %v5601_v25 = vmul.f32 %v11179_v42, %v13852_v47 }
0x1b6d   :  { %v5572_v22 = vpop.xlane.xlu1 %5571 }
0x1b6e   :  { %v5576_v61 = vmul.f32 0.032258064, %v5572_v22 }
0x1b70   :  { %12809 = vrsqrt.f32 %v5576_v61  ;;  %vm5580_vm2 = vcmp.eq.f32.partialorder %v5576_v61, inf  ;;  %v5583_v4 = vand.u32 2147483648, %v5576_v61  ;;  %vm5582_vm4 = vcmp.eq.f32.partialorder %v5576_v61, 0.0 }
0x1b71   :  { %v12647_v58 = vpop.permute.xlu1 %12646  ;;  %v5575_v57 = vpop.xlane.xlu0 %5574 }
0x1b72   :  { %v12649_v21 = vunpack.i.h.bf16 %v12647_v58  ;;  %v12648_v0 = vunpack.i.l.bf16 %v12647_v58  ;;  %v5577_v9 = vmul.f32 0.032258064, %v5575_v57 }
0x1b74   :  { %v12525_v12 = vpack.c.bf16 %v12649_v21, %v12648_v0  ;;  %12811 = vrsqrt.f32 %v5577_v9  ;;  %vm5587_vm6 = vcmp.eq.f32.partialorder %v5577_v9, inf  ;;  %v5590_v39 = vand.u32 2147483648, %v5577_v9 }
0x1b75   :  { %v12652_v24 = vpop.permute.xlu0 %12651  ;;  %vm5589_vm7 = vcmp.eq.f32.partialorder %v5577_v9, 0.0  ;;  %v5723_v49 = vpop.permute.xlu1 %5722 }
0x1b76   :  { %12526 = vmatprep.subr.bf16.mxu0 %v12525_v12  ;;  %v12654_v17 = vunpack.i.h.bf16 %v12652_v24  ;;  %v12653_v19 = vunpack.i.l.bf16 %v12652_v24 }
0x1b77   :  { %12528 = vmatpush3.bf16.msra.mxu0 %v12525_v12 }
0x1b78   :  { %v12529_v20 = vpack.c.bf16 %v12654_v17, %v12653_v19 }
0x1b7a   :  { %v12810_v28 = vpop.eup %12809  ;;  %12530 = vmatprep.subr.bf16.mxu0 %v12529_v20 }
0x1b7b   :  { %v5579_v30 = vmul.f32 %v12810_v28, %v5576_v61  ;;  %12532 = vmatpush3.bf16.msra.mxu0 %v12529_v20 }
0x1b7c   :  { %12057 = vmatprep.subr.mxu0 %v13006_v6 }
0x1b7d   :  { %v5581_v33 = vsel %vm5580_vm2, %v5576_v61, %v5579_v30 }
0x1b7e   :  { %v5584_v34 = vsel %vm5582_vm4, %v5583_v4, %v5581_v33  ;;  %v12812_v35 = vpop.eup %12811  ;;  %12045 = vmatmul.mubr.msk.f32.vlgmr.msra.gmra.mrb[54].mxu0 %vm251_vm3, %v13867_v5 }
0x1b7f   :  { %v5592_v38 = vadd.f32 1e-06, %v5584_v34  ;;  %v5586_v11 = vmul.f32 %v12812_v35, %v5577_v9  ;;  %12059 = vmatprep.mubr.msk.f32.mxu0 %vm13009_vm10, %v13006_v6 }
0x1b81   :  { %12813 = vrcp.f32 %v5592_v38  ;;  %v5588_v63 = vsel %vm5587_vm6, %v5577_v9, %v5586_v11 }
0x1b82   :  { %v5591_v41 = vsel %vm5589_vm7, %v5590_v39, %v5588_v63 }
0x1b83   :  { %v5593_v1 = vadd.f32 1e-06, %v5591_v41 }
0x1b85   :  { %12815 = vrcp.f32 %v5593_v1 }
0x1b8b   :  { %v12814_v3 = vpop.eup %12813 }
0x1b8c   :  { %v5602_v45 = vmul.f32 %v12814_v3, %v5600_v7 }
0x1b8e   :  { %v5608_v46 = vadd.f32 %v11180_v8, %v5602_v45 }
0x1b8f   :  { %v12816_v48 = vpop.eup %12815 }
0x1b90   :  { %12033 = vmatprep.mubr.msk.f32.mxu1 %vm251_vm3, %v5608_v46  ;;  %v5603_v26 = vmul.f32 %v12816_v48, %v5601_v25 }
0x1b92   :  { %v5609_v36 = vadd.f32 %v11180_v8, %v5603_v26 }
0x1b94   :  { %12034 = vmatmul.mubr.msk.f32.vlgmr.msra.gmra.mrb[66].mxu1 %vm251_vm3, %v5609_v36 }
0x1b95   :  { %12049 = vmatprep.mubr.msk.f32.mxu1 %vm13009_vm10, %v13006_v6 }
0x1c51   :  { %v12046_v50 = vpop.f32.mrb[54].mxu0 }
0x1c52   :  { %v13880_v51 = vadd.f32 %v12046_v50, %v5723_v49  ;;  %v5797_v44 = vpop.f32.mrb[55].mxu0 }
0x1c53   :  { %v13882_v52 = vadd.f32 %v5797_v44, %v5723_v49 }
0x1c54   :  { %5824 = vrot.lane.b32.xlu0 %v13880_v51, %s13007_s2 }
0x1c55   :  { %5822 = vrot.lane.b32.xlu1 %v13882_v52, %s13007_s2  ;;  %12048 = vmatpush3.xpose.msk.msra.mxu1 %vm428_vm11, %v13882_v52 }
0x1c56   :  { %12052 = vmatprep.subr.mxu1 %v13006_v6 }
0x1c58   :  { %5828 = vrot.lane.b32.xlu0 %v13880_v51, %s13008_s13 }
0x1c59   :  { %5826 = vrot.lane.b32.xlu1 %v13882_v52, %s13008_s13 }
0x1c5c   :  { %5832 = vrot.lane.b32.xlu0 %v13880_v51, %s13010_s14 }
0x1c5d   :  { %5830 = vrot.lane.b32.xlu1 %v13882_v52, %s13010_s14 }
0x1c67   :  { %v12035_v47 = vpop.f32.mrb[66].mxu1 }
0x1c68   :  { %v5702_v53 = vadd.f32 %v12035_v47, %v13861_v23  ;;  %v5696_v54 = vpop.f32.mrb[67].mxu1 }
0x1c69   :  { %v5697_v62 = vadd.f32 %v13861_v23, %v5696_v54 }
0x1c6a   :  { %5810 = vrot.lane.b32.xlu0 %v5702_v53, %s13007_s2 }
0x1c6b   :  { %5808 = vrot.lane.b32.xlu1 %v5697_v62, %s13007_s2  ;;  %12050 = vmatmul.mubr.msk.f32.vlgmr.msra.gmra.mrb[68].mxu1 %vm428_vm11, %v5697_v62 }
0x1c6c   :  { %12053 = vmatpush3.xpose.msk.msra.mxu1 %vm428_vm11, %v13880_v51  ;;  %12054 = vmatprep.mubr.msk.f32.mxu1 %vm13009_vm10, %v13006_v6 }
0x1c6d   :  { %12062 = vmatprep.subr.mxu1 %v13006_v6 }
0x1c6e   :  { %5814 = vrot.lane.b32.xlu0 %v5702_v53, %s13008_s13 }
0x1c6f   :  { %5812 = vrot.lane.b32.xlu1 %v5697_v62, %s13008_s13  ;;  %12055 = vmatmul.mubr.msk.f32.vlgmr.msra.gmra.mrb[70].mxu1 %vm428_vm11, %v5702_v53 }
0x1c70   :  { %12064 = vmatprep.mubr.msk.f32.mxu1 %vm13009_vm10, %v13006_v6 }
0x1c72   :  { %5818 = vrot.lane.b32.xlu0 %v5702_v53, %s13010_s14 }
0x1c73   :  { %5816 = vrot.lane.b32.xlu1 %v5697_v62, %s13010_s14 }
0x1cc6   :  { %v13916_v2 = vpop.permute.xlu0 %5824 }
0x1cc7   :  { %v13918_v23 = vpop.permute.xlu1 %5822  ;;  %12063 = vmatpush3.xpose.msk.msra.mxu1 %vm428_vm11, %v13916_v2 }
0x1cc8   :  { %12058 = vmatpush3.xpose.msk.msra.mxu0 %vm428_vm11, %v13918_v23  ;;  %12072 = vmatprep.subr.mxu1 %v13006_v6 }
0x1cc9   :  { %12067 = vmatprep.subr.mxu0 %v13006_v6 }
0x1cca   :  { %v13926_v55 = vpop.permute.xlu0 %5828 }
0x1ccb   :  { %v13928_v60 = vpop.permute.xlu1 %5826 }
0x1cce   :  { %v13930_v10 = vpop.permute.xlu0 %5832 }
0x1ccf   :  { %v13932_v59 = vpop.permute.xlu1 %5830 }
0x1cdc   :  { %v5811_v56 = vpop.permute.xlu0 %5810 }
0x1cdd   :  { %v5809_v15 = vpop.permute.xlu1 %5808  ;;  %12065 = vmatmul.mubr.msk.f32.vlgmr.msra.gmra.mrb[72].mxu1 %vm428_vm11, %v5811_v56 }
0x1cde   :  { %12073 = vmatpush3.xpose.msk.msra.mxu1 %vm428_vm11, %v13926_v55  ;;  %12060 = vmatmul.mubr.msk.f32.vlgmr.msra.gmra.mrb[56].mxu0 %vm428_vm11, %v5809_v15 }
0x1cdf   :  { %12068 = vmatpush3.xpose.msk.msra.mxu0 %vm428_vm11, %v13928_v60  ;;  %12074 = vmatprep.mubr.msk.f32.mxu1 %vm13009_vm10, %v13006_v6 }
0x1ce0   :  { %v5815_v13 = vpop.permute.xlu0 %5814  ;;  %12082 = vmatprep.subr.mxu1 %v13006_v6  ;;  %12069 = vmatprep.mubr.msk.f32.mxu0 %vm13009_vm10, %v13006_v6 }
0x1ce1   :  { %12077 = vmatprep.subr.mxu0 %v13006_v6  ;;  %v5813_v16 = vpop.permute.xlu1 %5812  ;;  %12075 = vmatmul.mubr.msk.f32.vlgmr.msra.gmra.mrb[74].mxu1 %vm428_vm11, %v5815_v13 }
0x1ce2   :  { %12083 = vmatpush3.xpose.msk.msra.mxu1 %vm428_vm11, %v13930_v10  ;;  %12070 = vmatmul.mubr.msk.f32.vlgmr.msra.gmra.mrb[58].mxu0 %vm428_vm11, %v5813_v16 }
0x1ce3   :  { %12078 = vmatpush3.xpose.msk.msra.mxu0 %vm428_vm11, %v13932_v59  ;;  %12084 = vmatprep.mubr.msk.f32.mxu1 %vm13009_vm10, %v13006_v6 }
0x1ce4   :  { %v5819_v22 = vpop.permute.xlu0 %5818  ;;  %12079 = vmatprep.mubr.msk.f32.mxu0 %vm13009_vm10, %v13006_v6  ;;  %12092 = vmatprep.subr.mxu1 %v13006_v6 }
0x1ce5   :  { %v5817_v61 = vpop.permute.xlu1 %5816  ;;  %12085 = vmatmul.mubr.msk.f32.vlgmr.msra.gmra.mrb[76].mxu1 %vm428_vm11, %v5819_v22  ;;  %12087 = vmatprep.subr.mxu0 %v13006_v6 }
0x1ce6   :  { %12080 = vmatmul.mubr.msk.f32.vlgmr.msra.gmra.mrb[60].mxu0 %vm428_vm11, %v5817_v61  ;;  %12094 = vmatprep.mubr.msk.f32.mxu1 %vm13009_vm10, %v13006_v6 }
0x1ce7   :  { %12089 = vmatprep.mubr.msk.f32.mxu0 %vm13009_vm10, %v13006_v6 }
0x1d3e   :  { %v5904_v58 = vpop.f32.mrb[68].mxu1 }
0x1d3f   :  { %v5905_v57 = vadd.f32 %v5904_v58, %v13222_v37  ;;  %v12051_v21 = vpop.f32.mrb[69].mxu1 }
0x1d41   :  { %v6426_v0 = vsel %vm428_vm11, %v5905_v57, -inf }
0x1d42   :  { %6427 = vmax.xlane.f32.xlu1 %v6426_v0  ;;  %v5978_v9 = vpop.f32.mrb[70].mxu1 }
0x1d43   :  { %v5979_v12 = vadd.f32 %v5978_v9, %v13225_v40  ;;  %v12056_v14 = vpop.f32.mrb[71].mxu1 }
0x1d45   :  { %v6429_v24 = vsel %vm428_vm11, %v5979_v12, -inf }
0x1d46   :  { %6430 = vmax.xlane.f32.xlu0 %v6429_v24 }
0x1db0   :  { %v6126_v17 = vpop.f32.mrb[72].mxu1 }
0x1db1   :  { %v6127_v19 = vadd.f32 %v6126_v17, %v13225_v40  ;;  %v6052_v20 = vpop.f32.mrb[56].mxu0  ;;  %v12066_v27 = vpop.f32.mrb[73].mxu1 }
0x1db2   :  { %v6053_v28 = vadd.f32 %v6052_v20, %v13222_v37  ;;  %v12061_v30 = vpop.f32.mrb[57].mxu0 }
0x1db3   :  { %v6435_v4 = vsel %vm428_vm11, %v6127_v19, -inf }
0x1db4   :  { %6436 = vmax.xlane.f32.xlu1 %v6435_v4  ;;  %v6274_v33 = vpop.f32.mrb[74].mxu1  ;;  %v6432_v34 = vsel %vm428_vm11, %v6053_v28, -inf }
0x1db5   :  { %v6275_v35 = vadd.f32 %v6274_v33, %v13225_v40  ;;  %v6200_v38 = vpop.f32.mrb[58].mxu0  ;;  %6433 = vmax.xlane.f32.xlu0 %v6432_v34  ;;  %v12076_v11 = vpop.f32.mrb[75].mxu1 }
0x1db6   :  { %v6201_v39 = vadd.f32 %v6200_v38, %v13222_v37  ;;  %v12071_v63 = vpop.f32.mrb[59].mxu0 }
0x1db7   :  { %v6441_v41 = vsel %vm428_vm11, %v6275_v35, -inf }
0x1db8   :  { %6442 = vmax.xlane.f32.xlu1 %v6441_v41  ;;  %v6422_v1 = vpop.f32.mrb[76].mxu1  ;;  %v6438_v42 = vsel %vm428_vm11, %v6201_v39, -inf }
0x1db9   :  { %v6423_v7 = vadd.f32 %v6422_v1, %v13225_v40  ;;  %v6348_v3 = vpop.f32.mrb[60].mxu0  ;;  %6439 = vmax.xlane.f32.xlu0 %v6438_v42  ;;  %v12086_v8 = vpop.f32.mrb[77].mxu1 }
0x1dba   :  { %v6349_v45 = vadd.f32 %v6348_v3, %v13222_v37  ;;  %v12081_v46 = vpop.f32.mrb[61].mxu0 }
0x1dbb   :  { %v6447_v25 = vsel %vm428_vm11, %v6423_v7, -inf }
0x1dbc   :  { %6448 = vmax.xlane.f32.xlu1 %v6447_v25  ;;  %v6444_v48 = vsel %vm428_vm11, %v6349_v45, -inf }
0x1dbd   :  { %6445 = vmax.xlane.f32.xlu0 %v6444_v48 }
0x1dcd   :  { %6590 = vrot.lane.b32.xlu1 %v13880_v51, %s13011_s15 }
0x1dcf   :  { %v6428_v36 = vpop.xlane.xlu1 %6427 }
0x1dd0   :  { %v6450_v50 = vsub.f32 %v5905_v57, %v6428_v36 }
0x1dd1   :  { %6666 = vrot.lane.b32.xlu1 %v13918_v23, %s13011_s15 }
0x1dd2   :  { %v6458_v44 = vmul.f32 1.442695, %v6450_v50 }
0x1dd3   :  { %6514 = vrot.lane.b32.xlu0 %v13882_v52, %s13011_s15  ;;  %v6431_v26 = vpop.xlane.xlu0 %6430 }
0x1dd4   :  { %v6451_v49 = vsub.f32 %v5979_v12, %v6431_v26 }
0x1dd5   :  { %6818 = vrot.lane.b32.xlu1 %v13928_v60, %s13011_s15 }
0x1dd6   :  { %v6460_v51 = vmul.f32 1.442695, %v6451_v49 }
0x1dd7   :  { %6742 = vrot.lane.b32.xlu0 %v13916_v2, %s13011_s15 }
0x1dd8   :  { %12817 = vpow2.f32 %v6460_v51 }
0x1dd9   :  { %12819 = vpow2.f32 %v6458_v44 }
0x1ddb   :  { %6894 = vrot.lane.b32.xlu0 %v13926_v55, %s13011_s15 }
0x1de2   :  { %v13992_v47 = vpop.eup %12817 }
0x1de3   :  { %v13994_v52 = vpop.eup %12819  ;;  %v6477_v53 = vsel %vm428_vm11, %v13992_v47, 0.0 }
0x1de4   :  { %v6474_v54 = vsel %vm428_vm11, %v13994_v52, 0.0 }
0x1df9   :  { %6478 = vadd.xlane.f32.xlu1 %v6477_v53 }
0x1dfa   :  { %6475 = vadd.xlane.f32.xlu0 %v6474_v54 }
0x1e41   :  { %v6437_v62 = vpop.xlane.xlu1 %6436 }
0x1e42   :  { %v6453_v2 = vsub.f32 %v6127_v19, %v6437_v62  ;;  %v6434_v23 = vpop.xlane.xlu0 %6433 }
0x1e43   :  { %v6452_v55 = vsub.f32 %v6053_v28, %v6434_v23 }
0x1e44   :  { %v6464_v60 = vmul.f32 1.442695, %v6453_v2 }
0x1e45   :  { %v6462_v56 = vmul.f32 1.442695, %v6452_v55  ;;  %v6443_v15 = vpop.xlane.xlu1 %6442 }
0x1e46   :  { %12821 = vpow2.f32 %v6464_v60  ;;  %v6455_v13 = vsub.f32 %v6275_v35, %v6443_v15  ;;  %v6440_v16 = vpop.xlane.xlu0 %6439 }
0x1e47   :  { %12823 = vpow2.f32 %v6462_v56  ;;  %v6454_v22 = vsub.f32 %v6201_v39, %v6440_v16 }
0x1e48   :  { %v6468_v61 = vmul.f32 1.442695, %v6455_v13 }
0x1e49   :  { %v6466_v58 = vmul.f32 1.442695, %v6454_v22  ;;  %v6449_v57 = vpop.xlane.xlu1 %6448 }
0x1e4a   :  { %12825 = vpow2.f32 %v6468_v61  ;;  %v6457_v21 = vsub.f32 %v6423_v7, %v6449_v57  ;;  %v6446_v0 = vpop.xlane.xlu0 %6445  ;;  %v5616_v57 = vld [vmem:[#allocation2 + $0x298] sm:$0xff] }
0x1e4b   :  { %12827 = vpow2.f32 %v6466_v58  ;;  %v6456_v9 = vsub.f32 %v6349_v45, %v6446_v0  ;;  %v5615_v58 = vld [vmem:[#allocation2 + $0x290] sm:$0xff]  ;;  %v5617_v0 = vld [vmem:[#allocation2 + $0x2a0] sm:$0xff] }
0x1e4c   :  { %v6472_v12 = vmul.f32 1.442695, %v6457_v21  ;;  %v12533_v21 = vpack.c.bf16 %v5616_v57, %v5615_v58  ;;  %v7300_v58 = vld [vmem:[#allocation2 + $0x300] sm:$0xff] }
0x1e4d   :  { %v6470_v14 = vmul.f32 1.442695, %v6456_v9  ;;  %v6591_v24 = vpop.permute.xlu1 %6590  ;;  %v5618_v9 = vld [vmem:[#allocation2 + $0x2a8] sm:$0xff] }
0x1e4e   :  { %12829 = vpow2.f32 %v6472_v12  ;;  %v6515_v17 = vpop.permute.xlu0 %6514  ;;  %12093 = vmatpush3.msra.mxu1 %v6591_v24  ;;  %v12537_v12 = vpack.c.bf16 %v5618_v9, %v5617_v0  ;;  %v7302_v9 = vld [vmem:[#allocation2 + $0x310] sm:$0xff] }
0x1e4f   :  { %12831 = vpow2.f32 %v6470_v14  ;;  %12088 = vmatpush3.msra.mxu0 %v6515_v17  ;;  %12102 = vmatprep.subr.mxu1 %v13006_v6 }
0x1e50   :  { %v12822_v19 = vpop.eup %12821  ;;  %12097 = vmatprep.subr.mxu0 %v13006_v6 }
0x1e51   :  { %v12824_v20 = vpop.eup %12823  ;;  %v6483_v27 = vsel %vm428_vm11, %v12822_v19, 0.0  ;;  %v6667_v63 = vpop.permute.xlu1 %6666 }
0x1e52   :  { %6484 = vadd.xlane.f32.xlu1 %v6483_v27  ;;  %v6480_v28 = vsel %vm428_vm11, %v12824_v20, 0.0  ;;  %v6743_v41 = vpop.permute.xlu0 %6742 }
0x1e53   :  { %6481 = vadd.xlane.f32.xlu0 %v6480_v28 }
0x1e54   :  { %v12826_v30 = vpop.eup %12825 }
0x1e55   :  { %v12828_v4 = vpop.eup %12827  ;;  %v6489_v33 = vsel %vm428_vm11, %v12826_v30, 0.0  ;;  %v6819_v1 = vpop.permute.xlu1 %6818 }
0x1e56   :  { %6490 = vadd.xlane.f32.xlu1 %v6489_v33  ;;  %v6486_v34 = vsel %vm428_vm11, %v12828_v4, 0.0  ;;  %v6895_v42 = vpop.permute.xlu0 %6894 }
0x1e57   :  { %6487 = vadd.xlane.f32.xlu0 %v6486_v34 }
0x1e58   :  { %v14006_v35 = vpop.eup %12829 }
0x1e59   :  { %v14008_v38 = vpop.eup %12831  ;;  %v6495_v11 = vsel %vm428_vm11, %v14006_v35, 0.0 }
0x1e5a   :  { %6496 = vadd.xlane.f32.xlu1 %v6495_v11  ;;  %v6492_v39 = vsel %vm428_vm11, %v14008_v38, 0.0 }
0x1e5b   :  { %6493 = vadd.xlane.f32.xlu0 %v6492_v39 }
0x1e6b   :  { %6970 = vrot.lane.b32.xlu1 %v13932_v59, %s13011_s15 }
0x1e71   :  { %7046 = vrot.lane.b32.xlu0 %v13930_v10, %s13011_s15 }
0x1e86   :  { %v6479_v7 = vpop.xlane.xlu1 %6478 }
0x1e87   :  { %12833 = vrcp.f32 %v6479_v7  ;;  %v6476_v3 = vpop.xlane.xlu0 %6475 }
0x1e88   :  { %12835 = vrcp.f32 %v6476_v3 }
0x1e91   :  { %v12834_v8 = vpop.eup %12833 }
0x1e92   :  { %v12836_v45 = vpop.eup %12835  ;;  %v6507_v46 = vmul.f32 %v12834_v8, %v13992_v47 }
0x1e93   :  { %v6506_v25 = vmul.f32 %v12836_v45, %v13994_v52 }
0x1e94   :  { %12095 = vmatmul.mubr.msk.f32.vlgmr.msra.gmra.mrb[78].mxu1 %vm428_vm11, %v6507_v46 }
0x1e95   :  { %12103 = vmatpush3.msra.mxu1 %v6743_v41  ;;  %12090 = vmatmul.mubr.msk.f32.vlgmr.msra.gmra.mrb[62].mxu0 %vm428_vm11, %v6506_v25  ;;  %v11210_v25 = vld [vmem:[#allocation2 + $0x2b0] ss:$0 sm:$0xff] }
0x1e96   :  { %12098 = vmatpush3.msra.mxu0 %v6667_v63  ;;  %12104 = vmatprep.mubr.msk.f32.mxu1 %vm13009_vm10, %v13006_v6 }
0x1e97   :  { %12112 = vmatprep.subr.mxu1 %v13006_v6  ;;  %12099 = vmatprep.mubr.msk.f32.mxu0 %vm13009_vm10, %v13006_v6 }
0x1e98   :  { %12107 = vmatprep.subr.mxu0 %v13006_v6 }
0x1edf   :  { %v6485_v10 = vpop.xlane.xlu1 %6484 }
0x1ee0   :  { %12837 = vrcp.f32 %v6485_v10  ;;  %v6482_v59 = vpop.xlane.xlu0 %6481 }
0x1ee1   :  { %12839 = vrcp.f32 %v6482_v59 }
0x1ee3   :  { %v6491_v48 = vpop.xlane.xlu1 %6490 }
0x1ee4   :  { %12841 = vrcp.f32 %v6491_v48  ;;  %v6488_v26 = vpop.xlane.xlu0 %6487 }
0x1ee5   :  { %12843 = vrcp.f32 %v6488_v26 }
0x1ee7   :  { %v6497_v36 = vpop.xlane.xlu1 %6496 }
0x1ee8   :  { %12845 = vrcp.f32 %v6497_v36  ;;  %v6494_v49 = vpop.xlane.xlu0 %6493 }
0x1ee9   :  { %12847 = vrcp.f32 %v6494_v49 }
0x1eea   :  { %v12838_v50 = vpop.eup %12837 }
0x1eeb   :  { %v12840_v51 = vpop.eup %12839  ;;  %v6509_v44 = vmul.f32 %v12838_v50, %v12822_v19  ;;  %v6971_v55 = vpop.permute.xlu1 %6970 }
0x1eec   :  { %v6508_v47 = vmul.f32 %v12840_v51, %v12824_v20  ;;  %v7047_v2 = vpop.permute.xlu0 %7046 }
0x1eed   :  { %12105 = vmatmul.mubr.msk.f32.vlgmr.msra.gmra.mrb[80].mxu1 %vm428_vm11, %v6509_v44 }
0x1eee   :  { %v12842_v52 = vpop.eup %12841  ;;  %12113 = vmatpush3.msra.mxu1 %v6895_v42  ;;  %12100 = vmatmul.mubr.msk.f32.vlgmr.msra.gmra.mrb[64].mxu0 %vm428_vm11, %v6508_v47 }
0x1eef   :  { %v12844_v53 = vpop.eup %12843  ;;  %12108 = vmatpush3.msra.mxu0 %v6819_v1  ;;  %12114 = vmatprep.mubr.msk.f32.mxu1 %vm13009_vm10, %v13006_v6  ;;  %v6511_v54 = vmul.f32 %v12842_v52, %v12826_v30 }
0x1ef0   :  { %12122 = vmatprep.subr.mxu1 %v13006_v6  ;;  %12109 = vmatprep.mubr.msk.f32.mxu0 %vm13009_vm10, %v13006_v6  ;;  %v6510_v62 = vmul.f32 %v12844_v53, %v12828_v4 }
0x1ef1   :  { %12115 = vmatmul.mubr.msk.f32.vlgmr.msra.gmra.mrb[82].mxu1 %vm428_vm11, %v6511_v54  ;;  %12117 = vmatprep.subr.mxu0 %v13006_v6 }
0x1ef2   :  { %v12846_v23 = vpop.eup %12845  ;;  %12123 = vmatpush3.msra.mxu1 %v7047_v2  ;;  %12110 = vmatmul.mubr.msk.f32.vlgmr.msra.gmra.mrb[66].mxu0 %vm428_vm11, %v6510_v62 }
0x1ef3   :  { %v12848_v60 = vpop.eup %12847  ;;  %12118 = vmatpush3.msra.mxu0 %v6971_v55  ;;  %12124 = vmatprep.mubr.msk.f32.mxu1 %vm13009_vm10, %v13006_v6  ;;  %v6513_v56 = vmul.f32 %v12846_v23, %v14006_v35  ;;  %v7293_v55 = vld [vmem:[#allocation2 + $0x2c8] sm:$0xff] }
0x1ef4   :  { %12119 = vmatprep.mubr.msk.f32.mxu0 %vm13009_vm10, %v13006_v6  ;;  %v6512_v15 = vmul.f32 %v12848_v60, %v14008_v38  ;;  %12534 = vmatprep.subr.bf16.mxu0 %v12533_v21  ;;  %v7294_v60 = vld [vmem:[#allocation2 + $0x2d0] sm:$0xff] }
0x1ef5   :  { %12125 = vmatmul.mubr.msk.f32.vlgmr.msra.gmra.mrb[84].mxu1 %vm428_vm11, %v6513_v56  ;;  %v7295_v56 = vld [vmem:[#allocation2 + $0x2d8] sm:$0xff] }
0x1ef6   :  { %12120 = vmatmul.mubr.msk.f32.vlgmr.msra.gmra.mrb[68].mxu0 %vm428_vm11, %v6512_v15  ;;  %v12541_v15 = vpack.c.bf16 %v7294_v60, %v7293_v55 }
0x1ef7   :  { %12536 = vmatpush3.bf16.msra.mxu0 %v12533_v21  ;;  %v7301_v21 = vld [vmem:[#allocation2 + $0x308] sm:$0xff] }
0x1ef8   :  { %12538 = vmatprep.subr.bf16.mxu0 %v12537_v12  ;;  %12542 = vmatprep.subr.bf16.mxu1 %v12541_v15  ;;  %v12553_v0 = vpack.c.bf16 %v7301_v21, %v7300_v58 }
0x1ef9   :  { %12544 = vmatpush3.bf16.msra.mxu1 %v12541_v15 }
0x1efb   :  { %12540 = vmatpush3.bf16.msra.mxu0 %v12537_v12  ;;  %v7303_v12 = vld [vmem:[#allocation2 + $0x318] sm:$0xff] }
0x1f67   :  { %v6662_v13 = vpop.f32.mrb[78].mxu1 }
0x1f68   :  { %v6586_v16 = vpop.f32.mrb[62].mxu0  ;;  %v12096_v22 = vpop.f32.mrb[79].mxu1 }
0x1f69   :  { %v12091_v61 = vpop.f32.mrb[63].mxu0  ;;  %v7298_v22 = vld [vmem:[#allocation2 + $0x2f0] sm:$0xff] }
0x1f6a   :  { %v7299_v61 = vld [vmem:[#allocation2 + $0x2f8] sm:$0xff] }
0x1f6b   :  { %v12549_v57 = vpack.c.bf16 %v7299_v61, %v7298_v22 }
0x1f6d   :  { %12550 = vmatprep.subr.bf16.mxu0 %v12549_v57 }
0x1fc0   :  { %v6814_v14 = vpop.f32.mrb[80].mxu1 }
0x1fc1   :  { %v6738_v24 = vpop.f32.mrb[64].mxu0  ;;  %7126 = vrot.lane.b32.xlu0 %v6814_v14, %s13004_s29  ;;  %v12106_v17 = vpop.f32.mrb[81].mxu1  ;;  %v12557_v14 = vpack.c.bf16 %v7303_v12, %v7302_v9  ;;  %v7535_v12 = vld [vmem:[#allocation2 + $0x348] sm:$0xff] }
0x1fc2   :  { %7124 = vrot.lane.b32.xlu1 %v6738_v24, %s13004_s29  ;;  %v12101_v19 = vpop.f32.mrb[65].mxu0 }
0x1fc4   :  { %v6966_v20 = vpop.f32.mrb[82].mxu1 }
0x1fc5   :  { %v6890_v27 = vpop.f32.mrb[66].mxu0  ;;  %7134 = vrot.lane.b32.xlu0 %v6966_v20, %s13013_s20  ;;  %v12116_v28 = vpop.f32.mrb[83].mxu1 }
0x1fc6   :  { %7132 = vrot.lane.b32.xlu1 %v6890_v27, %s13013_s20  ;;  %v12111_v30 = vpop.f32.mrb[67].mxu0 }
0x1fc8   :  { %v7118_v4 = vpop.f32.mrb[84].mxu1 }
0x1fc9   :  { %v7042_v33 = vpop.f32.mrb[68].mxu0  ;;  %7142 = vrot.lane.b32.xlu0 %v7118_v4, %s13014_s21  ;;  %v12126_v34 = vpop.f32.mrb[85].mxu1 }
0x1fca   :  { %7140 = vrot.lane.b32.xlu1 %v7042_v33, %s13014_s21  ;;  %v12121_v35 = vpop.f32.mrb[69].mxu0 }
0x2033   :  { %v7127_v38 = vpop.permute.xlu0 %7126 }
0x2034   :  { %v7125_v11 = vpop.permute.xlu1 %7124  ;;  %v7147_v42 = vsel %vm428_vm11, %v6662_v13, %v7127_v38  ;;  %v7296_v13 = vld [vmem:[#allocation2 + $0x2e0] sm:$0xff] }
0x2035   :  { %v7146_v41 = vsel %vm428_vm11, %v6586_v16, %v7125_v11  ;;  %v12545_v16 = vpack.c.bf16 %v7296_v13, %v7295_v56 }
0x2037   :  { %v7135_v39 = vpop.permute.xlu0 %7134  ;;  %12546 = vmatprep.subr.bf16.mxu1 %v12545_v16 }
0x2038   :  { %v7133_v63 = vpop.permute.xlu1 %7132  ;;  %v7149_v8 = vsel %vm65_vm0, %v7147_v42, %v7135_v39  ;;  %12548 = vmatpush3.bf16.msra.mxu1 %v12545_v16 }
0x2039   :  { %v7148_v7 = vsel %vm65_vm0, %v7146_v41, %v7133_v63 }
0x203b   :  { %v7143_v1 = vpop.permute.xlu0 %7142 }
0x203c   :  { %v7141_v3 = vpop.permute.xlu1 %7140  ;;  %v7151_v46 = vsel %vm1759_vm14, %v7149_v8, %v7143_v1  ;;  %v11213_v1 = vld [vmem:[#allocation2 + $0x2b8] ss:$0 sm:$0xff] }
0x203d   :  { %v7150_v45 = vsel %vm1759_vm14, %v7148_v7, %v7141_v3 }
0x203e   :  { %12135 = vmatprep.mubr.msk.f32.mxu0 %vm251_vm3, %v7150_v45  ;;  %v11214_v45 = vld [vmem:[#allocation2 + $0x2c0] ss:$0 sm:$0xff] }
0x203f   :  { %12136 = vmatmul.mubr.msk.f32.vlgmr.msra.gmra.mrb[70].mxu0 %vm251_vm3, %v7151_v46 }
0x2040   :  { %12552 = vmatpush3.bf16.msra.mxu0 %v12549_v57 }
0x2041   :  { %12554 = vmatprep.subr.bf16.mxu0 %v12553_v0 }
0x2044   :  { %12556 = vmatpush3.bf16.msra.mxu0 %v12553_v0 }
0x2045   :  { %12558 = vmatprep.subr.bf16.mxu0 %v12557_v14 }
0x2048   :  { %12560 = vmatpush3.bf16.msra.mxu0 %v12557_v14  ;;  %v7536_v14 = vld [vmem:[#allocation2 + $0x350] sm:$0xff] }
0x2112   :  { %v12137_v10 = vpop.f32.mrb[70].mxu0 }
0x2113   :  { %v7234_v59 = vadd.f32 %v12137_v10, %v11210_v25  ;;  %v7228_v48 = vpop.f32.mrb[71].mxu0 }
0x2114   :  { %v7229_v26 = vadd.f32 %v11210_v25, %v7228_v48  ;;  %v7304_v48 = vld [vmem:[#allocation2 + $0x320] sm:$0xff] }
0x2115   :  { %v14061_v36 = vadd.f32 %v7234_v59, %v13832_v32 }
0x2116   :  { %v14064_v49 = vadd.f32 %v7229_v26, %v13829_v29  ;;  %v7305_v26 = vld [vmem:[#allocation2 + $0x328] sm:$0xff] }
0x2117   :  { %v7244_v50 = vsel %vm251_vm3, %v14061_v36, 0.0 }
0x2118   :  { %7245 = vadd.xlane.f32.xlu0 %v7244_v50  ;;  %v7241_v51 = vsel %vm251_vm3, %v14064_v49, 0.0  ;;  %v12561_v50 = vpack.c.bf16 %v7305_v26, %v7304_v48 }
0x2119   :  { %7242 = vadd.xlane.f32.xlu1 %v7241_v51  ;;  %v11215_v51 = vld [vmem:[#allocation2 + $0x2e8] ss:$0 sm:$0xff] }
0x211a   :  { %12562 = vmatprep.subr.bf16.mxu0 %v12561_v50 }
0x211b   :  { %12564 = vmatpush3.bf16.msra.mxu0 %v12561_v50 }
0x211c   :  { %12189 = vmatprep.subr.mxu0 %v13006_v6 }
0x21a5   :  { %v7246_v44 = vpop.xlane.xlu0 %7245 }
0x21a6   :  { %v7248_v47 = vmul.f32 0.03125, %v7246_v44  ;;  %v7243_v52 = vpop.xlane.xlu1 %7242 }
0x21a7   :  { %v7247_v53 = vmul.f32 0.03125, %v7243_v52 }
0x21a8   :  { %v7250_v54 = vsub.f32 %v14061_v36, %v7248_v47 }
0x21a9   :  { %v7249_v32 = vsub.f32 %v14064_v49, %v7247_v53 }
0x21aa   :  { %v7252_v62 = vmul.f32 %v7250_v54, %v7250_v54  ;;  %v7284_v42 = vmul.f32 %v11213_v1, %v7250_v54 }
0x21ab   :  { %v7251_v2 = vmul.f32 %v7249_v32, %v7249_v32  ;;  %v7283_v3 = vmul.f32 %v11213_v1, %v7249_v32 }
0x21ac   :  { %v7256_v29 = vsel %vm251_vm3, %v7252_v62, 0.0  ;;  %v11218_v62 = vld [vmem:[#allocation2 + $0x330] ss:$0 sm:$0xff] }
0x21ad   :  { %7257 = vadd.xlane.f32.xlu1 %v7256_v29  ;;  %v7253_v23 = vsel %vm251_vm3, %v7251_v2, 0.0 }
0x21ae   :  { %7254 = vadd.xlane.f32.xlu0 %v7253_v23 }
0x223a   :  { %v7258_v24 = vpop.xlane.xlu1 %7257 }
0x223b   :  { %v7260_v17 = vmul.f32 0.032258064, %v7258_v24  ;;  %v7255_v19 = vpop.xlane.xlu0 %7254  ;;  %v7537_v24 = vld [vmem:[#allocation2 + $0x358] sm:$0xff] }
0x223c   :  { %v7259_v20 = vmul.f32 0.032258064, %v7255_v19  ;;  %v7538_v19 = vld [vmem:[#allocation2 + $0x360] sm:$0xff] }
0x223d   :  { %12849 = vrsqrt.f32 %v7260_v17  ;;  %vm7270_vm8 = vcmp.eq.f32.partialorder %v7260_v17, inf  ;;  %v7273_v4 = vand.u32 2147483648, %v7260_v17  ;;  %vm7272_vm9 = vcmp.eq.f32.partialorder %v7260_v17, 0.0 }
0x223e   :  { %12851 = vrsqrt.f32 %v7259_v20  ;;  %vm7263_vm12 = vcmp.eq.f32.partialorder %v7259_v20, inf  ;;  %v7266_v35 = vand.u32 2147483648, %v7259_v20  ;;  %vm7265_vm13 = vcmp.eq.f32.partialorder %v7259_v20, 0.0 }
0x2247   :  { %v12850_v27 = vpop.eup %12849 }
0x2248   :  { %v12852_v28 = vpop.eup %12851  ;;  %v7269_v30 = vmul.f32 %v12850_v27, %v7260_v17 }
0x2249   :  { %v7262_v33 = vmul.f32 %v12852_v28, %v7259_v20 }
0x224a   :  { %v7271_v34 = vsel %vm7270_vm8, %v7260_v17, %v7269_v30  ;;  %v12565_v17 = vpack.c.bf16 %v7536_v14, %v7535_v12 }
0x224b   :  { %v7274_v38 = vsel %vm7272_vm9, %v7273_v4, %v7271_v34  ;;  %v7264_v11 = vsel %vm7263_vm12, %v7259_v20, %v7262_v33  ;;  %v12569_v20 = vpack.c.bf16 %v7538_v19, %v7537_v24 }
0x224c   :  { %v7276_v39 = vadd.f32 1e-06, %v7274_v38  ;;  %v7267_v63 = vsel %vm7265_vm13, %v7266_v35, %v7264_v11  ;;  %12566 = vmatprep.subr.bf16.mxu1 %v12565_v17 }
0x224d   :  { %v7275_v41 = vadd.f32 1e-06, %v7267_v63 }
0x224e   :  { %12853 = vrcp.f32 %v7276_v39 }
0x224f   :  { %12855 = vrcp.f32 %v7275_v41 }
0x2258   :  { %v12854_v7 = vpop.eup %12853 }
0x2259   :  { %v12856_v8 = vpop.eup %12855  ;;  %v7286_v46 = vmul.f32 %v12854_v7, %v7284_v42 }
0x225a   :  { %v7285_v25 = vmul.f32 %v12856_v8, %v7283_v3  ;;  %v11221_v8 = vld [vmem:[#allocation2 + $0x338] ss:$0 sm:$0xff] }
0x225b   :  { %v7292_v59 = vadd.f32 %v11214_v45, %v7286_v46 }
0x225c   :  { %v7291_v10 = vadd.f32 %v11214_v45, %v7285_v25 }
0x225e   :  { %12146 = vmatprep.mubr.msk.f32.mxu1 %vm251_vm3, %v7291_v10 }
0x225f   :  { %12147 = vmatmul.mubr.msk.f32.vlgmr.msra.gmra.mrb[86].mxu1 %vm251_vm3, %v7292_v59  ;;  %v11222_v59 = vld [vmem:[#allocation2 + $0x340] ss:$0 sm:$0xff] }
0x2260   :  { %12568 = vmatpush3.bf16.msra.mxu1 %v12565_v17 }
0x2261   :  { %12570 = vmatprep.subr.bf16.mxu1 %v12569_v20 }
0x2264   :  { %12572 = vmatpush3.bf16.msra.mxu1 %v12569_v20 }
0x2265   :  { %12179 = vmatprep.subr.mxu1 %v13006_v6 }
0x2332   :  { %v12148_v44 = vpop.f32.mrb[86].mxu1 }
0x2333   :  { %v7389_v47 = vadd.f32 %v12148_v44, %v11215_v51  ;;  %v7383_v52 = vpop.f32.mrb[87].mxu1  ;;  %v11223_v44 = vld [vmem:[#allocation2 + $0x368] ss:$0 sm:$0xff] }
0x2334   :  { %v7384_v53 = vadd.f32 %v11215_v51, %v7383_v52 }
0x2335   :  { %v7393_v32 = vmax.f32 %v7389_v47, 0.0 }
0x2336   :  { %v7392_v54 = vmax.f32 %v7384_v53, 0.0 }
0x2338   :  { %12165 = vmatprep.mubr.msk.f32.mxu0 %vm2008_vm5, %v7392_v54 }
0x2339   :  { %12166 = vmatmul.mubr.msk.f32.vlgmr.msra.gmra.mrb[72].mxu0 %vm2008_vm5, %v7393_v32 }
0x233a   :  { %12191 = vmatprep.mubr.msk.f32.mxu0 %vm13009_vm10, %v13006_v6 }
0x240c   :  { %v12167_v2 = vpop.f32.mrb[72].mxu0 }
0x240d   :  { %v7476_v29 = vadd.f32 %v12167_v2, %v11218_v62  ;;  %v7470_v23 = vpop.f32.mrb[73].mxu0 }
0x240e   :  { %v7471_v55 = vadd.f32 %v11218_v62, %v7470_v23 }
0x240f   :  { %v14082_v60 = vadd.f32 %v7476_v29, %v14061_v36 }
0x2410   :  { %v14085_v56 = vadd.f32 %v7471_v55, %v14064_v49 }
0x2411   :  { %v7486_v15 = vsel %vm251_vm3, %v14082_v60, 0.0 }
0x2412   :  { %7487 = vadd.xlane.f32.xlu1 %v7486_v15  ;;  %v7483_v13 = vsel %vm251_vm3, %v14085_v56, 0.0 }
0x2413   :  { %7484 = vadd.xlane.f32.xlu0 %v7483_v13 }
0x249f   :  { %v7488_v16 = vpop.xlane.xlu1 %7487 }
0x24a0   :  { %v7490_v22 = vmul.f32 0.03125, %v7488_v16  ;;  %v7485_v61 = vpop.xlane.xlu0 %7484 }
0x24a1   :  { %v7489_v58 = vmul.f32 0.03125, %v7485_v61 }
0x24a2   :  { %v7492_v57 = vsub.f32 %v14082_v60, %v7490_v22 }
0x24a3   :  { %v7491_v36 = vsub.f32 %v14085_v56, %v7489_v58 }
0x24a4   :  { %v7494_v21 = vmul.f32 %v7492_v57, %v7492_v57  ;;  %v7526_v45 = vmul.f32 %v11221_v8, %v7492_v57 }
0x24a5   :  { %v7493_v0 = vmul.f32 %v7491_v36, %v7491_v36  ;;  %v7525_v25 = vmul.f32 %v11221_v8, %v7491_v36 }
0x24a6   :  { %v7498_v49 = vsel %vm251_vm3, %v7494_v21, 0.0 }
0x24a7   :  { %7499 = vadd.xlane.f32.xlu1 %v7498_v49  ;;  %v7495_v9 = vsel %vm251_vm3, %v7493_v0, 0.0 }
0x24a8   :  { %7496 = vadd.xlane.f32.xlu0 %v7495_v9 }
0x2534   :  { %v7500_v27 = vpop.xlane.xlu1 %7499 }
0x2535   :  { %v7502_v28 = vmul.f32 0.032258064, %v7500_v27  ;;  %v7497_v30 = vpop.xlane.xlu0 %7496 }
0x2536   :  { %v7501_v4 = vmul.f32 0.032258064, %v7497_v30 }
0x2537   :  { %12857 = vrsqrt.f32 %v7502_v28  ;;  %vm7512_vm15 = vcmp.eq.f32.partialorder %v7502_v28, inf  ;;  %v7515_v38 = vand.u32 2147483648, %v7502_v28  ;;  %vm7514_vm1 = vcmp.eq.f32.partialorder %v7502_v28, 0.0 }
0x2538   :  { %12859 = vrsqrt.f32 %v7501_v4  ;;  %vm7505_vm2 = vcmp.eq.f32.partialorder %v7501_v4, inf  ;;  %v7508_v63 = vand.u32 2147483648, %v7501_v4  ;;  %vm7507_vm4 = vcmp.eq.f32.partialorder %v7501_v4, 0.0 }
0x2541   :  { %v12858_v33 = vpop.eup %12857 }
0x2542   :  { %v12860_v34 = vpop.eup %12859  ;;  %v7511_v35 = vmul.f32 %v12858_v33, %v7502_v28 }
0x2543   :  { %v7504_v11 = vmul.f32 %v12860_v34, %v7501_v4 }
0x2544   :  { %v7513_v39 = vsel %vm7512_vm15, %v7502_v28, %v7511_v35 }
0x2545   :  { %v7516_v41 = vsel %vm7514_vm1, %v7515_v38, %v7513_v39  ;;  %v7506_v1 = vsel %vm7505_vm2, %v7501_v4, %v7504_v11 }
0x2546   :  { %v7518_v42 = vadd.f32 1e-06, %v7516_v41  ;;  %v7509_v7 = vsel %vm7507_vm4, %v7508_v63, %v7506_v1 }
0x2547   :  { %v7517_v3 = vadd.f32 1e-06, %v7509_v7 }
0x2548   :  { %12861 = vrcp.f32 %v7518_v42 }
0x2549   :  { %12863 = vrcp.f32 %v7517_v3 }
0x2552   :  { %v12862_v46 = vpop.eup %12861 }
0x2553   :  { %v12864_v10 = vpop.eup %12863  ;;  %v7528_v48 = vmul.f32 %v12862_v46, %v7526_v45 }
0x2554   :  { %v7527_v26 = vmul.f32 %v12864_v10, %v7525_v25 }
0x2555   :  { %v7534_v51 = vadd.f32 %v11222_v59, %v7528_v48 }
0x2556   :  { %v7533_v50 = vadd.f32 %v11222_v59, %v7527_v26 }
0x2558   :  { %12176 = vmatprep.mubr.msk.f32.mxu1 %vm251_vm3, %v7533_v50 }
0x2559   :  { %12177 = vmatmul.mubr.msk.f32.vlgmr.msra.gmra.mrb[88].mxu1 %vm251_vm3, %v7534_v51 }
0x255a   :  { %12181 = vmatprep.mubr.msk.f32.mxu1 %vm13009_vm10, %v13006_v6 }
0x262c   :  { %v12178_v47 = vpop.f32.mrb[88].mxu1 }
0x262d   :  { %v14100_v52 = vadd.f32 %v12178_v47, %v11223_v44  ;;  %v7621_v53 = vpop.f32.mrb[89].mxu1 }
0x262e   :  { %v14102_v54 = vadd.f32 %v11223_v44, %v7621_v53 }
0x262f   :  { %7634 = vrot.lane.b32.xlu1 %v14100_v52, %s13007_s2 }
0x2630   :  { %7632 = vrot.lane.b32.xlu0 %v14102_v54, %s13007_s2 }
0x2633   :  { %7636 = vrot.lane.b32.xlu1 %v14102_v54, %s13008_s13 }
0x2634   :  { %7638 = vrot.lane.b32.xlu0 %v14100_v52, %s13008_s13 }
0x2637   :  { %7640 = vrot.lane.b32.xlu1 %v14102_v54, %s13010_s14 }
0x2638   :  { %7642 = vrot.lane.b32.xlu0 %v14100_v52, %s13010_s14 }
0x263b   :  { %7644 = vrot.lane.b32.xlu1 %v14102_v54, %s13011_s15 }
0x263c   :  { %7720 = vrot.lane.b32.xlu0 %v14100_v52, %s13011_s15 }
0x26a1   :  { %v14120_v32 = vpop.permute.xlu1 %7634 }
0x26a2   :  { %7872 = vrot.lane.b32.xlu0 %v14120_v32, %s13011_s15  ;;  %v14124_v62 = vpop.permute.xlu0 %7632 }
0x26a3   :  { %7796 = vrot.lane.b32.xlu1 %v14124_v62, %s13011_s15 }
0x26a5   :  { %v14128_v2 = vpop.permute.xlu1 %7636 }
0x26a6   :  { %v14130_v29 = vpop.permute.xlu0 %7638 }
0x26a7   :  { %7948 = vrot.lane.b32.xlu1 %v14128_v2, %s13011_s15  ;;  %8024 = vrot.lane.b32.xlu0 %v14130_v29, %s13011_s15 }
0x26a9   :  { %v14136_v23 = vpop.permute.xlu1 %7640 }
0x26aa   :  { %v14138_v55 = vpop.permute.xlu0 %7642 }
0x26ab   :  { %8100 = vrot.lane.b32.xlu1 %v14136_v23, %s13011_s15  ;;  %8176 = vrot.lane.b32.xlu0 %v14138_v55, %s13011_s15 }
0x26ad   :  { %v7645_v15 = vpop.permute.xlu1 %7644 }
0x26ae   :  { %12180 = vmatpush3.xpose.msk.msra.mxu1 %vm428_vm11, %v7645_v15  ;;  %v7721_v13 = vpop.permute.xlu0 %7720 }
0x26af   :  { %12184 = vmatprep.subr.mxu1 %v13006_v6 }
0x26b1   :  { %12182 = vmatmul.mubr.msk.f32.vlgmr.msra.gmra.mrb[90].mxu1 %vm428_vm11, %v14102_v54 }
0x26b2   :  { %12185 = vmatpush3.xpose.msk.msra.mxu1 %vm428_vm11, %v7721_v13  ;;  %12186 = vmatprep.mubr.msk.f32.mxu1 %vm13009_vm10, %v13006_v6 }
0x26b3   :  { %12194 = vmatprep.subr.mxu1 %v13006_v6 }
0x26b5   :  { %12187 = vmatmul.mubr.msk.f32.vlgmr.msra.gmra.mrb[92].mxu1 %vm428_vm11, %v14100_v52 }
0x26b6   :  { %12196 = vmatprep.mubr.msk.f32.mxu1 %vm13009_vm10, %v13006_v6 }
0x2714   :  { %v7873_v16 = vpop.permute.xlu0 %7872 }
0x2715   :  { %v7797_v22 = vpop.permute.xlu1 %7796  ;;  %12195 = vmatpush3.xpose.msk.msra.mxu1 %vm428_vm11, %v7873_v16 }
0x2716   :  { %12190 = vmatpush3.xpose.msk.msra.mxu0 %vm428_vm11, %v7797_v22  ;;  %12204 = vmatprep.subr.mxu1 %v13006_v6 }
0x2717   :  { %12199 = vmatprep.subr.mxu0 %v13006_v6 }
0x2718   :  { %12197 = vmatmul.mubr.msk.f32.vlgmr.msra.gmra.mrb[94].mxu1 %vm428_vm11, %v14120_v32 }
0x2719   :  { %12192 = vmatmul.mubr.msk.f32.vlgmr.msra.gmra.mrb[74].mxu0 %vm428_vm11, %v14124_v62  ;;  %v7949_v61 = vpop.permute.xlu1 %7948  ;;  %v8025_v58 = vpop.permute.xlu0 %8024  ;;  %12206 = vmatprep.mubr.msk.f32.mxu1 %vm13009_vm10, %v13006_v6 }
0x271a   :  { %12200 = vmatpush3.xpose.msk.msra.mxu0 %vm428_vm11, %v7949_v61  ;;  %12205 = vmatpush3.xpose.msk.msra.mxu1 %vm428_vm11, %v8025_v58 }
0x271b   :  { %12201 = vmatprep.mubr.msk.f32.mxu0 %vm13009_vm10, %v13006_v6  ;;  %12209 = vmatprep.subr.mxu0 %v13006_v6 }
0x271c   :  { %12214 = vmatprep.subr.mxu1 %v13006_v6 }
0x271d   :  { %12202 = vmatmul.mubr.msk.f32.vlgmr.msra.gmra.mrb[76].mxu0 %vm428_vm11, %v14128_v2  ;;  %v8101_v57 = vpop.permute.xlu1 %8100  ;;  %12207 = vmatmul.mubr.msk.f32.vlgmr.msra.gmra.mrb[96].mxu1 %vm428_vm11, %v14130_v29  ;;  %v8177_v36 = vpop.permute.xlu0 %8176 }
0x271e   :  { %12210 = vmatpush3.xpose.msk.msra.mxu0 %vm428_vm11, %v8101_v57  ;;  %12215 = vmatpush3.xpose.msk.msra.mxu1 %vm428_vm11, %v8177_v36 }
0x271f   :  { %12211 = vmatprep.mubr.msk.f32.mxu0 %vm13009_vm10, %v13006_v6  ;;  %12216 = vmatprep.mubr.msk.f32.mxu1 %vm13009_vm10, %v13006_v6 }
0x2720   :  { %12219 = vmatprep.subr.mxu0 %v13006_v6  ;;  %12224 = vmatprep.subr.mxu1 %v13006_v6 }
0x2721   :  { %12212 = vmatmul.mubr.msk.f32.vlgmr.msra.gmra.mrb[78].mxu0 %vm428_vm11, %v14136_v23  ;;  %12217 = vmatmul.mubr.msk.f32.vlgmr.msra.gmra.mrb[98].mxu1 %vm428_vm11, %v14138_v55 }
0x2722   :  { %12221 = vmatprep.mubr.msk.f32.mxu0 %vm13009_vm10, %v13006_v6  ;;  %12226 = vmatprep.mubr.msk.f32.mxu1 %vm13009_vm10, %v13006_v6 }
0x2784   :  { %v7716_v21 = vpop.f32.mrb[90].mxu1 }
0x2785   :  { %v7717_v0 = vadd.f32 %v7716_v21, %v13715_v18  ;;  %v12183_v49 = vpop.f32.mrb[91].mxu1 }
0x2787   :  { %v8252_v9 = vsel %vm428_vm11, %v7717_v0, -inf }
0x2788   :  { %8253 = vmax.xlane.f32.xlu1 %v8252_v9  ;;  %v7792_v12 = vpop.f32.mrb[92].mxu1 }
0x2789   :  { %v7793_v14 = vadd.f32 %v7792_v12, %v13723_v31  ;;  %v12188_v24 = vpop.f32.mrb[93].mxu1 }
0x278b   :  { %v8255_v17 = vsel %vm428_vm11, %v7793_v14, -inf }
0x278c   :  { %8256 = vmax.xlane.f32.xlu0 %v8255_v17 }
0x27eb   :  { %v7944_v19 = vpop.f32.mrb[94].mxu1 }
0x27ec   :  { %v7945_v20 = vadd.f32 %v7944_v19, %v13723_v31  ;;  %v7868_v27 = vpop.f32.mrb[74].mxu0  ;;  %v12198_v28 = vpop.f32.mrb[95].mxu1 }
0x27ed   :  { %v7869_v30 = vadd.f32 %v7868_v27, %v13715_v18  ;;  %v12193_v4 = vpop.f32.mrb[75].mxu0 }
0x27ee   :  { %v8261_v33 = vsel %vm428_vm11, %v7945_v20, -inf }
0x27ef   :  { %8262 = vmax.xlane.f32.xlu1 %v8261_v33  ;;  %v8258_v34 = vsel %vm428_vm11, %v7869_v30, -inf }
0x27f0   :  { %v8020_v35 = vpop.f32.mrb[76].mxu0  ;;  %8259 = vmax.xlane.f32.xlu0 %v8258_v34  ;;  %v8096_v38 = vpop.f32.mrb[96].mxu1 }
0x27f1   :  { %v8021_v11 = vadd.f32 %v8020_v35, %v13715_v18  ;;  %v8097_v39 = vadd.f32 %v8096_v38, %v13723_v31  ;;  %v12203_v63 = vpop.f32.mrb[77].mxu0  ;;  %v12208_v41 = vpop.f32.mrb[97].mxu1 }
0x27f3   :  { %v8264_v1 = vsel %vm428_vm11, %v8021_v11, -inf  ;;  %v8267_v42 = vsel %vm428_vm11, %v8097_v39, -inf }
0x27f4   :  { %v8172_v7 = vpop.f32.mrb[78].mxu0  ;;  %8265 = vmax.xlane.f32.xlu0 %v8264_v1  ;;  %8268 = vmax.xlane.f32.xlu1 %v8267_v42  ;;  %v8248_v3 = vpop.f32.mrb[98].mxu1 }
0x27f5   :  { %v8173_v8 = vadd.f32 %v8172_v7, %v13715_v18  ;;  %v8249_v45 = vadd.f32 %v8248_v3, %v13723_v31  ;;  %v12213_v46 = vpop.f32.mrb[79].mxu0  ;;  %v12218_v25 = vpop.f32.mrb[99].mxu1 }
0x27f7   :  { %v8270_v10 = vsel %vm428_vm11, %v8173_v8, -inf  ;;  %v8273_v59 = vsel %vm428_vm11, %v8249_v45, -inf }
0x27f8   :  { %8271 = vmax.xlane.f32.xlu0 %v8270_v10  ;;  %8274 = vmax.xlane.f32.xlu1 %v8273_v59 }
0x2809   :  { %8416 = vrot.lane.b32.xlu1 %v14100_v52, %s13012_s3 }
0x280d   :  { %8492 = vrot.lane.b32.xlu1 %v14124_v62, %s13012_s3 }
0x280e   :  { %8340 = vrot.lane.b32.xlu0 %v14102_v54, %s13012_s3 }
0x2811   :  { %8644 = vrot.lane.b32.xlu1 %v14128_v2, %s13012_s3 }
0x2812   :  { %8568 = vrot.lane.b32.xlu0 %v14120_v32, %s13012_s3 }
0x2815   :  { %v8254_v18 = vpop.xlane.xlu1 %8253 }
0x2816   :  { %8720 = vrot.lane.b32.xlu0 %v14130_v29, %s13012_s3  ;;  %v8276_v48 = vsub.f32 %v7717_v0, %v8254_v18 }
0x2818   :  { %v8284_v50 = vmul.f32 1.442695, %v8276_v48 }
0x2819   :  { %v8257_v31 = vpop.xlane.xlu0 %8256 }
0x281a   :  { %v8277_v26 = vsub.f32 %v7793_v14, %v8257_v31  ;;  %12865 = vpow2.f32 %v8284_v50 }
0x281c   :  { %v8286_v51 = vmul.f32 1.442695, %v8277_v26 }
0x281e   :  { %12867 = vpow2.f32 %v8286_v51 }
0x2824   :  { %v14220_v44 = vpop.eup %12865 }
0x2825   :  { %v8300_v52 = vsel %vm428_vm11, %v14220_v44, 0.0 }
0x2828   :  { %v14222_v47 = vpop.eup %12867 }
0x2829   :  { %v8303_v53 = vsel %vm428_vm11, %v14222_v47, 0.0 }
0x2835   :  { %8301 = vadd.xlane.f32.xlu0 %v8300_v52  ;;  %8304 = vadd.xlane.f32.xlu1 %v8303_v53 }
0x287c   :  { %v8263_v54 = vpop.xlane.xlu1 %8262 }
0x287d   :  { %v8279_v32 = vsub.f32 %v7945_v20, %v8263_v54  ;;  %v8260_v62 = vpop.xlane.xlu0 %8259 }
0x287e   :  { %v8278_v2 = vsub.f32 %v7869_v30, %v8260_v62 }
0x287f   :  { %v8290_v29 = vmul.f32 1.442695, %v8279_v32 }
0x2880   :  { %v8288_v15 = vmul.f32 1.442695, %v8278_v2 }
0x2881   :  { %12869 = vpow2.f32 %v8290_v29  ;;  %v8269_v13 = vpop.xlane.xlu1 %8268  ;;  %v8266_v16 = vpop.xlane.xlu0 %8265 }
0x2882   :  { %12871 = vpow2.f32 %v8288_v15  ;;  %v8281_v22 = vsub.f32 %v8097_v39, %v8269_v13  ;;  %v8280_v61 = vsub.f32 %v8021_v11, %v8266_v16 }
0x2884   :  { %v8294_v58 = vmul.f32 1.442695, %v8281_v22  ;;  %v8292_v57 = vmul.f32 1.442695, %v8280_v61  ;;  %v7540_v61 = vld [vmem:[#allocation2 + $0x370] sm:$0xff] }
0x2885   :  { %v8275_v36 = vpop.xlane.xlu1 %8274  ;;  %v8272_v21 = vpop.xlane.xlu0 %8271 }
0x2886   :  { %12873 = vpow2.f32 %v8294_v58  ;;  %v8283_v0 = vsub.f32 %v8249_v45, %v8275_v36  ;;  %v8282_v49 = vsub.f32 %v8173_v8, %v8272_v21  ;;  %v7541_v58 = vld [vmem:[#allocation2 + $0x378] sm:$0xff]  ;;  %v7542_v36 = vld [vmem:[#allocation2 + $0x380] sm:$0xff]  ;;  %v7543_v21 = vld [vmem:[#allocation2 + $0x388] sm:$0xff] }
0x2887   :  { %12875 = vpow2.f32 %v8292_v57  ;;  %v12573_v57 = vpack.c.bf16 %v7541_v58, %v7540_v61 }
0x2888   :  { %v8298_v9 = vmul.f32 1.442695, %v8283_v0  ;;  %v8296_v12 = vmul.f32 1.442695, %v8282_v49  ;;  %v12577_v0 = vpack.c.bf16 %v7543_v21, %v7542_v36 }
0x2889   :  { %v8417_v14 = vpop.permute.xlu1 %8416  ;;  %v8341_v24 = vpop.permute.xlu0 %8340 }
0x288a   :  { %12877 = vpow2.f32 %v8298_v9  ;;  %12220 = vmatpush3.msra.mxu0 %v8341_v24  ;;  %12225 = vmatpush3.msra.mxu1 %v8417_v14 }
0x288b   :  { %v12870_v17 = vpop.eup %12869  ;;  %12879 = vpow2.f32 %v8296_v12  ;;  %12229 = vmatprep.subr.mxu0 %v13006_v6  ;;  %12234 = vmatprep.subr.mxu1 %v13006_v6 }
0x288c   :  { %v12872_v19 = vpop.eup %12871  ;;  %v8309_v20 = vsel %vm428_vm11, %v12870_v17, 0.0 }
0x288d   :  { %8310 = vadd.xlane.f32.xlu1 %v8309_v20  ;;  %v8306_v27 = vsel %vm428_vm11, %v12872_v19, 0.0  ;;  %v8493_v39 = vpop.permute.xlu1 %8492  ;;  %v8569_v63 = vpop.permute.xlu0 %8568 }
0x288e   :  { %8307 = vadd.xlane.f32.xlu0 %v8306_v27 }
0x2890   :  { %v12874_v28 = vpop.eup %12873 }
0x2891   :  { %v12876_v30 = vpop.eup %12875  ;;  %v8315_v4 = vsel %vm428_vm11, %v12874_v28, 0.0  ;;  %v8645_v41 = vpop.permute.xlu1 %8644 }
0x2892   :  { %8316 = vadd.xlane.f32.xlu1 %v8315_v4  ;;  %v8312_v33 = vsel %vm428_vm11, %v12876_v30, 0.0  ;;  %v8721_v1 = vpop.permute.xlu0 %8720 }
0x2893   :  { %8313 = vadd.xlane.f32.xlu0 %v8312_v33 }
0x2894   :  { %v14234_v34 = vpop.eup %12877 }
0x2895   :  { %v14236_v35 = vpop.eup %12879  ;;  %v8321_v38 = vsel %vm428_vm11, %v14234_v34, 0.0 }
0x2896   :  { %8322 = vadd.xlane.f32.xlu1 %v8321_v38  ;;  %v8318_v11 = vsel %vm428_vm11, %v14236_v35, 0.0 }
0x2897   :  { %8319 = vadd.xlane.f32.xlu0 %v8318_v11 }
0x28a7   :  { %8796 = vrot.lane.b32.xlu1 %v14136_v23, %s13012_s3 }
0x28ad   :  { %8872 = vrot.lane.b32.xlu0 %v14138_v55, %s13012_s3 }
0x28c2   :  { %v8305_v42 = vpop.xlane.xlu1 %8304  ;;  %v8302_v7 = vpop.xlane.xlu0 %8301 }
0x28c3   :  { %12881 = vrcp.f32 %v8305_v42 }
0x28c4   :  { %12883 = vrcp.f32 %v8302_v7 }
0x28cd   :  { %v12882_v3 = vpop.eup %12881 }
0x28ce   :  { %v12884_v8 = vpop.eup %12883  ;;  %v8333_v45 = vmul.f32 %v12882_v3, %v14222_v47 }
0x28cf   :  { %v8332_v46 = vmul.f32 %v12884_v8, %v14220_v44  ;;  %v11250_v8 = vld [vmem:[#allocation2 + $0x390] ss:$0 sm:$0xff] }
0x28d0   :  { %12227 = vmatmul.mubr.msk.f32.vlgmr.msra.gmra.mrb[100].mxu1 %vm428_vm11, %v8333_v45 }
0x28d1   :  { %12222 = vmatmul.mubr.msk.f32.vlgmr.msra.gmra.mrb[80].mxu0 %vm428_vm11, %v8332_v46  ;;  %12235 = vmatpush3.msra.mxu1 %v8569_v63 }
0x28d2   :  { %12230 = vmatpush3.msra.mxu0 %v8493_v39  ;;  %12236 = vmatprep.mubr.msk.f32.mxu1 %vm13009_vm10, %v13006_v6 }
0x28d3   :  { %12244 = vmatprep.subr.mxu1 %v13006_v6  ;;  %12231 = vmatprep.mubr.msk.f32.mxu0 %vm13009_vm10, %v13006_v6 }
0x28d4   :  { %12239 = vmatprep.subr.mxu0 %v13006_v6 }
0x291a   :  { %v8311_v23 = vpop.xlane.xlu1 %8310 }
0x291b   :  { %12885 = vrcp.f32 %v8311_v23  ;;  %v8308_v55 = vpop.xlane.xlu0 %8307 }
0x291c   :  { %12887 = vrcp.f32 %v8308_v55 }
0x291f   :  { %v8317_v25 = vpop.xlane.xlu1 %8316 }
0x2920   :  { %12889 = vrcp.f32 %v8317_v25  ;;  %v8314_v10 = vpop.xlane.xlu0 %8313 }
0x2921   :  { %12891 = vrcp.f32 %v8314_v10 }
0x2923   :  { %v8323_v59 = vpop.xlane.xlu1 %8322 }
0x2924   :  { %12893 = vrcp.f32 %v8323_v59  ;;  %v8320_v18 = vpop.xlane.xlu0 %8319 }
0x2925   :  { %v12886_v31 = vpop.eup %12885  ;;  %12895 = vrcp.f32 %v8320_v18 }
0x2926   :  { %v12888_v48 = vpop.eup %12887  ;;  %v8335_v26 = vmul.f32 %v12886_v31, %v12870_v17 }
0x2927   :  { %v8334_v50 = vmul.f32 %v12888_v48, %v12872_v19  ;;  %v8797_v32 = vpop.permute.xlu1 %8796 }
0x2928   :  { %12237 = vmatmul.mubr.msk.f32.vlgmr.msra.gmra.mrb[102].mxu1 %vm428_vm11, %v8335_v26  ;;  %v8873_v53 = vpop.permute.xlu0 %8872 }
0x2929   :  { %12245 = vmatpush3.msra.mxu1 %v8721_v1  ;;  %12232 = vmatmul.mubr.msk.f32.vlgmr.msra.gmra.mrb[82].mxu0 %vm428_vm11, %v8334_v50 }
0x292a   :  { %v12890_v51 = vpop.eup %12889  ;;  %12240 = vmatpush3.msra.mxu0 %v8645_v41  ;;  %12241 = vmatprep.mubr.msk.f32.mxu0 %vm13009_vm10, %v13006_v6 }
0x292b   :  { %v12892_v44 = vpop.eup %12891  ;;  %v8337_v47 = vmul.f32 %v12890_v51, %v12874_v28  ;;  %12246 = vmatprep.mubr.msk.f32.mxu1 %vm13009_vm10, %v13006_v6  ;;  %12249 = vmatprep.subr.mxu0 %v13006_v6 }
0x292c   :  { %v8336_v52 = vmul.f32 %v12892_v44, %v12876_v30  ;;  %12254 = vmatprep.subr.mxu1 %v13006_v6 }
0x292d   :  { %12247 = vmatmul.mubr.msk.f32.vlgmr.msra.gmra.mrb[104].mxu1 %vm428_vm11, %v8337_v47 }
0x292e   :  { %v12894_v54 = vpop.eup %12893  ;;  %12242 = vmatmul.mubr.msk.f32.vlgmr.msra.gmra.mrb[84].mxu0 %vm428_vm11, %v8336_v52  ;;  %12255 = vmatpush3.msra.mxu1 %v8873_v53  ;;  %v9121_v52 = vld [vmem:[#allocation2 + $0x3b8] sm:$0xff]  ;;  %v9122_v53 = vld [vmem:[#allocation2 + $0x3c0] sm:$0xff] }
0x292f   :  { %v12896_v62 = vpop.eup %12895  ;;  %v8339_v2 = vmul.f32 %v12894_v54, %v14234_v34  ;;  %12250 = vmatpush3.msra.mxu0 %v8797_v32  ;;  %12251 = vmatprep.mubr.msk.f32.mxu0 %vm13009_vm10, %v13006_v6  ;;  %v12660_v54 = vpack.i.bf16 %v9122_v53, %v9121_v52  ;;  %v9119_v32 = vld [vmem:[#allocation2 + $0x3a8] sm:$0xff] }
0x2930   :  { %v8338_v29 = vmul.f32 %v12896_v62, %v14236_v35  ;;  %12256 = vmatprep.mubr.msk.f32.mxu1 %vm13009_vm10, %v13006_v6  ;;  %12574 = vmatprep.subr.bf16.mxu0 %v12573_v57  ;;  %v9120_v62 = vld [vmem:[#allocation2 + $0x3b0] sm:$0xff] }
0x2931   :  { %12257 = vmatmul.mubr.msk.f32.vlgmr.msra.gmra.mrb[106].mxu1 %vm428_vm11, %v8339_v2  ;;  %v12655_v2 = vpack.i.bf16 %v9120_v62, %v9119_v32 }
0x2932   :  { %12252 = vmatmul.mubr.msk.f32.vlgmr.msra.gmra.mrb[86].mxu0 %vm428_vm11, %v8338_v29  ;;  %v12581_v29 = vpack.c.bf16 %v9120_v62, %v9119_v32 }
0x2933   :  { %12576 = vmatpush3.bf16.msra.mxu0 %v12573_v57 }
0x2934   :  { %12578 = vmatprep.subr.bf16.mxu0 %v12577_v0  ;;  %12582 = vmatprep.subr.bf16.mxu1 %v12581_v29 }
0x2935   :  { %12584 = vmatpush3.bf16.msra.mxu1 %v12581_v29 }
0x2937   :  { %12580 = vmatpush3.bf16.msra.mxu0 %v12577_v0 }
0x29a3   :  { %v8488_v15 = vpop.f32.mrb[100].mxu1 }
0x29a4   :  { %v8412_v13 = vpop.f32.mrb[80].mxu0  ;;  %v12228_v16 = vpop.f32.mrb[101].mxu1 }
0x29a5   :  { %v12223_v22 = vpop.f32.mrb[81].mxu0 }
0x29fb   :  { %v8640_v49 = vpop.f32.mrb[102].mxu1 }
0x29fc   :  { %8952 = vrot.lane.b32.xlu0 %v8640_v49, %s13004_s29  ;;  %v8564_v9 = vpop.f32.mrb[82].mxu0  ;;  %v12238_v12 = vpop.f32.mrb[103].mxu1 }
0x29fd   :  { %8950 = vrot.lane.b32.xlu1 %v8564_v9, %s13004_s29  ;;  %v12233_v14 = vpop.f32.mrb[83].mxu0 }
0x2a00   :  { %v8792_v24 = vpop.f32.mrb[104].mxu1 }
0x2a01   :  { %v8716_v17 = vpop.f32.mrb[84].mxu0  ;;  %8960 = vrot.lane.b32.xlu0 %v8792_v24, %s13013_s20  ;;  %v12248_v19 = vpop.f32.mrb[105].mxu1 }
0x2a02   :  { %8958 = vrot.lane.b32.xlu1 %v8716_v17, %s13013_s20  ;;  %v12243_v20 = vpop.f32.mrb[85].mxu0 }
0x2a04   :  { %v8944_v27 = vpop.f32.mrb[106].mxu1 }
0x2a05   :  { %v8868_v28 = vpop.f32.mrb[86].mxu0  ;;  %8968 = vrot.lane.b32.xlu0 %v8944_v27, %s13014_s21  ;;  %v12258_v30 = vpop.f32.mrb[107].mxu1 }
0x2a06   :  { %8966 = vrot.lane.b32.xlu1 %v8868_v28, %s13014_s21  ;;  %v12253_v4 = vpop.f32.mrb[87].mxu0 }
0x2a6e   :  { %v8953_v33 = vpop.permute.xlu0 %8952 }
0x2a6f   :  { %v8951_v34 = vpop.permute.xlu1 %8950  ;;  %v8973_v11 = vsel %vm428_vm11, %v8488_v15, %v8953_v33  ;;  %v12585_v15 = vpack.c.bf16 %v9122_v53, %v9121_v52 }
0x2a70   :  { %v8972_v39 = vsel %vm428_vm11, %v8412_v13, %v8951_v34  ;;  %v14315_v13 = vld [vmem:[#allocation2 + $0x3c8] ss:$0 sm:$0xff] }
0x2a71   :  { %12586 = vmatprep.subr.bf16.mxu1 %v12585_v15 }
0x2a72   :  { %12588 = vmatpush3.bf16.msra.mxu1 %v12585_v15 }
0x2a73   :  { %v8961_v35 = vpop.permute.xlu0 %8960  ;;  %12292 = vmatprep.subr.mxu1 %v13006_v6 }
0x2a74   :  { %v8959_v38 = vpop.permute.xlu1 %8958  ;;  %v8975_v63 = vsel %vm65_vm0, %v8973_v11, %v8961_v35  ;;  %v11253_v11 = vld [vmem:[#allocation2 + $0x398] ss:$0 sm:$0xff] }
0x2a75   :  { %v8974_v1 = vsel %vm65_vm0, %v8972_v39, %v8959_v38 }
0x2a77   :  { %v8969_v41 = vpop.permute.xlu0 %8968 }
0x2a78   :  { %v8967_v42 = vpop.permute.xlu1 %8966  ;;  %v8977_v7 = vsel %vm1759_vm14, %v8975_v63, %v8969_v41 }
0x2a79   :  { %v8976_v3 = vsel %vm1759_vm14, %v8974_v1, %v8967_v42  ;;  %v11254_v42 = vld [vmem:[#allocation2 + $0x3a0] ss:$0 sm:$0xff] }
0x2a7a   :  { %12267 = vmatprep.mubr.msk.f32.mxu0 %vm251_vm3, %v8976_v3 }
0x2a7b   :  { %12268 = vmatmul.mubr.msk.f32.vlgmr.msra.gmra.mrb[88].mxu0 %vm251_vm3, %v8977_v7 }
0x2a7c   :  { %12289 = vmatprep.mubr.msk.f32.mxu0 %vm251_vm3, %v13842_v43 }
0x2b4e   :  { %v12269_v45 = vpop.f32.mrb[88].mxu0 }
0x2b4f   :  { %v9060_v46 = vadd.f32 %v12269_v45, %v11250_v8  ;;  %v9054_v23 = vpop.f32.mrb[89].mxu0 }
0x2b50   :  { %v9055_v55 = vadd.f32 %v11250_v8, %v9054_v23 }
0x2b51   :  { %v14291_v25 = vadd.f32 %v9060_v46, %v14082_v60 }
0x2b52   :  { %v14294_v10 = vadd.f32 %v9055_v55, %v14085_v56 }
0x2b53   :  { %v9070_v59 = vsel %vm251_vm3, %v14291_v25, 0.0 }
0x2b54   :  { %9071 = vadd.xlane.f32.xlu0 %v9070_v59  ;;  %v9067_v18 = vsel %vm251_vm3, %v14294_v10, 0.0 }
0x2b55   :  { %9068 = vadd.xlane.f32.xlu1 %v9067_v18 }
0x2be1   :  { %v9072_v43 = vpop.xlane.xlu0 %9071 }
0x2be2   :  { %v9074_v31 = vmul.f32 0.03125, %v9072_v43  ;;  %v9069_v48 = vpop.xlane.xlu1 %9068 }
0x2be3   :  { %v9073_v26 = vmul.f32 0.03125, %v9069_v48 }
0x2be4   :  { %v14301_v50 = vsub.f32 %v14291_v25, %v9074_v31 }
0x2be5   :  { %v14304_v60 = vsub.f32 %v14294_v10, %v9073_v26 }
0x2be6   :  { %v9078_v56 = vmul.f32 %v14301_v50, %v14301_v50  ;;  %v9110_v39 = vmul.f32 %v11253_v11, %v14301_v50 }
0x2be7   :  { %v9077_v51 = vmul.f32 %v14304_v60, %v14304_v60  ;;  %v9109_v41 = vmul.f32 %v11253_v11, %v14304_v60 }
0x2be8   :  { %v9082_v44 = vsel %vm251_vm3, %v9078_v56, 0.0 }
0x2be9   :  { %9083 = vadd.xlane.f32.xlu1 %v9082_v44  ;;  %v9079_v47 = vsel %vm251_vm3, %v9077_v51, 0.0 }
0x2bea   :  { %9080 = vadd.xlane.f32.xlu0 %v9079_v47 }
0x2bfa   :  { %12661 = vrot.lane.b32.xlu1 %v12660_v54, %s13011_s15 }
0x2bfe   :  { %9231 = vrot.lane.b32.xlu1 %v14315_v13, %s13011_s15 }
0x2c00   :  { %12656 = vrot.lane.b32.xlu0 %v12655_v2, %s13011_s15 }
0x2c76   :  { %v9084_v16 = vpop.xlane.xlu1 %9083 }
0x2c77   :  { %v9086_v22 = vmul.f32 0.032258064, %v9084_v16  ;;  %v9081_v61 = vpop.xlane.xlu0 %9080 }
0x2c78   :  { %v9085_v58 = vmul.f32 0.032258064, %v9081_v61 }
0x2c79   :  { %12897 = vrsqrt.f32 %v9086_v22  ;;  %vm9096_vm6 = vcmp.eq.f32.partialorder %v9086_v22, inf  ;;  %v9099_v20 = vand.u32 2147483648, %v9086_v22  ;;  %vm9098_vm7 = vcmp.eq.f32.partialorder %v9086_v22, 0.0 }
0x2c7a   :  { %12899 = vrsqrt.f32 %v9085_v58  ;;  %v12662_v57 = vpop.permute.xlu1 %12661  ;;  %vm9089_vm8 = vcmp.eq.f32.partialorder %v9085_v58, inf  ;;  %v9092_v30 = vand.u32 2147483648, %v9085_v58  ;;  %vm9091_vm9 = vcmp.eq.f32.partialorder %v9085_v58, 0.0 }
0x2c7b   :  { %v12657_v36 = vpop.permute.xlu0 %12656  ;;  %v12664_v21 = vunpack.i.h.bf16 %v12662_v57  ;;  %v12663_v0 = vunpack.i.l.bf16 %v12662_v57 }
0x2c7c   :  { %v12659_v49 = vunpack.i.h.bf16 %v12657_v36  ;;  %v12658_v9 = vunpack.i.l.bf16 %v12657_v36 }
0x2c7d   :  { %v12593_v14 = vpack.c.bf16 %v12664_v21, %v12663_v0 }
0x2c7e   :  { %v12589_v12 = vpack.c.bf16 %v12659_v49, %v12658_v9 }
0x2c80   :  { %12590 = vmatprep.subr.bf16.mxu0 %v12589_v12 }
0x2c81   :  { %12592 = vmatpush3.bf16.msra.mxu0 %v12589_v12 }
0x2c82   :  { %12594 = vmatprep.subr.bf16.mxu0 %v12593_v14 }
0x2c83   :  { %v12898_v24 = vpop.eup %12897 }
0x2c84   :  { %v12900_v17 = vpop.eup %12899  ;;  %v9095_v19 = vmul.f32 %v12898_v24, %v9086_v22 }
0x2c85   :  { %v9088_v27 = vmul.f32 %v12900_v17, %v9085_v58  ;;  %12596 = vmatpush3.bf16.msra.mxu0 %v12593_v14 }
0x2c86   :  { %v9097_v28 = vsel %vm9096_vm6, %v9086_v22, %v9095_v19  ;;  %12302 = vmatprep.subr.mxu0 %v13006_v6 }
0x2c87   :  { %v9100_v4 = vsel %vm9098_vm7, %v9099_v20, %v9097_v28  ;;  %v9090_v33 = vsel %vm9089_vm8, %v9085_v58, %v9088_v27 }
0x2c88   :  { %v9102_v34 = vadd.f32 1e-06, %v9100_v4  ;;  %v9093_v35 = vsel %vm9091_vm9, %v9092_v30, %v9090_v33  ;;  %12290 = vmatmul.mubr.msk.f32.vlgmr.msra.gmra.mrb[90].mxu0 %vm251_vm3, %v13867_v5  ;;  %v9232_v5 = vpop.permute.xlu1 %9231 }
0x2c89   :  { %v9101_v38 = vadd.f32 1e-06, %v9093_v35  ;;  %12304 = vmatprep.mubr.msk.f32.mxu0 %vm13009_vm10, %v13006_v6 }
0x2c8a   :  { %12901 = vrcp.f32 %v9102_v34 }
0x2c8b   :  { %12903 = vrcp.f32 %v9101_v38 }
0x2c94   :  { %v12902_v63 = vpop.eup %12901 }
0x2c95   :  { %v12904_v1 = vpop.eup %12903  ;;  %v9112_v7 = vmul.f32 %v12902_v63, %v9110_v39 }
0x2c96   :  { %v9111_v3 = vmul.f32 %v12904_v1, %v9109_v41 }
0x2c97   :  { %v9118_v45 = vadd.f32 %v11254_v42, %v9112_v7 }
0x2c98   :  { %v9117_v8 = vadd.f32 %v11254_v42, %v9111_v3 }
0x2c9a   :  { %12278 = vmatprep.mubr.msk.f32.mxu1 %vm251_vm3, %v9117_v8 }
0x2c9b   :  { %12279 = vmatmul.mubr.msk.f32.vlgmr.msra.gmra.mrb[108].mxu1 %vm251_vm3, %v9118_v45 }
0x2c9c   :  { %12294 = vmatprep.mubr.msk.f32.mxu1 %vm13009_vm10, %v13006_v6 }
0x2d5b   :  { %v12291_v46 = vpop.f32.mrb[90].mxu0 }
0x2d5c   :  { %v14330_v23 = vadd.f32 %v12291_v46, %v9232_v5  ;;  %v9300_v55 = vpop.f32.mrb[91].mxu0 }
0x2d5d   :  { %v14332_v59 = vadd.f32 %v9300_v55, %v9232_v5 }
0x2d5e   :  { %9327 = vrot.lane.b32.xlu1 %v14330_v23, %s13007_s2 }
0x2d5f   :  { %9325 = vrot.lane.b32.xlu0 %v14332_v59, %s13007_s2  ;;  %12293 = vmatpush3.xpose.msk.msra.mxu1 %vm428_vm11, %v14332_v59 }
0x2d60   :  { %12297 = vmatprep.subr.mxu1 %v13006_v6 }
0x2d62   :  { %9331 = vrot.lane.b32.xlu1 %v14330_v23, %s13008_s13 }
0x2d63   :  { %9329 = vrot.lane.b32.xlu0 %v14332_v59, %s13008_s13 }
0x2d66   :  { %9335 = vrot.lane.b32.xlu1 %v14330_v23, %s13010_s14 }
0x2d67   :  { %9333 = vrot.lane.b32.xlu0 %v14332_v59, %s13010_s14 }
0x2d6e   :  { %v12280_v18 = vpop.f32.mrb[108].mxu1 }
0x2d6f   :  { %v9211_v43 = vadd.f32 %v12280_v18, %v14315_v13  ;;  %v9205_v31 = vpop.f32.mrb[109].mxu1 }
0x2d70   :  { %v9206_v48 = vadd.f32 %v14315_v13, %v9205_v31 }
0x2d71   :  { %9313 = vrot.lane.b32.xlu1 %v9211_v43, %s13007_s2 }
0x2d72   :  { %9311 = vrot.lane.b32.xlu0 %v9206_v48, %s13007_s2  ;;  %12295 = vmatmul.mubr.msk.f32.vlgmr.msra.gmra.mrb[110].mxu1 %vm428_vm11, %v9206_v48 }
0x2d73   :  { %12298 = vmatpush3.xpose.msk.msra.mxu1 %vm428_vm11, %v14330_v23  ;;  %12299 = vmatprep.mubr.msk.f32.mxu1 %vm13009_vm10, %v13006_v6 }
0x2d74   :  { %12307 = vmatprep.subr.mxu1 %v13006_v6 }
0x2d75   :  { %9317 = vrot.lane.b32.xlu1 %v9211_v43, %s13008_s13 }
0x2d76   :  { %9315 = vrot.lane.b32.xlu0 %v9206_v48, %s13008_s13  ;;  %12300 = vmatmul.mubr.msk.f32.vlgmr.msra.gmra.mrb[112].mxu1 %vm428_vm11, %v9211_v43 }
0x2d77   :  { %12309 = vmatprep.mubr.msk.f32.mxu1 %vm13009_vm10, %v13006_v6 }
0x2d79   :  { %9321 = vrot.lane.b32.xlu1 %v9211_v43, %s13010_s14 }
0x2d7a   :  { %9319 = vrot.lane.b32.xlu0 %v9206_v48, %s13010_s14 }
0x2dd0   :  { %v14366_v26 = vpop.permute.xlu1 %9327 }
0x2dd1   :  { %v14368_v50 = vpop.permute.xlu0 %9325  ;;  %12308 = vmatpush3.xpose.msk.msra.mxu1 %vm428_vm11, %v14366_v26 }
0x2dd2   :  { %12303 = vmatpush3.xpose.msk.msra.mxu0 %vm428_vm11, %v14368_v50  ;;  %12317 = vmatprep.subr.mxu1 %v13006_v6 }
0x2dd3   :  { %12312 = vmatprep.subr.mxu0 %v13006_v6 }
0x2dd4   :  { %v14376_v60 = vpop.permute.xlu1 %9331 }
0x2dd5   :  { %v14378_v56 = vpop.permute.xlu0 %9329 }
0x2dd8   :  { %v14380_v51 = vpop.permute.xlu1 %9335 }
0x2dd9   :  { %v14382_v44 = vpop.permute.xlu0 %9333 }
0x2de3   :  { %v9314_v47 = vpop.permute.xlu1 %9313 }
0x2de4   :  { %v9312_v52 = vpop.permute.xlu0 %9311  ;;  %12310 = vmatmul.mubr.msk.f32.vlgmr.msra.gmra.mrb[114].mxu1 %vm428_vm11, %v9314_v47 }
0x2de5   :  { %12318 = vmatpush3.xpose.msk.msra.mxu1 %vm428_vm11, %v14376_v60  ;;  %12305 = vmatmul.mubr.msk.f32.vlgmr.msra.gmra.mrb[92].mxu0 %vm428_vm11, %v9312_v52 }
0x2de6   :  { %12313 = vmatpush3.xpose.msk.msra.mxu0 %vm428_vm11, %v14378_v56  ;;  %12319 = vmatprep.mubr.msk.f32.mxu1 %vm13009_vm10, %v13006_v6 }
0x2de7   :  { %v9318_v53 = vpop.permute.xlu1 %9317  ;;  %12327 = vmatprep.subr.mxu1 %v13006_v6  ;;  %12314 = vmatprep.mubr.msk.f32.mxu0 %vm13009_vm10, %v13006_v6 }
0x2de8   :  { %12322 = vmatprep.subr.mxu0 %v13006_v6  ;;  %v9316_v54 = vpop.permute.xlu0 %9315  ;;  %12320 = vmatmul.mubr.msk.f32.vlgmr.msra.gmra.mrb[116].mxu1 %vm428_vm11, %v9318_v53 }
0x2de9   :  { %12328 = vmatpush3.xpose.msk.msra.mxu1 %vm428_vm11, %v14380_v51  ;;  %12315 = vmatmul.mubr.msk.f32.vlgmr.msra.gmra.mrb[94].mxu0 %vm428_vm11, %v9316_v54 }
0x2dea   :  { %12323 = vmatpush3.xpose.msk.msra.mxu0 %vm428_vm11, %v14382_v44  ;;  %12329 = vmatprep.mubr.msk.f32.mxu1 %vm13009_vm10, %v13006_v6 }
0x2deb   :  { %v9322_v32 = vpop.permute.xlu1 %9321  ;;  %12324 = vmatprep.mubr.msk.f32.mxu0 %vm13009_vm10, %v13006_v6  ;;  %12332 = vmatprep.subr.mxu0 %v13006_v6 }
0x2dec   :  { %v9320_v62 = vpop.permute.xlu0 %9319  ;;  %12330 = vmatmul.mubr.msk.f32.vlgmr.msra.gmra.mrb[118].mxu1 %vm428_vm11, %v9322_v32  ;;  %12337 = vmatprep.subr.mxu1 %v13006_v6 }
0x2ded   :  { %12325 = vmatmul.mubr.msk.f32.vlgmr.msra.gmra.mrb[96].mxu0 %vm428_vm11, %v9320_v62  ;;  %12339 = vmatprep.mubr.msk.f32.mxu1 %vm13009_vm10, %v13006_v6 }
0x2dee   :  { %12334 = vmatprep.mubr.msk.f32.mxu0 %vm13009_vm10, %v13006_v6 }
0x2e45   :  { %v9407_v2 = vpop.f32.mrb[110].mxu1 }
0x2e46   :  { %v9408_v29 = vadd.f32 %v9407_v2, %v13222_v37  ;;  %v12296_v15 = vpop.f32.mrb[111].mxu1 }
0x2e48   :  { %v9929_v13 = vsel %vm428_vm11, %v9408_v29, -inf }
0x2e49   :  { %9930 = vmax.xlane.f32.xlu0 %v9929_v13  ;;  %v9481_v16 = vpop.f32.mrb[112].mxu1 }
0x2e4a   :  { %v9482_v22 = vadd.f32 %v9481_v16, %v13225_v40  ;;  %v12301_v61 = vpop.f32.mrb[113].mxu1 }
0x2e4c   :  { %v9932_v58 = vsel %vm428_vm11, %v9482_v22, -inf }
0x2e4d   :  { %9933 = vmax.xlane.f32.xlu1 %v9932_v58 }
0x2eb7   :  { %v9629_v57 = vpop.f32.mrb[114].mxu1 }
0x2eb8   :  { %v9555_v36 = vpop.f32.mrb[92].mxu0  ;;  %v12311_v21 = vpop.f32.mrb[115].mxu1  ;;  %v9630_v9 = vadd.f32 %v9629_v57, %v13225_v40 }
0x2eb9   :  { %v9556_v0 = vadd.f32 %v9555_v36, %v13222_v37  ;;  %v12306_v49 = vpop.f32.mrb[93].mxu0 }
0x2eba   :  { %v9938_v4 = vsel %vm428_vm11, %v9630_v9, -inf }
0x2ebb   :  { %v9777_v12 = vpop.f32.mrb[116].mxu1  ;;  %v9935_v14 = vsel %vm428_vm11, %v9556_v0, -inf }
0x2ebc   :  { %v9703_v24 = vpop.f32.mrb[94].mxu0  ;;  %9936 = vmax.xlane.f32.xlu0 %v9935_v14  ;;  %v12321_v17 = vpop.f32.mrb[117].mxu1  ;;  %v9778_v27 = vadd.f32 %v9777_v12, %v13225_v40 }
0x2ebd   :  { %v9704_v19 = vadd.f32 %v9703_v24, %v13222_v37  ;;  %v12316_v20 = vpop.f32.mrb[95].mxu0 }
0x2ebe   :  { %v9944_v63 = vsel %vm428_vm11, %v9778_v27, -inf }
0x2ebf   :  { %v9925_v28 = vpop.f32.mrb[118].mxu1  ;;  %v9941_v30 = vsel %vm428_vm11, %v9704_v19, -inf }
0x2ec0   :  { %v9851_v33 = vpop.f32.mrb[96].mxu0  ;;  %9942 = vmax.xlane.f32.xlu1 %v9941_v30  ;;  %9939 = vmax.xlane.f32.xlu0 %v9938_v4  ;;  %v12331_v34 = vpop.f32.mrb[119].mxu1  ;;  %v9926_v11 = vadd.f32 %v9925_v28, %v13225_v40 }
0x2ec1   :  { %v9852_v35 = vadd.f32 %v9851_v33, %v13222_v37  ;;  %v12326_v38 = vpop.f32.mrb[97].mxu0 }
0x2ec2   :  { %v9950_v41 = vsel %vm428_vm11, %v9926_v11, -inf }
0x2ec3   :  { %v9947_v39 = vsel %vm428_vm11, %v9852_v35, -inf }
0x2ec4   :  { %9948 = vmax.xlane.f32.xlu1 %v9947_v39  ;;  %9945 = vmax.xlane.f32.xlu0 %v9944_v63 }
0x2ec8   :  { %9951 = vmax.xlane.f32.xlu0 %v9950_v41 }
0x2ed5   :  { %10017 = vrot.lane.b32.xlu1 %v14332_v59, %s13011_s15 }
0x2ed6   :  { %v9931_v1 = vpop.xlane.xlu0 %9930 }
0x2ed7   :  { %v9953_v42 = vsub.f32 %v9408_v29, %v9931_v1 }
0x2ed9   :  { %10169 = vrot.lane.b32.xlu1 %v14368_v50, %s13011_s15  ;;  %v9961_v3 = vmul.f32 1.442695, %v9953_v42 }
0x2eda   :  { %v9934_v37 = vpop.xlane.xlu1 %9933 }
0x2edb   :  { %v9954_v40 = vsub.f32 %v9482_v22, %v9934_v37 }
0x2edd   :  { %10245 = vrot.lane.b32.xlu1 %v14366_v26, %s13011_s15  ;;  %v9963_v7 = vmul.f32 1.442695, %v9954_v40 }
0x2ede   :  { %10093 = vrot.lane.b32.xlu0 %v14330_v23, %s13011_s15 }
0x2edf   :  { %12905 = vpow2.f32 %v9963_v7 }
0x2ee0   :  { %12907 = vpow2.f32 %v9961_v3 }
0x2ee1   :  { %10397 = vrot.lane.b32.xlu1 %v14376_v60, %s13011_s15 }
0x2ee2   :  { %10321 = vrot.lane.b32.xlu0 %v14378_v56, %s13011_s15 }
0x2ee9   :  { %v14442_v8 = vpop.eup %12905 }
0x2eea   :  { %v9980_v45 = vsel %vm428_vm11, %v14442_v8, 0.0  ;;  %v14446_v5 = vpop.eup %12907 }
0x2eeb   :  { %v9977_v46 = vsel %vm428_vm11, %v14446_v5, 0.0 }
0x2f01   :  { %9981 = vadd.xlane.f32.xlu0 %v9980_v45 }
0x2f05   :  { %9978 = vadd.xlane.f32.xlu1 %v9977_v46 }
0x2f49   :  { %v9937_v23 = vpop.xlane.xlu0 %9936 }
0x2f4a   :  { %v9955_v55 = vsub.f32 %v9556_v0, %v9937_v23 }
0x2f4c   :  { %v9965_v59 = vmul.f32 1.442695, %v9955_v55 }
0x2f4d   :  { %v9943_v18 = vpop.xlane.xlu1 %9942  ;;  %v9940_v43 = vpop.xlane.xlu0 %9939 }
0x2f4e   :  { %12909 = vpow2.f32 %v9965_v59  ;;  %v9957_v31 = vsub.f32 %v9704_v19, %v9943_v18  ;;  %v9956_v48 = vsub.f32 %v9630_v9, %v9940_v43 }
0x2f50   :  { %v9969_v26 = vmul.f32 1.442695, %v9957_v31  ;;  %v9967_v50 = vmul.f32 1.442695, %v9956_v48  ;;  %v9124_v31 = vld [vmem:[#allocation2 + $0x3d0] sm:$0xff]  ;;  %v9125_v48 = vld [vmem:[#allocation2 + $0x3d8] sm:$0xff] }
0x2f51   :  { %v9949_v60 = vpop.xlane.xlu1 %9948  ;;  %v9946_v56 = vpop.xlane.xlu0 %9945 }
0x2f52   :  { %12911 = vpow2.f32 %v9969_v26  ;;  %v9959_v47 = vsub.f32 %v9852_v35, %v9949_v60  ;;  %v9958_v52 = vsub.f32 %v9778_v27, %v9946_v56  ;;  %v12597_v26 = vpack.c.bf16 %v9125_v48, %v9124_v31  ;;  %v9127_v60 = vld [vmem:[#allocation2 + $0x3e8] sm:$0xff] }
0x2f53   :  { %12913 = vpow2.f32 %v9967_v50  ;;  %v9126_v50 = vld [vmem:[#allocation2 + $0x3e0] sm:$0xff] }
0x2f54   :  { %v9973_v53 = vmul.f32 1.442695, %v9959_v47  ;;  %v9971_v54 = vmul.f32 1.442695, %v9958_v52  ;;  %v12601_v56 = vpack.c.bf16 %v9127_v60, %v9126_v50 }
0x2f55   :  { %v10018_v32 = vpop.permute.xlu1 %10017  ;;  %v9952_v62 = vpop.xlane.xlu0 %9951 }
0x2f56   :  { %12915 = vpow2.f32 %v9973_v53  ;;  %v9960_v2 = vsub.f32 %v9926_v11, %v9952_v62  ;;  %12333 = vmatpush3.msra.mxu0 %v10018_v32 }
0x2f57   :  { %12917 = vpow2.f32 %v9971_v54  ;;  %12342 = vmatprep.subr.mxu0 %v13006_v6 }
0x2f58   :  { %v12910_v29 = vpop.eup %12909  ;;  %v9975_v15 = vmul.f32 1.442695, %v9960_v2 }
0x2f59   :  { %v10094_v13 = vpop.permute.xlu0 %10093  ;;  %v9983_v16 = vsel %vm428_vm11, %v12910_v29, 0.0  ;;  %v10170_v14 = vpop.permute.xlu1 %10169 }
0x2f5a   :  { %12919 = vpow2.f32 %v9975_v15  ;;  %9984 = vadd.xlane.f32.xlu1 %v9983_v16  ;;  %12338 = vmatpush3.msra.mxu1 %v10094_v13 }
0x2f5b   :  { %12347 = vmatprep.subr.mxu1 %v13006_v6 }
0x2f5c   :  { %v12912_v22 = vpop.eup %12911 }
0x2f5d   :  { %v12914_v61 = vpop.eup %12913  ;;  %v9989_v58 = vsel %vm428_vm11, %v12912_v22, 0.0  ;;  %v10246_v24 = vpop.permute.xlu1 %10245 }
0x2f5e   :  { %9990 = vadd.xlane.f32.xlu1 %v9989_v58  ;;  %v9986_v57 = vsel %vm428_vm11, %v12914_v61, 0.0  ;;  %v10322_v17 = vpop.permute.xlu0 %10321 }
0x2f5f   :  { %9987 = vadd.xlane.f32.xlu0 %v9986_v57 }
0x2f60   :  { %v12916_v36 = vpop.eup %12915 }
0x2f61   :  { %v12918_v21 = vpop.eup %12917  ;;  %v9995_v0 = vsel %vm428_vm11, %v12916_v36, 0.0  ;;  %v10398_v19 = vpop.permute.xlu1 %10397 }
0x2f62   :  { %9996 = vadd.xlane.f32.xlu1 %v9995_v0  ;;  %v9992_v49 = vsel %vm428_vm11, %v12918_v21, 0.0 }
0x2f63   :  { %9993 = vadd.xlane.f32.xlu0 %v9992_v49 }
0x2f64   :  { %v14457_v9 = vpop.eup %12919 }
0x2f65   :  { %v9998_v12 = vsel %vm428_vm11, %v14457_v9, 0.0 }
0x2f67   :  { %9999 = vadd.xlane.f32.xlu0 %v9998_v12 }
0x2f73   :  { %10549 = vrot.lane.b32.xlu1 %v14380_v51, %s13011_s15 }
0x2f7d   :  { %10473 = vrot.lane.b32.xlu0 %v14382_v44, %s13011_s15 }
0x2f8e   :  { %v9982_v20 = vpop.xlane.xlu0 %9981 }
0x2f8f   :  { %12921 = vrcp.f32 %v9982_v20 }
0x2f92   :  { %v9979_v27 = vpop.xlane.xlu1 %9978 }
0x2f93   :  { %12923 = vrcp.f32 %v9979_v27 }
0x2f99   :  { %v12922_v28 = vpop.eup %12921 }
0x2f9a   :  { %v10010_v30 = vmul.f32 %v12922_v28, %v14442_v8 }
0x2f9c   :  { %12340 = vmatmul.mubr.msk.f32.vlgmr.msra.gmra.mrb[120].mxu1 %vm428_vm11, %v10010_v30 }
0x2f9d   :  { %v12924_v4 = vpop.eup %12923  ;;  %12348 = vmatpush3.msra.mxu1 %v10246_v24  ;;  %12349 = vmatprep.mubr.msk.f32.mxu1 %vm13009_vm10, %v13006_v6 }
0x2f9e   :  { %v10009_v51 = vmul.f32 %v12924_v4, %v14446_v5  ;;  %12357 = vmatprep.subr.mxu1 %v13006_v6 }
0x2fa0   :  { %12335 = vmatmul.mubr.msk.f32.vlgmr.msra.gmra.mrb[98].mxu0 %vm428_vm11, %v10009_v51 }
0x2fa1   :  { %12343 = vmatpush3.msra.mxu0 %v10170_v14  ;;  %12344 = vmatprep.mubr.msk.f32.mxu0 %vm13009_vm10, %v13006_v6 }
0x2fa2   :  { %12352 = vmatprep.subr.mxu0 %v13006_v6 }
0x2fe7   :  { %v9985_v44 = vpop.xlane.xlu1 %9984 }
0x2fe8   :  { %12925 = vrcp.f32 %v9985_v44 }
0x2feb   :  { %v9991_v33 = vpop.xlane.xlu1 %9990 }
0x2fec   :  { %12927 = vrcp.f32 %v9991_v33  ;;  %v9988_v34 = vpop.xlane.xlu0 %9987 }
0x2fed   :  { %12929 = vrcp.f32 %v9988_v34 }
0x2fef   :  { %v9997_v35 = vpop.xlane.xlu1 %9996 }
0x2ff0   :  { %12931 = vrcp.f32 %v9997_v35  ;;  %v9994_v38 = vpop.xlane.xlu0 %9993 }
0x2ff1   :  { %12933 = vrcp.f32 %v9994_v38 }
0x2ff2   :  { %v12926_v11 = vpop.eup %12925 }
0x2ff3   :  { %v10011_v39 = vmul.f32 %v12926_v11, %v12910_v29  ;;  %v10550_v5 = vpop.permute.xlu1 %10549 }
0x2ff4   :  { %v10000_v63 = vpop.xlane.xlu0 %9999 }
0x2ff5   :  { %12935 = vrcp.f32 %v10000_v63  ;;  %12345 = vmatmul.mubr.msk.f32.vlgmr.msra.gmra.mrb[100].mxu0 %vm428_vm11, %v10011_v39 }
0x2ff6   :  { %v12928_v41 = vpop.eup %12927  ;;  %12353 = vmatpush3.msra.mxu0 %v10322_v17  ;;  %12354 = vmatprep.mubr.msk.f32.mxu0 %vm13009_vm10, %v13006_v6  ;;  %v11284_v17 = vld [vmem:[#allocation2 + $0x3f0] ss:$0 sm:$0xff] }
0x2ff7   :  { %v12930_v37 = vpop.eup %12929  ;;  %v10013_v40 = vmul.f32 %v12928_v41, %v12912_v22  ;;  %12362 = vmatprep.subr.mxu0 %v13006_v6 }
0x2ff8   :  { %v10012_v1 = vmul.f32 %v12930_v37, %v12914_v61  ;;  %v10474_v42 = vpop.permute.xlu0 %10473  ;;  %v10796_v37 = vld [vmem:[#allocation2 + $0x408] sm:$0xff] }
0x2ff9   :  { %12355 = vmatmul.mubr.msk.f32.vlgmr.msra.gmra.mrb[102].mxu0 %vm428_vm11, %v10013_v40  ;;  %v10797_v40 = vld [vmem:[#allocation2 + $0x410] sm:$0xff] }
0x2ffa   :  { %v12932_v7 = vpop.eup %12931  ;;  %12350 = vmatmul.mubr.msk.f32.vlgmr.msra.gmra.mrb[122].mxu1 %vm428_vm11, %v10012_v1  ;;  %12363 = vmatpush3.msra.mxu0 %v10474_v42  ;;  %v10798_v1 = vld [vmem:[#allocation2 + $0x418] sm:$0xff]  ;;  %v12605_v42 = vpack.c.bf16 %v10797_v40, %v10796_v37 }
0x2ffb   :  { %v12934_v3 = vpop.eup %12933  ;;  %v10015_v8 = vmul.f32 %v12932_v7, %v12916_v36  ;;  %12358 = vmatpush3.msra.mxu1 %v10398_v19  ;;  %12359 = vmatprep.mubr.msk.f32.mxu1 %vm13009_vm10, %v13006_v6  ;;  %v10799_v7 = vld [vmem:[#allocation2 + $0x420] sm:$0xff] }
0x2ffc   :  { %v10014_v45 = vmul.f32 %v12934_v3, %v12918_v21  ;;  %12364 = vmatprep.mubr.msk.f32.mxu0 %vm13009_vm10, %v13006_v6  ;;  %12367 = vmatprep.subr.mxu1 %v13006_v6  ;;  %v12609_v3 = vpack.c.bf16 %v10799_v7, %v10798_v1 }
0x2ffd   :  { %12365 = vmatmul.mubr.msk.f32.vlgmr.msra.gmra.mrb[104].mxu0 %vm428_vm11, %v10015_v8  ;;  %12598 = vmatprep.subr.bf16.mxu0 %v12597_v26  ;;  %v10801_v8 = vld [vmem:[#allocation2 + $0x430] sm:$0xff] }
0x2ffe   :  { %12360 = vmatmul.mubr.msk.f32.vlgmr.msra.gmra.mrb[124].mxu1 %vm428_vm11, %v10014_v45  ;;  %12600 = vmatpush3.bf16.msra.mxu0 %v12597_v26  ;;  %v10802_v45 = vld [vmem:[#allocation2 + $0x438] sm:$0xff] }
0x2fff   :  { %v12936_v46 = vpop.eup %12935  ;;  %12368 = vmatpush3.msra.mxu1 %v10550_v5  ;;  %12369 = vmatprep.mubr.msk.f32.mxu1 %vm13009_vm10, %v13006_v6  ;;  %v10803_v5 = vld [vmem:[#allocation2 + $0x440] sm:$0xff] }
0x3000   :  { %v10016_v23 = vmul.f32 %v12936_v46, %v14457_v9  ;;  %12602 = vmatprep.subr.bf16.mxu0 %v12601_v56  ;;  %12606 = vmatprep.subr.bf16.mxu1 %v12605_v42  ;;  %v12613_v46 = vpack.c.bf16 %v10802_v45, %v10801_v8 }
0x3002   :  { %12370 = vmatmul.mubr.msk.f32.vlgmr.msra.gmra.mrb[126].mxu1 %vm428_vm11, %v10016_v23  ;;  %12604 = vmatpush3.bf16.msra.mxu0 %v12601_v56  ;;  %v10804_v23 = vld [vmem:[#allocation2 + $0x448] sm:$0xff] }
0x3003   :  { %12608 = vmatpush3.bf16.msra.mxu1 %v12605_v42  ;;  %12614 = vmatprep.subr.bf16.mxu0 %v12613_v46 }
0x3004   :  { %12610 = vmatprep.subr.bf16.mxu1 %v12609_v3 }
0x3007   :  { %12612 = vmatpush3.bf16.msra.mxu1 %v12609_v3 }
0x306f   :  { %v10165_v55 = vpop.f32.mrb[120].mxu1 }
0x3070   :  { %v12341_v59 = vpop.f32.mrb[121].mxu1 }
0x3071   :  { %v10805_v59 = vld [vmem:[#allocation2 + $0x450] sm:$0xff] }
0x3073   :  { %v10089_v18 = vpop.f32.mrb[98].mxu0 }
0x3074   :  { %v12336_v43 = vpop.f32.mrb[99].mxu0 }
0x30c8   :  { %v10241_v47 = vpop.f32.mrb[100].mxu0 }
0x30c9   :  { %v12346_v6 = vpop.f32.mrb[101].mxu0  ;;  %10627 = vrot.lane.b32.xlu0 %v10241_v47, %s13004_s29 }
0x30cc   :  { %v10393_v52 = vpop.f32.mrb[102].mxu0 }
0x30cd   :  { %v10317_v53 = vpop.f32.mrb[122].mxu1  ;;  %10635 = vrot.lane.b32.xlu0 %v10393_v52, %s13013_s20  ;;  %v12356_v54 = vpop.f32.mrb[103].mxu0 }
0x30ce   :  { %10629 = vrot.lane.b32.xlu1 %v10317_v53, %s13004_s29  ;;  %v12351_v32 = vpop.f32.mrb[123].mxu1 }
0x30d0   :  { %v10545_v62 = vpop.f32.mrb[104].mxu0 }
0x30d1   :  { %v10469_v2 = vpop.f32.mrb[124].mxu1  ;;  %10643 = vrot.lane.b32.xlu0 %v10545_v62, %s13014_s21  ;;  %v12366_v29 = vpop.f32.mrb[105].mxu0 }
0x30d2   :  { %10637 = vrot.lane.b32.xlu1 %v10469_v2, %s13013_s20  ;;  %v12361_v15 = vpop.f32.mrb[125].mxu1 }
0x30d5   :  { %v10621_v13 = vpop.f32.mrb[126].mxu1 }
0x30d6   :  { %10645 = vrot.lane.b32.xlu1 %v10621_v13, %s13014_s21  ;;  %v12371_v16 = vpop.f32.mrb[127].mxu1  ;;  %v11287_v13 = vld [vmem:[#allocation2 + $0x3f8] ss:$0 sm:$0xff] }
0x313b   :  { %v10628_v22 = vpop.permute.xlu0 %10627 }
0x313c   :  { %v10649_v57 = vsel %vm428_vm11, %v10089_v18, %v10628_v22  ;;  %v10806_v18 = vld [vmem:[#allocation2 + $0x458] sm:$0xff] }
0x313d   :  { %v12621_v43 = vpack.c.bf16 %v10806_v18, %v10805_v59 }
0x313f   :  { %v10636_v61 = vpop.permute.xlu0 %10635 }
0x3140   :  { %v10630_v58 = vpop.permute.xlu1 %10629  ;;  %v10651_v36 = vsel %vm65_vm0, %v10649_v57, %v10636_v61  ;;  %v11288_v61 = vld [vmem:[#allocation2 + $0x400] ss:$0 sm:$0xff] }
0x3141   :  { %v10650_v9 = vsel %vm428_vm11, %v10165_v55, %v10630_v58  ;;  %v12617_v55 = vpack.c.bf16 %v10804_v23, %v10803_v5 }
0x3143   :  { %v10644_v21 = vpop.permute.xlu0 %10643 }
0x3144   :  { %v10653_v0 = vsel %vm1759_vm14, %v10651_v36, %v10644_v21  ;;  %v10638_v49 = vpop.permute.xlu1 %10637 }
0x3145   :  { %12380 = vmatprep.mubr.msk.f32.mxu0 %vm251_vm3, %v10653_v0  ;;  %v10652_v12 = vsel %vm65_vm0, %v10650_v9, %v10638_v49  ;;  %v10807_v9 = vld [vmem:[#allocation2 + $0x460] sm:$0xff] }
0x3148   :  { %v10646_v14 = vpop.permute.xlu1 %10645 }
0x3149   :  { %v10654_v24 = vsel %vm1759_vm14, %v10652_v12, %v10646_v14  ;;  %v10808_v12 = vld [vmem:[#allocation2 + $0x468] sm:$0xff] }
0x314a   :  { %12381 = vmatmul.mubr.msk.f32.vlgmr.msra.gmra.mrb[106].mxu0 %vm251_vm3, %v10654_v24  ;;  %v12625_v14 = vpack.c.bf16 %v10808_v12, %v10807_v9  ;;  %v11289_v24 = vld [vmem:[#allocation2 + $0x428] ss:$0 sm:$0xff] }
0x314b   :  { %12616 = vmatpush3.bf16.msra.mxu0 %v12613_v46 }
0x314c   :  { %12618 = vmatprep.subr.bf16.mxu0 %v12617_v55 }
0x314f   :  { %12620 = vmatpush3.bf16.msra.mxu0 %v12617_v55 }
0x3150   :  { %12622 = vmatprep.subr.bf16.mxu0 %v12621_v43 }
0x3153   :  { %12624 = vmatpush3.bf16.msra.mxu0 %v12621_v43 }
0x3154   :  { %12626 = vmatprep.subr.bf16.mxu0 %v12625_v14 }
0x3157   :  { %12628 = vmatpush3.bf16.msra.mxu0 %v12625_v14 }
0x321d   :  { %v12382_v19 = vpop.f32.mrb[106].mxu0 }
0x321e   :  { %v10737_v20 = vadd.f32 %v12382_v19, %v11284_v17  ;;  %v10731_v27 = vpop.f32.mrb[107].mxu0 }
0x321f   :  { %v10732_v28 = vadd.f32 %v11284_v17, %v10731_v27 }
0x3220   :  { %v14507_v30 = vadd.f32 %v10737_v20, %v14291_v25 }
0x3221   :  { %v14510_v4 = vadd.f32 %v10732_v28, %v14294_v10 }
0x3222   :  { %v10747_v51 = vsel %vm251_vm3, %v14507_v30, 0.0 }
0x3223   :  { %10748 = vadd.xlane.f32.xlu1 %v10747_v51  ;;  %v10744_v44 = vsel %vm251_vm3, %v14510_v4, 0.0 }
0x3224   :  { %10745 = vadd.xlane.f32.xlu0 %v10744_v44  ;;  %v11292_v44 = vld [vmem:[#allocation2 + $0x470] ss:$0 sm:$0xff] }
0x32b0   :  { %v10749_v33 = vpop.xlane.xlu1 %10748 }
0x32b1   :  { %v10751_v34 = vmul.f32 0.03125, %v10749_v33  ;;  %v10746_v35 = vpop.xlane.xlu0 %10745 }
0x32b2   :  { %v10750_v38 = vmul.f32 0.03125, %v10746_v35 }
0x32b3   :  { %v10753_v11 = vsub.f32 %v14507_v30, %v10751_v34 }
0x32b4   :  { %v10752_v25 = vsub.f32 %v14510_v4, %v10750_v38 }
0x32b5   :  { %v10755_v63 = vmul.f32 %v10753_v11, %v10753_v11  ;;  %v10787_v57 = vmul.f32 %v11287_v13, %v10753_v11 }
0x32b6   :  { %v10754_v39 = vmul.f32 %v10752_v25, %v10752_v25  ;;  %v10786_v16 = vmul.f32 %v11287_v13, %v10752_v25 }
0x32b7   :  { %v10759_v41 = vsel %vm251_vm3, %v10755_v63, 0.0 }
0x32b8   :  { %v10756_v10 = vsel %vm251_vm3, %v10754_v39, 0.0 }
0x32b9   :  { %10757 = vadd.xlane.f32.xlu0 %v10756_v10 }
0x32bd   :  { %10760 = vadd.xlane.f32.xlu0 %v10759_v41 }
0x3346   :  { %v10758_v31 = vpop.xlane.xlu0 %10757 }
0x3347   :  { %v10762_v48 = vmul.f32 0.032258064, %v10758_v31 }
0x3349   :  { %12937 = vrsqrt.f32 %v10762_v48  ;;  %vm10766_vm0 = vcmp.eq.f32.partialorder %v10762_v48, inf  ;;  %v10769_v47 = vand.u32 2147483648, %v10762_v48  ;;  %vm10768_vm10 = vcmp.eq.f32.partialorder %v10762_v48, 0.0 }
0x334a   :  { %v10761_v26 = vpop.xlane.xlu0 %10760 }
0x334b   :  { %v10763_v50 = vmul.f32 0.032258064, %v10761_v26 }
0x334d   :  { %12939 = vrsqrt.f32 %v10763_v50  ;;  %vm10773_vm11 = vcmp.eq.f32.partialorder %v10763_v50, inf  ;;  %v10776_v62 = vand.u32 2147483648, %v10763_v50  ;;  %vm10775_vm14 = vcmp.eq.f32.partialorder %v10763_v50, 0.0 }
0x3353   :  { %v12938_v60 = vpop.eup %12937 }
0x3354   :  { %v10765_v56 = vmul.f32 %v12938_v60, %v10762_v48 }
0x3356   :  { %v10767_v6 = vsel %vm10766_vm0, %v10762_v48, %v10765_v56 }
0x3357   :  { %v12940_v52 = vpop.eup %12939  ;;  %v10770_v53 = vsel %vm10768_vm10, %v10769_v47, %v10767_v6  ;;  %v11295_v6 = vld [vmem:[#allocation2 + $0x478] ss:$0 sm:$0xff] }
0x3358   :  { %v10772_v54 = vmul.f32 %v12940_v52, %v10763_v50  ;;  %v10778_v32 = vadd.f32 1e-06, %v10770_v53 }
0x335a   :  { %v10774_v2 = vsel %vm10773_vm11, %v10763_v50, %v10772_v54  ;;  %12941 = vrcp.f32 %v10778_v32  ;;  %v11296_v32 = vld [vmem:[#allocation2 + $0x480] ss:$0 sm:$0xff] }
0x335b   :  { %v10777_v29 = vsel %vm10775_vm14, %v10776_v62, %v10774_v2 }
0x335c   :  { %v10779_v15 = vadd.f32 1e-06, %v10777_v29 }
0x335e   :  { %12943 = vrcp.f32 %v10779_v15 }
0x3364   :  { %v12942_v22 = vpop.eup %12941 }
0x3365   :  { %v10788_v58 = vmul.f32 %v12942_v22, %v10786_v16 }
0x3367   :  { %v10794_v36 = vadd.f32 %v11288_v61, %v10788_v58 }
0x3368   :  { %v12944_v21 = vpop.eup %12943 }
0x3369   :  { %v10789_v0 = vmul.f32 %v12944_v21, %v10787_v57  ;;  %12391 = vmatprep.mubr.msk.f32.mxu1 %vm251_vm3, %v10794_v36 }
0x336b   :  { %v10795_v49 = vadd.f32 %v11288_v61, %v10789_v0 }
0x336d   :  { %12392 = vmatmul.mubr.msk.f32.vlgmr.msra.gmra.mrb[128].mxu1 %vm251_vm3, %v10795_v49 }
0x3440   :  { %v12393_v17 = vpop.f32.mrb[128].mxu1 }
0x3441   :  { %v10892_v19 = vadd.f32 %v12393_v17, %v11289_v24  ;;  %v10886_v20 = vpop.f32.mrb[129].mxu1 }
0x3442   :  { %v10887_v27 = vadd.f32 %v11289_v24, %v10886_v20 }
0x3443   :  { %v10896_v51 = vmax.f32 %v10892_v19, 0.0 }
0x3444   :  { %v10895_v28 = vmax.f32 %v10887_v27, 0.0 }
0x3446   :  { %12410 = vmatprep.mubr.msk.f32.mxu0 %vm2008_vm5, %v10895_v28 }
0x3447   :  { %12411 = vmatmul.mubr.msk.f32.vlgmr.msra.gmra.mrb[108].mxu0 %vm2008_vm5, %v10896_v51 }
0x351a   :  { %v12412_v33 = vpop.f32.mrb[108].mxu0 }
0x351b   :  { %v10979_v34 = vadd.f32 %v12412_v33, %v11292_v44  ;;  %v10973_v35 = vpop.f32.mrb[109].mxu0 }
0x351c   :  { %v10974_v38 = vadd.f32 %v11292_v44, %v10973_v35 }
0x351d   :  { %v10983_v11 = vadd.f32 %v10979_v34, %v14507_v30 }
0x351e   :  { %v10982_v25 = vadd.f32 %v10974_v38, %v14510_v4 }
0x351f   :  { %v10989_v39 = vsel %vm251_vm3, %v10983_v11, 0.0 }
0x3520   :  { %10990 = vadd.xlane.f32.xlu0 %v10989_v39  ;;  %v10986_v10 = vsel %vm251_vm3, %v10982_v25, 0.0 }
0x3521   :  { %10987 = vadd.xlane.f32.xlu1 %v10986_v10 }
0x35ad   :  { %v10991_v63 = vpop.xlane.xlu0 %10990 }
0x35ae   :  { %v10993_v41 = vmul.f32 0.03125, %v10991_v63  ;;  %v10988_v37 = vpop.xlane.xlu1 %10987 }
0x35af   :  { %v10992_v40 = vmul.f32 0.03125, %v10988_v37 }
0x35b0   :  { %v10995_v1 = vsub.f32 %v10983_v11, %v10993_v41 }
0x35b1   :  { %v10994_v42 = vsub.f32 %v10982_v25, %v10992_v40 }
0x35b2   :  { %v10997_v7 = vmul.f32 %v10995_v1, %v10995_v1  ;;  %v11029_v52 = vmul.f32 %v11295_v6, %v10995_v1 }
0x35b3   :  { %v10996_v3 = vmul.f32 %v10994_v42, %v10994_v42  ;;  %v11028_v54 = vmul.f32 %v11295_v6, %v10994_v42 }
0x35b4   :  { %v11001_v8 = vsel %vm251_vm3, %v10997_v7, 0.0 }
0x35b5   :  { %11002 = vadd.xlane.f32.xlu0 %v11001_v8  ;;  %v10998_v30 = vsel %vm251_vm3, %v10996_v3, 0.0 }
0x35b6   :  { %10999 = vadd.xlane.f32.xlu1 %v10998_v30 }
0x3642   :  { %v11003_v4 = vpop.xlane.xlu0 %11002 }
0x3643   :  { %v11005_v45 = vmul.f32 0.032258064, %v11003_v4  ;;  %v11000_v5 = vpop.xlane.xlu1 %10999 }
0x3644   :  { %v11004_v46 = vmul.f32 0.032258064, %v11000_v5 }
0x3645   :  { %12945 = vrsqrt.f32 %v11005_v45  ;;  %vm11015_vm5 = vcmp.eq.f32.partialorder %v11005_v45, inf  ;;  %v11018_v18 = vand.u32 2147483648, %v11005_v45  ;;  %vm11017_vm12 = vcmp.eq.f32.partialorder %v11005_v45, 0.0 }
0x3646   :  { %12947 = vrsqrt.f32 %v11004_v46  ;;  %vm11008_vm13 = vcmp.eq.f32.partialorder %v11004_v46, inf  ;;  %v11011_v48 = vand.u32 2147483648, %v11004_v46  ;;  %vm11010_vm15 = vcmp.eq.f32.partialorder %v11004_v46, 0.0 }
0x364f   :  { %v12946_v23 = vpop.eup %12945 }
0x3650   :  { %v12948_v55 = vpop.eup %12947  ;;  %v11014_v59 = vmul.f32 %v12946_v23, %v11005_v45 }
0x3651   :  { %v11007_v43 = vmul.f32 %v12948_v55, %v11004_v46 }
0x3652   :  { %v11016_v31 = vsel %vm11015_vm5, %v11005_v45, %v11014_v59 }
0x3653   :  { %v11019_v26 = vsel %vm11017_vm12, %v11018_v18, %v11016_v31  ;;  %v11009_v50 = vsel %vm11008_vm13, %v11004_v46, %v11007_v43 }
0x3654   :  { %v11021_v60 = vadd.f32 1e-06, %v11019_v26  ;;  %v11012_v56 = vsel %vm11010_vm15, %v11011_v48, %v11009_v50 }
0x3655   :  { %v11020_v47 = vadd.f32 1e-06, %v11012_v56 }
0x3656   :  { %12949 = vrcp.f32 %v11021_v60 }
0x3657   :  { %12951 = vrcp.f32 %v11020_v47 }
0x3660   :  { %v12950_v53 = vpop.eup %12949 }
0x3661   :  { %v12952_v62 = vpop.eup %12951  ;;  %v11031_v2 = vmul.f32 %v12950_v53, %v11029_v52 }
0x3662   :  { %v11030_v29 = vmul.f32 %v12952_v62, %v11028_v54 }
0x3663   :  { %v11037_v15 = vadd.f32 %v11296_v32, %v11031_v2 }
0x3664   :  { %v11036_v13 = vadd.f32 %v11296_v32, %v11030_v29 }
0x3665   :  { %11039 = vst.msk [vmem:[#allocation5 + $0x8] sm:$0xff] %vm251_vm3, %v11037_v15 }
0x3666   :  { %11038 = vst.msk [vmem:[#allocation5] sm:$0xff] %vm251_vm3, %v11036_v13 }
0x3667   :  { %12987 = shalt.err (!%p12984_p12)
}
0x3668   :  { %s12988_s7 = scalar_lea.hbm %s14552_s5, 256 }
0x3669   :  { %p12989_p13 = scmp.ne.s32.totalorder %s14552_s5, %s12988_s7  ;;  %p12992_p0 = scmp.lt.u32.totalorder %s12988_s7, %s14552_s5 }
0x366b   :  { %p12994_p1 = pnand %p12992_p0, %p12989_p13 }
0x366d   :  { %12997 = shalt.err (!%p12994_p1)
}
0x366e   :  { %11051 = dma.vmem_to_hbm [thread:$0]  %s11046_s26, 256, %s14552_s5, [#allocation4], %s13003_s28, %s13003_s28, %s13004_s29  }
0x366f   :  { %13000 = dma.done.wait [#allocation4], 256  }
0x3670   :  { %13001 = vsyncadd [#allocation4], 4294967040 }
0x3671   :  { %11055 = vsyncpa [#allocation3], 1 }
0x3672   :  { %11056 = vsyncpa [#allocation4], 1 }

</bundles_post_ra>
